<compile_context>
chip_gen: v7x
topology: tpu7x:2x2x1
jax: 0.10.0
libtpu: 0.0.40
codegen_flags: <defaults>
</compile_context>

<pallas_src>
import functools

import jax
import jax.numpy as jnp
from jax.experimental import pallas as pl
from jax.experimental.pallas import tpu as pltpu

INPUT_DIM = 3 * 64 * 64          # 12288
NUM_CLASSES = 6

N_LANE = 128                     # weight lane padding (canonical MXU RHS width)
N_PAD_OUT = 8                    # output column padding (6 -> 8, sublane friendly)
B_TILE = 256                     # default batch tile; sweep 256-512 (256 fits all gens)


def _round_down_mult8(x):
    return max((x // 8) * 8, 8)


def _linear_kernel(x_ref, w_ref, b_ref, o_ref):
    """o = x @ W + b for one batch tile.

    x_ref: (b_tile, K) f32   -- cast to bf16 on the VPU (hidden under the DMA).
    w_ref: (K, 128)    bf16  -- resident, lane-dense canonical MXU RHS.
    b_ref: (1, 8)      f32   -- resident.
    o_ref: (b_tile, 8) f32
    """
    x_bf = x_ref[...].astype(jnp.bfloat16)
    acc = jnp.dot(x_bf, w_ref[...], preferred_element_type=jnp.float32)  # (b_tile, 128)
    o_ref[...] = acc[:, :N_PAD_OUT] + b_ref[...]


@functools.partial(jax.jit, static_argnames=("b_tile",))
def linear_classifier_forward(x, w_kn, b_pad, *, b_tile=B_TILE):
    """x: (B, 12288) f32; w_kn: (12288, 128) bf16; b_pad: (1, 8) f32.

    Returns (B, 6) f32 logits == torch.nn.Linear(12288, 6)(x) with bf16
    operands and f32 accumulation.
    """
    batch, k_dim = x.shape
    assert k_dim == INPUT_DIM

    if batch < 8:
        # Sub-tile batch: one grid step is pure fixed overhead (and leaves a
        # v7x TensorCore idle) -> plain XLA dot with identical math.
        logits = jnp.dot(x.astype(jnp.bfloat16), w_kn[:, :NUM_CLASSES],
                         preferred_element_type=jnp.float32)
        return logits + b_pad[0, :NUM_CLASSES]

    # Largest multiple of 8 that (a) the caller asked for and (b) does not
    # exceed the batch, so blocks never exceed the array; the last (ragged)
    # block is masked by Pallas automatically.
    b_tile_eff = min(_round_down_mult8(b_tile), _round_down_mult8(batch))
    n_tiles = pl.cdiv(batch, b_tile_eff)

    # VMEM budget: double-buffered f32 x tile + double-buffered bf16 W + slack,
    # clamped to v7x's 64 MiB physical VMEM (v5e/v6e have 128 MiB, no issue).
    vmem_needed = (2 * b_tile_eff * INPUT_DIM * 4
                   + 2 * INPUT_DIM * N_LANE * 2
                   + 2 * b_tile_eff * N_PAD_OUT * 4
                   + (2 << 20))
    vmem_limit = int(min(max(vmem_needed, 32 << 20), 64 << 20))

    out = pl.pallas_call(
        _linear_kernel,
        out_shape=jax.ShapeDtypeStruct((batch, N_PAD_OUT), jnp.float32),
        grid_spec=pltpu.PrefetchScalarGridSpec(
            num_scalar_prefetch=0,
            grid=(n_tiles,),
            in_specs=[
                pl.BlockSpec((b_tile_eff, INPUT_DIM), lambda i: (i, 0)),  # x stream
                pl.BlockSpec((INPUT_DIM, N_LANE), lambda i: (0, 0)),      # W resident
                pl.BlockSpec((1, N_PAD_OUT), lambda i: (0, 0)),           # bias resident
            ],
            out_specs=pl.BlockSpec((b_tile_eff, N_PAD_OUT), lambda i: (i, 0)),
        ),
        compiler_params=pltpu.CompilerParams(
            dimension_semantics=("parallel",),   # independent batch tiles -> v7x 2 TCs
            vmem_limit_bytes=vmem_limit,
        ),
    )(x, w_kn, b_pad)

    return out[:, :NUM_CLASSES]


def init_params(key):
    """Deterministic params matching torch.nn.Linear(INPUT_DIM, 6) default init:
    U(-1/sqrt(K), 1/sqrt(K)) for weight and bias."""
    kw, kb = jax.random.split(key)
    bound = 1.0 / jnp.sqrt(jnp.float32(INPUT_DIM))
    w = jax.random.uniform(kw, (NUM_CLASSES, INPUT_DIM), jnp.float32, -bound, bound)
    b = jax.random.uniform(kb, (NUM_CLASSES,), jnp.float32, -bound, bound)

    # (K, 128) bf16, classes on the lane axis (canonical MXU RHS; resident per call).
    w_kn = (jnp.zeros((INPUT_DIM, N_LANE), jnp.bfloat16)
            .at[:, :NUM_CLASSES].set(w.T.astype(jnp.bfloat16)))
    b_pad = jnp.zeros((1, N_PAD_OUT), jnp.float32).at[0, :NUM_CLASSES].set(b)
    return w, b, w_kn, b_pad


if __name__ == "__main__":
    key = jax.random.PRNGKey(0)
    k_params, k_x = jax.random.split(key)

    w, b, w_kn, b_pad = init_params(k_params)

    # Small demo batch, deliberately NOT tile-aligned so the ragged last tile
    # (masked writeback, no jnp.pad) is exercised.
    batch = 20
    x = jax.random.normal(k_x, (batch, INPUT_DIM), jnp.float32)

    # Small tile -> 3 grid steps (multi-tile "parallel" axis + ragged tail).
    out = linear_classifier_forward(x, w_kn, b_pad, b_tile=8)
    out = jax.block_until_ready(out)
    assert out.shape == (batch, NUM_CLASSES)

    # Default (large) tile path: clamped to the batch, still a ragged boundary.
    out_default = jax.block_until_ready(linear_classifier_forward(x, w_kn, b_pad))
    assert out_default.shape == (batch, NUM_CLASSES)

    # Precision-matched reference: same bf16-cast operands, f32 accumulation.
    x_m = x.astype(jnp.bfloat16).astype(jnp.float32)
    w_m = w.astype(jnp.bfloat16).astype(jnp.float32)
    ref = x_m @ w_m.T + b
    assert jnp.allclose(out, ref, atol=2e-3, rtol=2e-3), "mismatch vs bf16-matched reference"
    assert jnp.allclose(out_default, ref, atol=2e-3, rtol=2e-3), "mismatch (default tile)"

    # Loose sanity check against the full-f32 reference (bf16 rounding only).
    ref_f32 = x @ w.T + b
    assert jnp.allclose(out, ref_f32, atol=5e-2, rtol=5e-2), "mismatch vs f32 reference"

    print("KERNEL_OK")
</pallas_src>

<mosaic_0001>
module attributes {stable_mosaic.version = 11 : i64} {
  func.func @_linear_kernel(%arg0: i32, %arg1: memref<8x12288xf32, #tpu.memory_space<vmem>>, %arg2: memref<12288x128xbf16, #tpu.memory_space<vmem>>, %arg3: memref<1x8xf32, #tpu.memory_space<vmem>>, %arg4: memref<8x8xf32, #tpu.memory_space<vmem>>) attributes {dimension_semantics = [#tpu.dimension_semantics<parallel>], iteration_bounds = array<i64: 3>, scalar_prefetch = 0 : i64, scratch_operands = 0 : i64, tpu.core_type = #tpu.core_type<tc>, window_params = [{transform_indices = @transform_0, window_bounds = array<i64: 8, 12288>}, {pipeline_mode = #tpu.pipeline_mode<synchronous>, transform_indices = @transform_1, window_bounds = array<i64: 12288, 128>}, {pipeline_mode = #tpu.pipeline_mode<synchronous>, transform_indices = @transform_2, window_bounds = array<i64: 1, 8>}, {transform_indices = @transform_3, window_bounds = array<i64: 8, 8>}]} {
    %c0 = arith.constant 0 : index
    %c0_0 = arith.constant 0 : index
    %0 = vector.load %arg1[%c0, %c0_0] : memref<8x12288xf32, #tpu.memory_space<vmem>>, vector<8x12288xf32>
    %1 = arith.truncf %0 : vector<8x12288xf32> to vector<8x12288xbf16>
    %c0_1 = arith.constant 0 : index
    %c0_2 = arith.constant 0 : index
    %2 = vector.load %arg2[%c0_1, %c0_2] : memref<12288x128xbf16, #tpu.memory_space<vmem>>, vector<12288x128xbf16>
    %cst = arith.constant dense<0.000000e+00> : vector<8x128xf32>
    %3 = tpu.matmul %1, %2, %cst {dimension_numbers = #tpu.dot_dimension_numbers<[1], [0], [0], [1], [0, 0, 1, 1], [], []>} : vector<8x12288xbf16>, vector<12288x128xbf16>, vector<8x128xf32> -> vector<8x128xf32>
    %4 = vector.extract_strided_slice %3 {offsets = [0, 0], sizes = [8, 8], strides = [1, 1]} : vector<8x128xf32> to vector<8x8xf32>
    %c0_3 = arith.constant 0 : index
    %c0_4 = arith.constant 0 : index
    %5 = vector.load %arg3[%c0_3, %c0_4] : memref<1x8xf32, #tpu.memory_space<vmem>>, vector<1x8xf32>
    %6 = vector.broadcast %5 : vector<1x8xf32> to vector<8x8xf32>
    %7 = arith.addf %4, %6 : vector<8x8xf32>
    %c0_5 = arith.constant 0 : index
    %c0_6 = arith.constant 0 : index
    %8 = vector.load %arg4[%c0_5, %c0_6] : memref<8x8xf32, #tpu.memory_space<vmem>>, vector<8x8xf32>
    tpu.vector_store %arg4[%c0_5, %c0_6], %7 {strides = array<i32>} : memref<8x8xf32, #tpu.memory_space<vmem>>, vector<8x8xf32>,
    return
  }
  func.func @transform_0(%arg0: i32) -> (i32, i32) {
    %c0_i32 = arith.constant 0 : i32
    %c0_i32_0 = arith.constant 0 : i32
    return %arg0, %c0_i32 : i32, i32
  }
  func.func @transform_1(%arg0: i32) -> (i32, i32) {
    %c0_i32 = arith.constant 0 : i32
    %c0_i32_0 = arith.constant 0 : i32
    %c0_i32_1 = arith.constant 0 : i32
    return %c0_i32, %c0_i32_0 : i32, i32
  }
  func.func @transform_2(%arg0: i32) -> (i32, i32) {
    %c0_i32 = arith.constant 0 : i32
    %c0_i32_0 = arith.constant 0 : i32
    %c0_i32_1 = arith.constant 0 : i32
    return %c0_i32, %c0_i32_0 : i32, i32
  }
  func.func @transform_3(%arg0: i32) -> (i32, i32) {
    %c0_i32 = arith.constant 0 : i32
    %c0_i32_0 = arith.constant 0 : i32
    return %arg0, %c0_i32 : i32, i32
  }
}

</mosaic_0001>

<bundles_post_ra>
// kernel: linear_classifier_forward.1
= control target key start
LH: loop header
LB: loop body
LE: loop exit
PB: predicated region body
PF: predicated region fallthrough
CT: control target
= control target key end

     0   :  { %8 = vsyncpa [#allocation3], 0  ;;  %s11705_s0 = inlined_call_operand.hbm [shape: f32[20,12288], index: 0, kind: input, shape index: {}]   ;;  %s11706_s1 = inlined_call_operand.hbm [shape: bf16[12288,128], index: 1, kind: input, shape index: {}]   ;;  %s11707_s2 = inlined_call_operand.hbm [shape: f32[1,8], index: 2, kind: input, shape index: {}]   ;;  %s11708_s3 = inlined_call_operand.vmem [shape: f32[20,8], index: 3, kind: output, shape index: {}]  }
   0x1   :  { %10 = vsyncpa [#allocation3 + $0x1], 0 }
   0x2   :  { %11 = vsyncpa [#allocation5], 0  ;;  %s11386_s12 = smov 0   ;;  %s11388_s13 = smov 0  }
   0x3   :  { %s11390_s14 = smov 0   ;;  %s11392_s15 = smov 0  }
   0x4 LB: > { %s11405_s16 = sadd.s32 4294967295, %s11359_s15   ;;  %p37_p0 = scmp.ne.s32.totalorder %s11351_s13, %s11347_s12  ;;  %s11359_s15 = sphi %s11392_s15, %s11723_s15   ;;  %s11355_s14 = sphi %s11390_s14, %s11722_s14   ;;  %s11351_s13 = sphi %s11388_s13, %s11721_s13   ;;  %s11347_s12 = sphi %s11386_s12, %s11720_s12  }
   0x5   : > { %p11709_p1 = scmp.eq.s32.totalorder %s11405_s16, 0  ;;  %p8566_p2 = scmp.ge.s32.totalorder %s11359_s15, 1 }
   0x6   : > { %p116_p3 = scmp.lt.s32.totalorder %s11359_s15, 4  ;;  %s11361_s19 = smov [#allocation4]  }
   0x7   : > { %p11413_p4 = por %p11709_p1, %p37_p0  ;;  %s128_s20 = sshll.u32 %s11361_s19, 4  ;;  %s129_s20 = int_to_ptr.vmem [resolvable:$true] %s128_s20 }
   0x8   : > { %p11417_p5 = pnand %p8566_p2, %p116_p3  ;;  %s11362_s22 = smov [#allocation6]  }
   0x9   : > { %s11712_s17 = scalar_select %p11413_p4, 1, 0 }
   0xa   : > { %s11713_s18 = scalar_select %p11417_p5, 1, 0 }
   0xb   : > { %p10415_p6 = pneg %p11417_p5  ;;  %s142_s23 = sshll.u32 %s11362_s22, 4  ;;  %s11429_s23 = int_to_ptr.vmem [resolvable:$true] %s142_s23 }
   0xc   : > { %s11235_s26 = scalar_lea.hbm %s11706_s1, 98304 }
   0xd   : > { %p11425_p7 = pnand %p10415_p6, %p11709_p1  ;;  %p11236_p8 = scmp.ne.s32.totalorder %s11706_s1, %s11235_s26 }
   0xe   : > { %p11242_p12 = scmp.lt.u32.totalorder %s11235_s26, %s11706_s1 }
   0xf   : > { %p11237_p9 = pneg %p11425_p7 }
  0x11   : > { %p11238_p10 = pnand %p11237_p9, %p11236_p8 }
  0x13   : > { %p11239_p11 = pneg %p11238_p10 }
  0x15   : > { %p11244_p13 = pnand %p11242_p12, %p11239_p11 }
  0x17   : > { %11247 = shalt.err (!%p11244_p13)
}
  0x18   : > { %s11248_s4 = scalar_lea.vmem %s129_s20, 98304  ;;  %p11256_p6 = scmp.lt.s32.totalorder %s129_s20, %s129_s20 }
  0x19   : > { %p11249_p0 = scmp.ne.s32.totalorder %s129_s20, %s11248_s4  ;;  %p11257_p1 = scmp.lt.s32.totalorder %s11248_s4, %s11248_s4 }
  0x1b   : > { %p11251_p2 = pnand %p11249_p0, %p11237_p9  ;;  %p11258_p4 = por %p11257_p1, %p11256_p6 }
  0x1d   : > { %p11252_p3 = pneg %p11251_p2 }
  0x1f   : > { %p11259_p5 = pnand %p11258_p4, %p11252_p3 }
  0x21   : > { %11262 = shalt.err (!%p11259_p5)
}
  0x22   : > { %s11363_s5 = smov 64   ;;  %s11364_s6 = smov 4  }
  0x23   : > { %10418 = dma.hbm_to_vmem [thread:$0]  (!%p11425_p7), %s11706_s1, 98304, %s129_s20, [#allocation5], %s11363_s5, %s11363_s5, %s11364_s6  }
  0x24   : > { %s11263_s11 = scalar_lea.hbm %s11707_s2, 16 }
  0x25   : > { %p11264_p8 = scmp.ne.s32.totalorder %s11707_s2, %s11263_s11  ;;  %p11270_p5 = scmp.lt.u32.totalorder %s11263_s11, %s11707_s2 }
  0x27   : > { %p11266_p1 = pnand %p11264_p8, %p11237_p9 }
  0x29   : > { %p11267_p4 = pneg %p11266_p1 }
  0x2b   : > { %p11272_p10 = pnand %p11270_p5, %p11267_p4 }
  0x2d   : > { %11275 = shalt.err (!%p11272_p10)
}
  0x2e   : > { %s11276_s20 = scalar_lea.vmem %s11429_s23, 16  ;;  %s11283_s25 = scalar_lea.vmem %s11429_s23, 32 }
  0x2f   : > { %p11277_p11 = scmp.ne.s32.totalorder %s11429_s23, %s11276_s20  ;;  %p11284_p0 = scmp.lt.s32.totalorder %s11429_s23, %s11429_s23 }
  0x30   : > { %p11285_p2 = scmp.lt.s32.totalorder %s11283_s25, %s11276_s20 }
  0x31   : > { %p11279_p12 = pnand %p11277_p11, %p11237_p9 }
  0x32   : > { %p11286_p3 = por %p11285_p2, %p11284_p0 }
  0x33   : > { %p11280_p13 = pneg %p11279_p12 }
  0x35   : > { %p11287_p6 = pnand %p11286_p3, %p11280_p13 }
  0x37   : > { %11290 = shalt.err (!%p11287_p6)
}
  0x38   : > { %10421 = dma.hbm_to_vmem [thread:$0]  (!%p11425_p7), %s11707_s2, 16, %s11429_s23, [#allocation5]  }
  0x39   : > { %s11480_s28 = sadd.s32 1, %s11359_s15   ;;  %s24_s29 = sadd.s32 1, %s11355_s14 }
  0x3a   : > { %s21_s21 = ssub.s32 %s11359_s15, %s11480_s28  ;;  %p31_p9 = scmp.ne.s32.totalorder %s11355_s14, %s11351_s13 }
  0x3b   : > { %p22_p8 = scmp.eq.s32.totalorder %s21_s21, 0  ;;  %p32_p1 = scmp.eq.s32.totalorder %s11359_s15, 0 }
  0x3c   : > { %p10428_p4 = scmp.lt.s32.totalorder %s11359_s15, 3  ;;  %s153_s30 = sand.u32 1, %s11355_s14  }
  0x3d   : > { %s11491_s4 = scalar_select %p22_p8, %s11355_s14, %s24_s29  }
  0x3e   : > { %p33_p5 = por %p32_p1, %p31_p9  ;;  %s10402_s5 = smul.u32 768, %s153_s30 }
  0x3f   : > { %s10403_s6 = smul.u32 12288, %s11359_s15  ;;  %s154_s15 = scalar_lea.sflag [#allocation3], %s153_s30 }
  0x40   : > { %p11494_p10 = pnand %p10428_p4, %p33_p5  ;;  %s157_s10 = scalar_lea.vmem [#allocation2], %s10402_s5 }
  0x41   : > { %s11501_s9 = scalar_lea.hbm %s11705_s0, %s10403_s6  ;;  %s165_s11 = sshll.u32 %s157_s10, 4  ;;  %s11503_s11 = int_to_ptr.vmem [resolvable:$true] %s165_s11 }
  0x42   : > { %s11291_s12 = scalar_lea.hbm %s11501_s9, 12288  ;;  %p11293_p11 = pneg %p11494_p10 }
  0x43   : > { %p11292_p7 = scmp.ne.s32.totalorder %s11501_s9, %s11291_s12  ;;  %s11296_s24 = scalar_lea.hbm %s11705_s0, 36864 }
  0x44   : > { %p11297_p0 = scmp.lt.u32.totalorder %s11501_s9, %s11705_s0  ;;  %p11298_p2 = scmp.lt.u32.totalorder %s11296_s24, %s11291_s12 }
  0x45   : > { %p11294_p12 = pnand %p11293_p11, %p11292_p7  ;;  %p11300_p6 = scmp.lt.u32.totalorder %s11291_s12, %s11501_s9 }
  0x46   : > { %p11299_p3 = por %p11298_p2, %p11297_p0 }
  0x47   : > { %p11295_p13 = pneg %p11294_p12 }
  0x48   : > { %p11301_p9 = por %p11300_p6, %p11299_p3 }
  0x4a   : > { %p11302_p8 = pnand %p11301_p9, %p11295_p13 }
  0x4c   : > { %11305 = shalt.err (!%p11302_p8)
}
  0x4d   : > { %s11306_s26 = scalar_lea.vmem %s11503_s11, 12288  ;;  %s11365_s27 = smov [#allocation2]  }
  0x4e   : > { %p11307_p1 = scmp.ne.s32.totalorder %s11503_s11, %s11306_s26  ;;  %s11311_s29 = sshll.u32 %s11365_s27, 4  ;;  %s11312_s29 = int_to_ptr.vmem [resolvable:$false] %s11311_s29 }
  0x4f   : > { %s11313_s21 = scalar_lea.vmem %s11312_s29, 24576  ;;  %p11314_p7 = scmp.lt.s32.totalorder %s11503_s11, %s11312_s29 }
  0x50   : > { %p11309_p4 = pnand %p11307_p1, %p11293_p11  ;;  %p11315_p12 = scmp.lt.s32.totalorder %s11313_s21, %s11306_s26 }
  0x52   : > { %p11310_p5 = pneg %p11309_p4  ;;  %p11316_p0 = por %p11315_p12, %p11314_p7 }
  0x54   : > { %p11317_p2 = pnand %p11316_p0, %p11310_p5 }
  0x56   : > { %11320 = shalt.err (!%p11317_p2)
}
  0x57   : > { %10425 = dma.hbm_to_vmem [thread:$0]  (!%p11494_p10), %s11501_s9, 12288, %s11503_s11, %s154_s15  }
  0x58   : > { %p11716_p13 = scmp.ne.s32.totalorder %s11713_s18, 0 }
  0x59   : > { %s176_s30 = sand.u32 (!%p11716_p13), 1, %s11351_s13   ;;  %p11717_p11 = scmp.ne.s32.totalorder (!%p11716_p13), %s11712_s17, 0 }
  0x5a   : > { %174 = sbr.rel (%p11716_p13) target bundleno = 1093 (0x445), region = 32  ;;  %s177_s6 = scalar_lea.sflag (!%p11716_p13), [#allocation3], %s176_s30 }
  0x5b   : > { %s10404_s5 = smul.u32 (!%p11716_p13), 768, %s176_s30 }
  0x5d   : > { %s11533_s23 = scalar_lea.vmem (!%p11716_p13), [#allocation2], %s10404_s5 }
  0x61   : > { %11338 = dma.done.wait (%p11717_p11), %s177_s6, 12288  }
  0x62   : > { %11340 = vsyncadd (%p11717_p11), %s177_s6, 4294955008  ;;  %p11718_p3 = scmp.eq.s32.totalorder %s11405_s16, 0 }
  0x64   : > { %11342 = dma.done.wait (%p11718_p3), [#allocation5], 98320   ;;  %p11719_p10 = pmov %p11718_p3 }
  0x65   : > { %v10467_v0 = vld [vmem:[#allocation4 + $0x40] sm:$0xff]   ;;  %v10471_v4 = vld [vmem:[#allocation4 + $0x48] sm:$0xff]   ;;  %v10475_v8 = vld [vmem:[#allocation4 + $0x50] sm:$0xff]   ;;  %p210_p6 = scmp.lt.s32.totalorder %s11405_s16, 2  ;;  %vm8479_vm0 = vcmask 64512  }
  0x66   : > { %11344 = vsyncadd (%p11719_p10), [#allocation5], 4294868976  ;;  %v10468_v1 = vld [vmem:[#allocation4 + $0xc0] sm:$0xff]   ;;  %9346 = vmatprep.subr.bf16.mxu0 %v10467_v0  ;;  %v10472_v5 = vld [vmem:[#allocation4 + $0xc8] sm:$0xff]  }
  0x67   : > { %v10469_v2 = vld [vmem:[#allocation4] sm:$0xff]   ;;  %9368 = vmatprep.subr.bf16.mxu1 %v10468_v1  ;;  %v10473_v6 = vld [vmem:[#allocation4 + $0x8] sm:$0xff]   ;;  %v10476_v9 = vld [vmem:[#allocation4 + $0xd0] sm:$0xff]   ;;  %s11725_s16 = smov (!%p210_p6, %s11405_s16), 2 }
  0x68   : > { %v10470_v3 = vld [vmem:[#allocation4 + $0x80] sm:$0xff]   ;;  %9347 = vmatpush3.bf16.msra.mxu0 %v10469_v2  ;;  %v10474_v7 = vld [vmem:[#allocation4 + $0x88] sm:$0xff]   ;;  %v10477_v10 = vld [vmem:[#allocation4 + $0x10] sm:$0xff]   ;;  %s8574_s17 = sshll.u32 %s11725_s16, 3 }
  0x69   : > { %9369 = vmatpush3.bf16.msra.mxu1 %v10470_v3  ;;  %9348 = vmatprep.subr.bf16.mxu0 %v10471_v4  ;;  %v10478_v11 = vld [vmem:[#allocation4 + $0x90] sm:$0xff]   ;;  %v10479_v12 = vld [vmem:[#allocation4 + $0x58] sm:$0xff]   ;;  %v10483_v16 = vld [vmem:[#allocation4 + $0x60] sm:$0xff]   ;;  %s213_s8 = scalar_lea.vmem %s11708_s3, %s8574_s17 }
  0x6a   : > { %9370 = vmatprep.subr.bf16.mxu1 %v10472_v5  ;;  %v10480_v13 = vld [vmem:[#allocation4 + $0xd8] sm:$0xff]   ;;  %v10484_v17 = vld [vmem:[#allocation4 + $0xe0] sm:$0xff]   ;;  %v10487_v20 = vld [vmem:[#allocation4 + $0x68] sm:$0xff]  }
  0x6b   : > { %v10481_v14 = vld [vmem:[#allocation4 + $0x18] sm:$0xff]   ;;  %v10485_v18 = vld [vmem:[#allocation4 + $0x20] sm:$0xff]   ;;  %v10488_v21 = vld [vmem:[#allocation4 + $0xe8] sm:$0xff]  }
  0x6c   : > { %9349 = vmatpush3.bf16.msra.mxu0 %v10473_v6  ;;  %v10482_v15 = vld [vmem:[#allocation4 + $0x98] sm:$0xff]   ;;  %v10486_v19 = vld [vmem:[#allocation4 + $0xa0] sm:$0xff]   ;;  %v10489_v22 = vld [vmem:[#allocation4 + $0x28] sm:$0xff]  }
  0x6d   : > { %9371 = vmatpush3.bf16.msra.mxu1 %v10474_v7  ;;  %9350 = vmatprep.subr.bf16.mxu0 %v10475_v8  ;;  %v10490_v23 = vld [vmem:[#allocation4 + $0xa8] sm:$0xff]   ;;  %v10491_v24 = vld [vmem:[#allocation4 + $0x70] sm:$0xff]   ;;  %v10495_v28 = vld [vmem:[#allocation4 + $0x78] sm:$0xff]  }
  0x6e   : > { %9372 = vmatprep.subr.bf16.mxu1 %v10476_v9  ;;  %v10492_v25 = vld [vmem:[#allocation4 + $0xf0] sm:$0xff]   ;;  %v10496_v29 = vld [vmem:[#allocation4 + $0xf8] sm:$0xff]   ;;  %v216_v32 = vld [vmem:[%s11533_s23 + $0x8] sm:$0xff] }
  0x6f   : > { %v10493_v26 = vld [vmem:[#allocation4 + $0x30] sm:$0xff]   ;;  %v10497_v30 = vld [vmem:[#allocation4 + $0x38] sm:$0xff]   ;;  %v215_v34 = vld [vmem:[%s11533_s23] sm:$0xff]  ;;  %v312_v35 = vpack.c.bf16 %v216_v32, %v216_v32 }
  0x70   : > { %9351 = vmatpush3.bf16.msra.mxu0 %v10477_v10  ;;  %v10494_v27 = vld [vmem:[#allocation4 + $0xb0] sm:$0xff]   ;;  %v10498_v31 = vld [vmem:[#allocation4 + $0xb8] sm:$0xff]   ;;  %v311_v37 = vpack.c.bf16 %v215_v34, %v215_v34  ;;  %v10499_v40 = vld [vmem:[#allocation4 + $0x140] sm:$0xff]  }
  0x71   : > { %9373 = vmatpush3.bf16.msra.mxu1 %v10478_v11  ;;  %9352 = vmatprep.subr.bf16.mxu0 %v10479_v12  ;;  %v218_v33 = vld [vmem:[%s11533_s23 + $0x18] sm:$0xff]  ;;  %v217_v38 = vld [vmem:[%s11533_s23 + $0x10] sm:$0xff]  ;;  %v10500_v41 = vld [vmem:[#allocation4 + $0x1c0] sm:$0xff]  }
  0x72   : > { %9374 = vmatprep.subr.bf16.mxu1 %v10480_v13  ;;  %v314_v36 = vpack.c.bf16 %v218_v33, %v218_v33  ;;  %v313_v39 = vpack.c.bf16 %v217_v38, %v217_v38  ;;  %6583 = vmatprep.mubr.bf16.mxu0 %v312_v35  ;;  %v10501_v42 = vld [vmem:[#allocation4 + $0x100] sm:$0xff]   ;;  %v10503_v44 = vld [vmem:[#allocation4 + $0x148] sm:$0xff]   ;;  %v10507_v48 = vld [vmem:[#allocation4 + $0x150] sm:$0xff]  }
  0x73   : > { %v10502_v43 = vld [vmem:[#allocation4 + $0x180] sm:$0xff]   ;;  %v10504_v45 = vld [vmem:[#allocation4 + $0x1c8] sm:$0xff]   ;;  %v10508_v49 = vld [vmem:[#allocation4 + $0x1d0] sm:$0xff]  }
  0x74   : > { %9353 = vmatpush3.bf16.msra.mxu0 %v10481_v14  ;;  %6623 = vmatprep.mubr.bf16.mxu1 %v314_v36  ;;  %v10505_v46 = vld [vmem:[#allocation4 + $0x108] sm:$0xff]   ;;  %v10509_v50 = vld [vmem:[#allocation4 + $0x110] sm:$0xff]   ;;  %v10511_v52 = vld [vmem:[#allocation4 + $0x158] sm:$0xff]  }
  0x75   : > { %9375 = vmatpush3.bf16.msra.mxu1 %v10482_v15  ;;  %9354 = vmatprep.subr.bf16.mxu0 %v10483_v16  ;;  %v10506_v47 = vld [vmem:[#allocation4 + $0x188] sm:$0xff]   ;;  %v10510_v51 = vld [vmem:[#allocation4 + $0x190] sm:$0xff]   ;;  %v10512_v53 = vld [vmem:[#allocation4 + $0x1d8] sm:$0xff]  }
  0x76   : > { %9376 = vmatprep.subr.bf16.mxu1 %v10484_v17  ;;  %v10513_v54 = vld [vmem:[#allocation4 + $0x118] sm:$0xff]   ;;  %v10515_v56 = vld [vmem:[#allocation4 + $0x160] sm:$0xff]   ;;  %v10519_v60 = vld [vmem:[#allocation4 + $0x168] sm:$0xff]  }
  0x77   : > { %v10514_v55 = vld [vmem:[#allocation4 + $0x198] sm:$0xff]   ;;  %v10516_v57 = vld [vmem:[#allocation4 + $0x1e0] sm:$0xff]   ;;  %v10520_v61 = vld [vmem:[#allocation4 + $0x1e8] sm:$0xff]  }
  0x78   : > { %9355 = vmatpush3.bf16.msra.mxu0 %v10485_v18  ;;  %v10517_v58 = vld [vmem:[#allocation4 + $0x120] sm:$0xff]   ;;  %v10521_v62 = vld [vmem:[#allocation4 + $0x128] sm:$0xff]   ;;  %v10523_v0 = vld [vmem:[#allocation4 + $0x170] sm:$0xff]  }
  0x79   : > { %9377 = vmatpush3.bf16.msra.mxu1 %v10486_v19  ;;  %9356 = vmatprep.subr.bf16.mxu0 %v10487_v20  ;;  %v10518_v59 = vld [vmem:[#allocation4 + $0x1a0] sm:$0xff]   ;;  %v10522_v63 = vld [vmem:[#allocation4 + $0x1a8] sm:$0xff]   ;;  %v10524_v1 = vld [vmem:[#allocation4 + $0x1f0] sm:$0xff]  }
  0x7a   : > { %9378 = vmatprep.subr.bf16.mxu1 %v10488_v21  ;;  %v10525_v2 = vld [vmem:[#allocation4 + $0x130] sm:$0xff]   ;;  %v10527_v4 = vld [vmem:[#allocation4 + $0x178] sm:$0xff]   ;;  %v220_v8 = vld [vmem:[%s11533_s23 + $0x28] sm:$0xff] }
  0x7b   : > { %v10526_v3 = vld [vmem:[#allocation4 + $0x1b0] sm:$0xff]   ;;  %v10528_v5 = vld [vmem:[#allocation4 + $0x1f8] sm:$0xff]   ;;  %v316_v10 = vpack.c.bf16 %v220_v8, %v220_v8  ;;  %v219_v12 = vld [vmem:[%s11533_s23 + $0x20] sm:$0xff] }
  0x7c   : > { %9357 = vmatpush3.bf16.msra.mxu0 %v10489_v22  ;;  %v10529_v6 = vld [vmem:[#allocation4 + $0x138] sm:$0xff]   ;;  %v221_v13 = vld [vmem:[%s11533_s23 + $0x30] sm:$0xff]  ;;  %v315_v14 = vpack.c.bf16 %v219_v12, %v219_v12  ;;  %v10531_v16 = vld [vmem:[#allocation4 + $0x240] sm:$0xff]  }
  0x7d   : > { %9379 = vmatpush3.bf16.msra.mxu1 %v10490_v23  ;;  %9358 = vmatprep.subr.bf16.mxu0 %v10491_v24  ;;  %v10530_v7 = vld [vmem:[#allocation4 + $0x1b8] sm:$0xff]   ;;  %v317_v15 = vpack.c.bf16 %v221_v13, %v221_v13  ;;  %v10532_v17 = vld [vmem:[#allocation4 + $0x2c0] sm:$0xff]   ;;  %v10535_v20 = vld [vmem:[#allocation4 + $0x248] sm:$0xff]  }
  0x7e   : > { %9380 = vmatprep.subr.bf16.mxu1 %v10492_v25  ;;  %v222_v9 = vld [vmem:[%s11533_s23 + $0x38] sm:$0xff]  ;;  %v10533_v18 = vld [vmem:[#allocation4 + $0x200] sm:$0xff]   ;;  %v10536_v21 = vld [vmem:[#allocation4 + $0x2c8] sm:$0xff]  }
  0x7f   : > { %v318_v11 = vpack.c.bf16 %v222_v9, %v222_v9  ;;  %v10534_v19 = vld [vmem:[#allocation4 + $0x280] sm:$0xff]   ;;  %v10537_v22 = vld [vmem:[#allocation4 + $0x208] sm:$0xff]   ;;  %v10539_v24 = vld [vmem:[#allocation4 + $0x250] sm:$0xff]  }
  0x80   : > { %9359 = vmatpush3.bf16.msra.mxu0 %v10493_v26  ;;  %v10538_v23 = vld [vmem:[#allocation4 + $0x288] sm:$0xff]   ;;  %v10540_v25 = vld [vmem:[#allocation4 + $0x2d0] sm:$0xff]   ;;  %v10547_v32 = vld [vmem:[#allocation4 + $0x260] sm:$0xff]  }
  0x81   : > { %9381 = vmatpush3.bf16.msra.mxu1 %v10494_v27  ;;  %9360 = vmatprep.subr.bf16.mxu0 %v10495_v28  ;;  %v10541_v26 = vld [vmem:[#allocation4 + $0x210] sm:$0xff]   ;;  %v10543_v28 = vld [vmem:[#allocation4 + $0x258] sm:$0xff]   ;;  %v10548_v33 = vld [vmem:[#allocation4 + $0x2e0] sm:$0xff]  }
  0x82   : > { %9382 = vmatprep.subr.bf16.mxu1 %v10496_v29  ;;  %v10542_v27 = vld [vmem:[#allocation4 + $0x290] sm:$0xff]   ;;  %v10544_v29 = vld [vmem:[#allocation4 + $0x2d8] sm:$0xff]   ;;  %v10549_v34 = vld [vmem:[#allocation4 + $0x220] sm:$0xff]  }
  0x83   : > { %v10550_v35 = vld [vmem:[#allocation4 + $0x2a0] sm:$0xff]   ;;  %v10551_v36 = vld [vmem:[#allocation4 + $0x268] sm:$0xff]  }
  0x84   : > { %9361 = vmatpush3.bf16.msra.mxu0 %v10497_v30  ;;  %v10545_v30 = vld [vmem:[#allocation4 + $0x218] sm:$0xff]   ;;  %v10553_v38 = vld [vmem:[#allocation4 + $0x228] sm:$0xff]   ;;  %v10579_v8 = vld [vmem:[#allocation4 + $0x360] sm:$0xff]  }
  0x85   : > { %9383 = vmatpush3.bf16.msra.mxu1 %v10498_v31  ;;  %9390 = vmatprep.subr.bf16.mxu0 %v10499_v40  ;;  %v10546_v31 = vld [vmem:[#allocation4 + $0x298] sm:$0xff]   ;;  %v10555_v40 = vld [vmem:[#allocation4 + $0x270] sm:$0xff]   ;;  %v10580_v9 = vld [vmem:[#allocation4 + $0x3e0] sm:$0xff]  }
  0x86   : > { %9412 = vmatprep.subr.bf16.mxu1 %v10500_v41  ;;  %v10556_v41 = vld [vmem:[#allocation4 + $0x2f0] sm:$0xff]   ;;  %v10583_v12 = vld [vmem:[#allocation4 + $0x368] sm:$0xff]  }
  0x87   : > { %6584 = vmatmul.mubr.bf16.vlgmr.msra.gmra.mrb[0].mxu0 %v311_v37  ;;  %v10552_v37 = vld [vmem:[#allocation4 + $0x2e8] sm:$0xff]  }
  0x88   : > { %6624 = vmatmul.mubr.bf16.vlgmr.msra.gmra.mrb[0].mxu1 %v313_v39  ;;  %9391 = vmatpush3.bf16.msra.mxu0 %v10501_v42  ;;  %v10554_v39 = vld [vmem:[#allocation4 + $0x2a8] sm:$0xff]   ;;  %v10557_v42 = vld [vmem:[#allocation4 + $0x230] sm:$0xff]  }
  0x89   : > { %9413 = vmatpush3.bf16.msra.mxu1 %v10502_v43  ;;  %9392 = vmatprep.subr.bf16.mxu0 %v10503_v44  ;;  %v10558_v43 = vld [vmem:[#allocation4 + $0x2b0] sm:$0xff]   ;;  %v10559_v44 = vld [vmem:[#allocation4 + $0x278] sm:$0xff]   ;;  %v10584_v13 = vld [vmem:[#allocation4 + $0x3e8] sm:$0xff]  }
  0x8a   : > { %9414 = vmatprep.subr.bf16.mxu1 %v10504_v45  ;;  %6663 = vmatprep.mubr.bf16.mxu0 %v316_v10  ;;  %v10560_v45 = vld [vmem:[#allocation4 + $0x2f8] sm:$0xff]   ;;  %v10581_v10 = vld [vmem:[#allocation4 + $0x320] sm:$0xff]  }
  0x8b   : > { %6703 = vmatprep.mubr.bf16.mxu1 %v318_v11  ;;  %v10582_v11 = vld [vmem:[#allocation4 + $0x3a0] sm:$0xff]  }
  0x8c   : > { %9393 = vmatpush3.bf16.msra.mxu0 %v10505_v46  ;;  %v10561_v46 = vld [vmem:[#allocation4 + $0x238] sm:$0xff]  }
  0x8d   : > { %9415 = vmatpush3.bf16.msra.mxu1 %v10506_v47  ;;  %9394 = vmatprep.subr.bf16.mxu0 %v10507_v48  ;;  %v10562_v47 = vld [vmem:[#allocation4 + $0x2b8] sm:$0xff]   ;;  %v224_v48 = vld [vmem:[%s11533_s23 + $0x48] sm:$0xff] }
  0x8e   : > { %9416 = vmatprep.subr.bf16.mxu1 %v10508_v49  ;;  %v320_v49 = vpack.c.bf16 %v224_v48, %v224_v48  ;;  %v10611_v48 = vld [vmem:[#allocation4 + $0x460] sm:$0xff]  }
  0x90   : > { %9395 = vmatpush3.bf16.msra.mxu0 %v10509_v50  ;;  %v226_v50 = vld [vmem:[%s11533_s23 + $0x58] sm:$0xff] }
  0x91   : > { %9417 = vmatpush3.bf16.msra.mxu1 %v10510_v51  ;;  %9396 = vmatprep.subr.bf16.mxu0 %v10511_v52  ;;  %v223_v51 = vld [vmem:[%s11533_s23 + $0x40] sm:$0xff]  ;;  %v225_v52 = vld [vmem:[%s11533_s23 + $0x50] sm:$0xff] }
  0x92   : > { %9418 = vmatprep.subr.bf16.mxu1 %v10512_v53  ;;  %v322_v53 = vpack.c.bf16 %v226_v50, %v226_v50  ;;  %v10613_v50 = vld [vmem:[#allocation4 + $0x420] sm:$0xff]  }
  0x94   : > { %9397 = vmatpush3.bf16.msra.mxu0 %v10513_v54  ;;  %v319_v54 = vpack.c.bf16 %v223_v51, %v223_v51  ;;  %v10614_v51 = vld [vmem:[#allocation4 + $0x4a0] sm:$0xff]  }
  0x95   : > { %9419 = vmatpush3.bf16.msra.mxu1 %v10514_v55  ;;  %9398 = vmatprep.subr.bf16.mxu0 %v10515_v56  ;;  %v321_v55 = vpack.c.bf16 %v225_v52, %v225_v52  ;;  %v10563_v56 = vld [vmem:[#allocation4 + $0x340] sm:$0xff]   ;;  %v10615_v52 = vld [vmem:[#allocation4 + $0x468] sm:$0xff]  }
  0x96   : > { %9420 = vmatprep.subr.bf16.mxu1 %v10516_v57  ;;  %v10564_v57 = vld [vmem:[#allocation4 + $0x3c0] sm:$0xff]  }
  0x98   : > { %9399 = vmatpush3.bf16.msra.mxu0 %v10517_v58  ;;  %v10565_v58 = vld [vmem:[#allocation4 + $0x300] sm:$0xff]  }
  0x99   : > { %9421 = vmatpush3.bf16.msra.mxu1 %v10518_v59  ;;  %9400 = vmatprep.subr.bf16.mxu0 %v10519_v60  ;;  %v10566_v59 = vld [vmem:[#allocation4 + $0x380] sm:$0xff]   ;;  %v10567_v60 = vld [vmem:[#allocation4 + $0x348] sm:$0xff]  }
  0x9a   : > { %9422 = vmatprep.subr.bf16.mxu1 %v10520_v61  ;;  %v10568_v61 = vld [vmem:[#allocation4 + $0x3c8] sm:$0xff]  }
  0x9c   : > { %9401 = vmatpush3.bf16.msra.mxu0 %v10521_v62  ;;  %v10569_v62 = vld [vmem:[#allocation4 + $0x308] sm:$0xff]  }
  0x9d   : > { %9423 = vmatpush3.bf16.msra.mxu1 %v10522_v63  ;;  %9402 = vmatprep.subr.bf16.mxu0 %v10523_v0  ;;  %v10570_v63 = vld [vmem:[#allocation4 + $0x388] sm:$0xff]   ;;  %v10571_v0 = vld [vmem:[#allocation4 + $0x350] sm:$0xff]  }
  0x9e   : > { %9424 = vmatprep.subr.bf16.mxu1 %v10524_v1  ;;  %v10572_v1 = vld [vmem:[#allocation4 + $0x3d0] sm:$0xff]  }
  0xa0   : > { %9403 = vmatpush3.bf16.msra.mxu0 %v10525_v2  ;;  %v10573_v2 = vld [vmem:[#allocation4 + $0x310] sm:$0xff]  }
  0xa1   : > { %9425 = vmatpush3.bf16.msra.mxu1 %v10526_v3  ;;  %9404 = vmatprep.subr.bf16.mxu0 %v10527_v4  ;;  %v10574_v3 = vld [vmem:[#allocation4 + $0x390] sm:$0xff]   ;;  %v10575_v4 = vld [vmem:[#allocation4 + $0x358] sm:$0xff]  }
  0xa2   : > { %9426 = vmatprep.subr.bf16.mxu1 %v10528_v5  ;;  %v10576_v5 = vld [vmem:[#allocation4 + $0x3d8] sm:$0xff]  }
  0xa4   : > { %9405 = vmatpush3.bf16.msra.mxu0 %v10529_v6  ;;  %v10577_v6 = vld [vmem:[#allocation4 + $0x318] sm:$0xff]  }
  0xa5   : > { %9427 = vmatpush3.bf16.msra.mxu1 %v10530_v7  ;;  %9434 = vmatprep.subr.bf16.mxu0 %v10531_v16  ;;  %v10578_v7 = vld [vmem:[#allocation4 + $0x398] sm:$0xff]   ;;  %v10587_v16 = vld [vmem:[#allocation4 + $0x370] sm:$0xff]  }
  0xa6   : > { %9456 = vmatprep.subr.bf16.mxu1 %v10532_v17  ;;  %v10588_v17 = vld [vmem:[#allocation4 + $0x3f0] sm:$0xff]  }
  0xa7   : > { %6664 = vmatmul.mubr.bf16.vlgmr.msra.gmra.mrb[4].mxu0 %v315_v14  ;;  %v10585_v14 = vld [vmem:[#allocation4 + $0x328] sm:$0xff]  }
  0xa8   : > { %6704 = vmatmul.mubr.bf16.vlgmr.msra.gmra.mrb[4].mxu1 %v317_v15  ;;  %9435 = vmatpush3.bf16.msra.mxu0 %v10533_v18  ;;  %v10586_v15 = vld [vmem:[#allocation4 + $0x3a8] sm:$0xff]   ;;  %v10589_v18 = vld [vmem:[#allocation4 + $0x330] sm:$0xff]  }
  0xa9   : > { %9457 = vmatpush3.bf16.msra.mxu1 %v10534_v19  ;;  %9436 = vmatprep.subr.bf16.mxu0 %v10535_v20  ;;  %v10590_v19 = vld [vmem:[#allocation4 + $0x3b0] sm:$0xff]   ;;  %v10591_v20 = vld [vmem:[#allocation4 + $0x378] sm:$0xff]  }
  0xaa   : > { %9458 = vmatprep.subr.bf16.mxu1 %v10536_v21  ;;  %6743 = vmatprep.mubr.bf16.mxu0 %v320_v49  ;;  %v10592_v21 = vld [vmem:[#allocation4 + $0x3f8] sm:$0xff]   ;;  %v10612_v49 = vld [vmem:[#allocation4 + $0x4e0] sm:$0xff]  }
  0xab   : > { %6783 = vmatprep.mubr.bf16.mxu1 %v322_v53  ;;  %v10616_v53 = vld [vmem:[#allocation4 + $0x4e8] sm:$0xff]  }
  0xac   : > { %9437 = vmatpush3.bf16.msra.mxu0 %v10537_v22  ;;  %v10593_v22 = vld [vmem:[#allocation4 + $0x338] sm:$0xff]  }
  0xad   : > { %9459 = vmatpush3.bf16.msra.mxu1 %v10538_v23  ;;  %9438 = vmatprep.subr.bf16.mxu0 %v10539_v24  ;;  %v10594_v23 = vld [vmem:[#allocation4 + $0x3b8] sm:$0xff]   ;;  %v228_v24 = vld [vmem:[%s11533_s23 + $0x68] sm:$0xff] }
  0xae   : > { %9460 = vmatprep.subr.bf16.mxu1 %v10540_v25  ;;  %v230_v25 = vld [vmem:[%s11533_s23 + $0x78] sm:$0xff] }
  0xb0   : > { %9439 = vmatpush3.bf16.msra.mxu0 %v10541_v26  ;;  %v227_v26 = vld [vmem:[%s11533_s23 + $0x60] sm:$0xff] }
  0xb1   : > { %9461 = vmatpush3.bf16.msra.mxu1 %v10542_v27  ;;  %9440 = vmatprep.subr.bf16.mxu0 %v10543_v28  ;;  %v324_v27 = vpack.c.bf16 %v228_v24, %v228_v24  ;;  %v326_v28 = vpack.c.bf16 %v230_v25, %v230_v25  ;;  %v10643_v24 = vld [vmem:[#allocation4 + $0x560] sm:$0xff]  }
  0xb2   : > { %9462 = vmatprep.subr.bf16.mxu1 %v10544_v29  ;;  %v323_v29 = vpack.c.bf16 %v227_v26, %v227_v26  ;;  %v10644_v25 = vld [vmem:[#allocation4 + $0x5e0] sm:$0xff]  }
  0xb3   : > { %v10645_v26 = vld [vmem:[#allocation4 + $0x520] sm:$0xff]  }
  0xb4   : > { %9441 = vmatpush3.bf16.msra.mxu0 %v10545_v30  ;;  %v229_v30 = vld [vmem:[%s11533_s23 + $0x70] sm:$0xff] }
  0xb5   : > { %9463 = vmatpush3.bf16.msra.mxu1 %v10546_v31  ;;  %9442 = vmatprep.subr.bf16.mxu0 %v10547_v32  ;;  %v325_v31 = vpack.c.bf16 %v229_v30, %v229_v30  ;;  %v10595_v32 = vld [vmem:[#allocation4 + $0x440] sm:$0xff]   ;;  %v10649_v30 = vld [vmem:[#allocation4 + $0x528] sm:$0xff]  }
  0xb6   : > { %9464 = vmatprep.subr.bf16.mxu1 %v10548_v33  ;;  %v10596_v33 = vld [vmem:[#allocation4 + $0x4c0] sm:$0xff]  }
  0xb8   : > { %9443 = vmatpush3.bf16.msra.mxu0 %v10549_v34  ;;  %v10597_v34 = vld [vmem:[#allocation4 + $0x400] sm:$0xff]  }
  0xb9   : > { %9465 = vmatpush3.bf16.msra.mxu1 %v10550_v35  ;;  %9444 = vmatprep.subr.bf16.mxu0 %v10551_v36  ;;  %v10598_v35 = vld [vmem:[#allocation4 + $0x480] sm:$0xff]   ;;  %v10599_v36 = vld [vmem:[#allocation4 + $0x448] sm:$0xff]  }
  0xba   : > { %9466 = vmatprep.subr.bf16.mxu1 %v10552_v37  ;;  %v10600_v37 = vld [vmem:[#allocation4 + $0x4c8] sm:$0xff]  }
  0xbc   : > { %9445 = vmatpush3.bf16.msra.mxu0 %v10553_v38  ;;  %v10601_v38 = vld [vmem:[#allocation4 + $0x408] sm:$0xff]  }
  0xbd   : > { %9467 = vmatpush3.bf16.msra.mxu1 %v10554_v39  ;;  %9446 = vmatprep.subr.bf16.mxu0 %v10555_v40  ;;  %v10602_v39 = vld [vmem:[#allocation4 + $0x488] sm:$0xff]   ;;  %v10603_v40 = vld [vmem:[#allocation4 + $0x450] sm:$0xff]  }
  0xbe   : > { %9468 = vmatprep.subr.bf16.mxu1 %v10556_v41  ;;  %v10604_v41 = vld [vmem:[#allocation4 + $0x4d0] sm:$0xff]  }
  0xc0   : > { %9447 = vmatpush3.bf16.msra.mxu0 %v10557_v42  ;;  %v10605_v42 = vld [vmem:[#allocation4 + $0x410] sm:$0xff]  }
  0xc1   : > { %9469 = vmatpush3.bf16.msra.mxu1 %v10558_v43  ;;  %9448 = vmatprep.subr.bf16.mxu0 %v10559_v44  ;;  %v10606_v43 = vld [vmem:[#allocation4 + $0x490] sm:$0xff]   ;;  %v10607_v44 = vld [vmem:[#allocation4 + $0x458] sm:$0xff]  }
  0xc2   : > { %9470 = vmatprep.subr.bf16.mxu1 %v10560_v45  ;;  %v10608_v45 = vld [vmem:[#allocation4 + $0x4d8] sm:$0xff]  }
  0xc4   : > { %9449 = vmatpush3.bf16.msra.mxu0 %v10561_v46  ;;  %v10609_v46 = vld [vmem:[#allocation4 + $0x418] sm:$0xff]  }
  0xc5   : > { %9471 = vmatpush3.bf16.msra.mxu1 %v10562_v47  ;;  %9478 = vmatprep.subr.bf16.mxu0 %v10563_v56  ;;  %v10610_v47 = vld [vmem:[#allocation4 + $0x498] sm:$0xff]   ;;  %v10619_v56 = vld [vmem:[#allocation4 + $0x470] sm:$0xff]  }
  0xc6   : > { %9500 = vmatprep.subr.bf16.mxu1 %v10564_v57  ;;  %v10620_v57 = vld [vmem:[#allocation4 + $0x4f0] sm:$0xff]  }
  0xc7   : > { %6744 = vmatmul.mubr.bf16.vlgmr.msra.gmra.mrb[8].mxu0 %v319_v54  ;;  %v10617_v54 = vld [vmem:[#allocation4 + $0x428] sm:$0xff]  }
  0xc8   : > { %6784 = vmatmul.mubr.bf16.vlgmr.msra.gmra.mrb[8].mxu1 %v321_v55  ;;  %9479 = vmatpush3.bf16.msra.mxu0 %v10565_v58  ;;  %v10618_v55 = vld [vmem:[#allocation4 + $0x4a8] sm:$0xff]   ;;  %v10621_v58 = vld [vmem:[#allocation4 + $0x430] sm:$0xff]  }
  0xc9   : > { %9501 = vmatpush3.bf16.msra.mxu1 %v10566_v59  ;;  %9480 = vmatprep.subr.bf16.mxu0 %v10567_v60  ;;  %v10622_v59 = vld [vmem:[#allocation4 + $0x4b0] sm:$0xff]   ;;  %v10623_v60 = vld [vmem:[#allocation4 + $0x478] sm:$0xff]  }
  0xca   : > { %9502 = vmatprep.subr.bf16.mxu1 %v10568_v61  ;;  %6823 = vmatprep.mubr.bf16.mxu0 %v324_v27  ;;  %v10624_v61 = vld [vmem:[#allocation4 + $0x4f8] sm:$0xff]   ;;  %v10646_v27 = vld [vmem:[#allocation4 + $0x5a0] sm:$0xff]  }
  0xcb   : > { %6863 = vmatprep.mubr.bf16.mxu1 %v326_v28  ;;  %v10647_v28 = vld [vmem:[#allocation4 + $0x568] sm:$0xff]  }
  0xcc   : > { %9481 = vmatpush3.bf16.msra.mxu0 %v10569_v62  ;;  %v10625_v62 = vld [vmem:[#allocation4 + $0x438] sm:$0xff]  }
  0xcd   : > { %9503 = vmatpush3.bf16.msra.mxu1 %v10570_v63  ;;  %9482 = vmatprep.subr.bf16.mxu0 %v10571_v0  ;;  %v10626_v63 = vld [vmem:[#allocation4 + $0x4b8] sm:$0xff]   ;;  %v232_v0 = vld [vmem:[%s11533_s23 + $0x88] sm:$0xff] }
  0xce   : > { %9504 = vmatprep.subr.bf16.mxu1 %v10572_v1  ;;  %v234_v1 = vld [vmem:[%s11533_s23 + $0x98] sm:$0xff] }
  0xd0   : > { %9483 = vmatpush3.bf16.msra.mxu0 %v10573_v2  ;;  %v328_v2 = vpack.c.bf16 %v232_v0, %v232_v0  ;;  %v10675_v0 = vld [vmem:[#allocation4 + $0x660] sm:$0xff]  }
  0xd1   : > { %9505 = vmatpush3.bf16.msra.mxu1 %v10574_v3  ;;  %9484 = vmatprep.subr.bf16.mxu0 %v10575_v4  ;;  %v330_v3 = vpack.c.bf16 %v234_v1, %v234_v1  ;;  %v231_v4 = vld [vmem:[%s11533_s23 + $0x80] sm:$0xff] }
  0xd2   : > { %9506 = vmatprep.subr.bf16.mxu1 %v10576_v5  ;;  %v233_v5 = vld [vmem:[%s11533_s23 + $0x90] sm:$0xff]  ;;  %v10676_v1 = vld [vmem:[#allocation4 + $0x6e0] sm:$0xff]  }
  0xd4   : > { %9485 = vmatpush3.bf16.msra.mxu0 %v10577_v6  ;;  %v327_v6 = vpack.c.bf16 %v231_v4, %v231_v4  ;;  %v10679_v4 = vld [vmem:[#allocation4 + $0x668] sm:$0xff]  }
  0xd5   : > { %9507 = vmatpush3.bf16.msra.mxu1 %v10578_v7  ;;  %9486 = vmatprep.subr.bf16.mxu0 %v10579_v8  ;;  %v329_v7 = vpack.c.bf16 %v233_v5, %v233_v5  ;;  %v10627_v8 = vld [vmem:[#allocation4 + $0x540] sm:$0xff]   ;;  %v10680_v5 = vld [vmem:[#allocation4 + $0x6e8] sm:$0xff]  }
  0xd6   : > { %9508 = vmatprep.subr.bf16.mxu1 %v10580_v9  ;;  %v10628_v9 = vld [vmem:[#allocation4 + $0x5c0] sm:$0xff]  }
  0xd8   : > { %9487 = vmatpush3.bf16.msra.mxu0 %v10581_v10  ;;  %v10629_v10 = vld [vmem:[#allocation4 + $0x500] sm:$0xff]  }
  0xd9   : > { %9509 = vmatpush3.bf16.msra.mxu1 %v10582_v11  ;;  %9488 = vmatprep.subr.bf16.mxu0 %v10583_v12  ;;  %v10630_v11 = vld [vmem:[#allocation4 + $0x580] sm:$0xff]   ;;  %v10631_v12 = vld [vmem:[#allocation4 + $0x548] sm:$0xff]  }
  0xda   : > { %9510 = vmatprep.subr.bf16.mxu1 %v10584_v13  ;;  %v10632_v13 = vld [vmem:[#allocation4 + $0x5c8] sm:$0xff]  }
  0xdc   : > { %9489 = vmatpush3.bf16.msra.mxu0 %v10585_v14  ;;  %v10633_v14 = vld [vmem:[#allocation4 + $0x508] sm:$0xff]  }
  0xdd   : > { %9511 = vmatpush3.bf16.msra.mxu1 %v10586_v15  ;;  %9490 = vmatprep.subr.bf16.mxu0 %v10587_v16  ;;  %v10634_v15 = vld [vmem:[#allocation4 + $0x588] sm:$0xff]   ;;  %v10635_v16 = vld [vmem:[#allocation4 + $0x550] sm:$0xff]  }
  0xde   : > { %9512 = vmatprep.subr.bf16.mxu1 %v10588_v17  ;;  %v10636_v17 = vld [vmem:[#allocation4 + $0x5d0] sm:$0xff]  }
  0xe0   : > { %9491 = vmatpush3.bf16.msra.mxu0 %v10589_v18  ;;  %v10637_v18 = vld [vmem:[#allocation4 + $0x510] sm:$0xff]  }
  0xe1   : > { %9513 = vmatpush3.bf16.msra.mxu1 %v10590_v19  ;;  %9492 = vmatprep.subr.bf16.mxu0 %v10591_v20  ;;  %v10638_v19 = vld [vmem:[#allocation4 + $0x590] sm:$0xff]   ;;  %v10639_v20 = vld [vmem:[#allocation4 + $0x558] sm:$0xff]  }
  0xe2   : > { %9514 = vmatprep.subr.bf16.mxu1 %v10592_v21  ;;  %v10640_v21 = vld [vmem:[#allocation4 + $0x5d8] sm:$0xff]  }
  0xe4   : > { %9493 = vmatpush3.bf16.msra.mxu0 %v10593_v22  ;;  %v10641_v22 = vld [vmem:[#allocation4 + $0x518] sm:$0xff]  }
  0xe5   : > { %9515 = vmatpush3.bf16.msra.mxu1 %v10594_v23  ;;  %9522 = vmatprep.subr.bf16.mxu0 %v10595_v32  ;;  %v10642_v23 = vld [vmem:[#allocation4 + $0x598] sm:$0xff]   ;;  %v10651_v32 = vld [vmem:[#allocation4 + $0x570] sm:$0xff]  }
  0xe6   : > { %9544 = vmatprep.subr.bf16.mxu1 %v10596_v33  ;;  %v10652_v33 = vld [vmem:[#allocation4 + $0x5f0] sm:$0xff]  }
  0xe7   : > { %6824 = vmatmul.mubr.bf16.vlgmr.msra.gmra.mrb[12].mxu0 %v323_v29  ;;  %v10648_v29 = vld [vmem:[#allocation4 + $0x5e8] sm:$0xff]  }
  0xe8   : > { %6864 = vmatmul.mubr.bf16.vlgmr.msra.gmra.mrb[12].mxu1 %v325_v31  ;;  %9523 = vmatpush3.bf16.msra.mxu0 %v10597_v34  ;;  %v10650_v31 = vld [vmem:[#allocation4 + $0x5a8] sm:$0xff]   ;;  %v10653_v34 = vld [vmem:[#allocation4 + $0x530] sm:$0xff]  }
  0xe9   : > { %9545 = vmatpush3.bf16.msra.mxu1 %v10598_v35  ;;  %9524 = vmatprep.subr.bf16.mxu0 %v10599_v36  ;;  %v10654_v35 = vld [vmem:[#allocation4 + $0x5b0] sm:$0xff]   ;;  %v10655_v36 = vld [vmem:[#allocation4 + $0x578] sm:$0xff]  }
  0xea   : > { %9546 = vmatprep.subr.bf16.mxu1 %v10600_v37  ;;  %6903 = vmatprep.mubr.bf16.mxu0 %v328_v2  ;;  %v10656_v37 = vld [vmem:[#allocation4 + $0x5f8] sm:$0xff]   ;;  %v10677_v2 = vld [vmem:[#allocation4 + $0x620] sm:$0xff]  }
  0xeb   : > { %6943 = vmatprep.mubr.bf16.mxu1 %v330_v3  ;;  %v10678_v3 = vld [vmem:[#allocation4 + $0x6a0] sm:$0xff]  }
  0xec   : > { %9525 = vmatpush3.bf16.msra.mxu0 %v10601_v38  ;;  %v10657_v38 = vld [vmem:[#allocation4 + $0x538] sm:$0xff]  }
  0xed   : > { %9547 = vmatpush3.bf16.msra.mxu1 %v10602_v39  ;;  %9526 = vmatprep.subr.bf16.mxu0 %v10603_v40  ;;  %v10658_v39 = vld [vmem:[#allocation4 + $0x5b8] sm:$0xff]   ;;  %v236_v40 = vld [vmem:[%s11533_s23 + $0xa8] sm:$0xff] }
  0xee   : > { %9548 = vmatprep.subr.bf16.mxu1 %v10604_v41  ;;  %v332_v41 = vpack.c.bf16 %v236_v40, %v236_v40 }
  0xf0   : > { %9527 = vmatpush3.bf16.msra.mxu0 %v10605_v42  ;;  %v238_v42 = vld [vmem:[%s11533_s23 + $0xb8] sm:$0xff] }
  0xf1   : > { %9549 = vmatpush3.bf16.msra.mxu1 %v10606_v43  ;;  %9528 = vmatprep.subr.bf16.mxu0 %v10607_v44  ;;  %v235_v43 = vld [vmem:[%s11533_s23 + $0xa0] sm:$0xff]  ;;  %v237_v44 = vld [vmem:[%s11533_s23 + $0xb0] sm:$0xff] }
  0xf2   : > { %9550 = vmatprep.subr.bf16.mxu1 %v10608_v45  ;;  %v334_v45 = vpack.c.bf16 %v238_v42, %v238_v42 }
  0xf4   : > { %9529 = vmatpush3.bf16.msra.mxu0 %v10609_v46  ;;  %v331_v46 = vpack.c.bf16 %v235_v43, %v235_v43  ;;  %v10707_v43 = vld [vmem:[#allocation4 + $0x760] sm:$0xff]  }
  0xf5   : > { %9551 = vmatpush3.bf16.msra.mxu1 %v10610_v47  ;;  %9530 = vmatprep.subr.bf16.mxu0 %v10611_v48  ;;  %v333_v47 = vpack.c.bf16 %v237_v44, %v237_v44  ;;  %v10659_v48 = vld [vmem:[#allocation4 + $0x640] sm:$0xff]  }
  0xf6   : > { %9552 = vmatprep.subr.bf16.mxu1 %v10612_v49  ;;  %v10660_v49 = vld [vmem:[#allocation4 + $0x6c0] sm:$0xff]  }
  0xf8   : > { %9531 = vmatpush3.bf16.msra.mxu0 %v10613_v50  ;;  %v10661_v50 = vld [vmem:[#allocation4 + $0x600] sm:$0xff]  }
  0xf9   : > { %9553 = vmatpush3.bf16.msra.mxu1 %v10614_v51  ;;  %9532 = vmatprep.subr.bf16.mxu0 %v10615_v52  ;;  %v10662_v51 = vld [vmem:[#allocation4 + $0x680] sm:$0xff]   ;;  %v10663_v52 = vld [vmem:[#allocation4 + $0x648] sm:$0xff]  }
  0xfa   : > { %9554 = vmatprep.subr.bf16.mxu1 %v10616_v53  ;;  %v10664_v53 = vld [vmem:[#allocation4 + $0x6c8] sm:$0xff]  }
  0xfc   : > { %9533 = vmatpush3.bf16.msra.mxu0 %v10617_v54  ;;  %v10665_v54 = vld [vmem:[#allocation4 + $0x608] sm:$0xff]  }
  0xfd   : > { %9555 = vmatpush3.bf16.msra.mxu1 %v10618_v55  ;;  %9534 = vmatprep.subr.bf16.mxu0 %v10619_v56  ;;  %v10666_v55 = vld [vmem:[#allocation4 + $0x688] sm:$0xff]   ;;  %v10667_v56 = vld [vmem:[#allocation4 + $0x650] sm:$0xff]  }
  0xfe   : > { %9556 = vmatprep.subr.bf16.mxu1 %v10620_v57  ;;  %v10668_v57 = vld [vmem:[#allocation4 + $0x6d0] sm:$0xff]  }
 0x100   : > { %9535 = vmatpush3.bf16.msra.mxu0 %v10621_v58  ;;  %v10669_v58 = vld [vmem:[#allocation4 + $0x610] sm:$0xff]  }
 0x101   : > { %9557 = vmatpush3.bf16.msra.mxu1 %v10622_v59  ;;  %9536 = vmatprep.subr.bf16.mxu0 %v10623_v60  ;;  %v10670_v59 = vld [vmem:[#allocation4 + $0x690] sm:$0xff]   ;;  %v10671_v60 = vld [vmem:[#allocation4 + $0x658] sm:$0xff]  }
 0x102   : > { %9558 = vmatprep.subr.bf16.mxu1 %v10624_v61  ;;  %v10672_v61 = vld [vmem:[#allocation4 + $0x6d8] sm:$0xff]  }
 0x104   : > { %9537 = vmatpush3.bf16.msra.mxu0 %v10625_v62  ;;  %v10673_v62 = vld [vmem:[#allocation4 + $0x618] sm:$0xff]  }
 0x105   : > { %9559 = vmatpush3.bf16.msra.mxu1 %v10626_v63  ;;  %9566 = vmatprep.subr.bf16.mxu0 %v10627_v8  ;;  %v10674_v63 = vld [vmem:[#allocation4 + $0x698] sm:$0xff]   ;;  %v10683_v8 = vld [vmem:[#allocation4 + $0x670] sm:$0xff]  }
 0x106   : > { %9588 = vmatprep.subr.bf16.mxu1 %v10628_v9  ;;  %v10684_v9 = vld [vmem:[#allocation4 + $0x6f0] sm:$0xff]  }
 0x107   : > { %6904 = vmatmul.mubr.bf16.vlgmr.msra.gmra.mrb[16].mxu0 %v327_v6  ;;  %v10681_v6 = vld [vmem:[#allocation4 + $0x628] sm:$0xff]  }
 0x108   : > { %6944 = vmatmul.mubr.bf16.vlgmr.msra.gmra.mrb[16].mxu1 %v329_v7  ;;  %9567 = vmatpush3.bf16.msra.mxu0 %v10629_v10  ;;  %v10682_v7 = vld [vmem:[#allocation4 + $0x6a8] sm:$0xff]   ;;  %v10685_v10 = vld [vmem:[#allocation4 + $0x630] sm:$0xff]  }
 0x109   : > { %9589 = vmatpush3.bf16.msra.mxu1 %v10630_v11  ;;  %9568 = vmatprep.subr.bf16.mxu0 %v10631_v12  ;;  %v10686_v11 = vld [vmem:[#allocation4 + $0x6b0] sm:$0xff]   ;;  %v10687_v12 = vld [vmem:[#allocation4 + $0x678] sm:$0xff]  }
 0x10a   : > { %9590 = vmatprep.subr.bf16.mxu1 %v10632_v13  ;;  %6983 = vmatprep.mubr.bf16.mxu0 %v332_v41  ;;  %v10688_v13 = vld [vmem:[#allocation4 + $0x6f8] sm:$0xff]  }
 0x10b   : > { %7023 = vmatprep.mubr.bf16.mxu1 %v334_v45  ;;  %v10706_v41 = vld [vmem:[#allocation4 + $0x798] sm:$0xff]  }
 0x10c   : > { %9569 = vmatpush3.bf16.msra.mxu0 %v10633_v14  ;;  %v10689_v14 = vld [vmem:[#allocation4 + $0x638] sm:$0xff]  }
 0x10d   : > { %9591 = vmatpush3.bf16.msra.mxu1 %v10634_v15  ;;  %9570 = vmatprep.subr.bf16.mxu0 %v10635_v16  ;;  %v10690_v15 = vld [vmem:[#allocation4 + $0x6b8] sm:$0xff]   ;;  %v240_v16 = vld [vmem:[%s11533_s23 + $0xc8] sm:$0xff] }
 0x10e   : > { %9592 = vmatprep.subr.bf16.mxu1 %v10636_v17  ;;  %v242_v17 = vld [vmem:[%s11533_s23 + $0xd8] sm:$0xff] }
 0x110   : > { %9571 = vmatpush3.bf16.msra.mxu0 %v10637_v18  ;;  %v239_v18 = vld [vmem:[%s11533_s23 + $0xc0] sm:$0xff] }
 0x111   : > { %9593 = vmatpush3.bf16.msra.mxu1 %v10638_v19  ;;  %9572 = vmatprep.subr.bf16.mxu0 %v10639_v20  ;;  %v336_v19 = vpack.c.bf16 %v240_v16, %v240_v16  ;;  %v338_v20 = vpack.c.bf16 %v242_v17, %v242_v17  ;;  %v10728_v16 = vld [vmem:[#allocation4 + $0x8c8] sm:$0xff]  }
 0x112   : > { %9594 = vmatprep.subr.bf16.mxu1 %v10640_v21  ;;  %v335_v21 = vpack.c.bf16 %v239_v18, %v239_v18  ;;  %v10729_v17 = vld [vmem:[#allocation4 + $0x808] sm:$0xff]  }
 0x113   : > { %v10730_v18 = vld [vmem:[#allocation4 + $0x888] sm:$0xff]  }
 0x114   : > { %9573 = vmatpush3.bf16.msra.mxu0 %v10641_v22  ;;  %v241_v22 = vld [vmem:[%s11533_s23 + $0xd0] sm:$0xff] }
 0x115   : > { %9595 = vmatpush3.bf16.msra.mxu1 %v10642_v23  ;;  %9574 = vmatprep.subr.bf16.mxu0 %v10643_v24  ;;  %v337_v23 = vpack.c.bf16 %v241_v22, %v241_v22  ;;  %v10691_v24 = vld [vmem:[#allocation4 + $0x740] sm:$0xff]   ;;  %v10734_v22 = vld [vmem:[#allocation4 + $0x890] sm:$0xff]  }
 0x116   : > { %9596 = vmatprep.subr.bf16.mxu1 %v10644_v25  ;;  %v10692_v25 = vld [vmem:[#allocation4 + $0x7c0] sm:$0xff]  }
 0x118   : > { %9575 = vmatpush3.bf16.msra.mxu0 %v10645_v26  ;;  %v10693_v26 = vld [vmem:[#allocation4 + $0x700] sm:$0xff]  }
 0x119   : > { %9597 = vmatpush3.bf16.msra.mxu1 %v10646_v27  ;;  %9576 = vmatprep.subr.bf16.mxu0 %v10647_v28  ;;  %v10694_v27 = vld [vmem:[#allocation4 + $0x780] sm:$0xff]   ;;  %v10695_v28 = vld [vmem:[#allocation4 + $0x748] sm:$0xff]  }
 0x11a   : > { %9598 = vmatprep.subr.bf16.mxu1 %v10648_v29  ;;  %v10696_v29 = vld [vmem:[#allocation4 + $0x7c8] sm:$0xff]  }
 0x11c   : > { %9577 = vmatpush3.bf16.msra.mxu0 %v10649_v30  ;;  %v10697_v30 = vld [vmem:[#allocation4 + $0x708] sm:$0xff]  }
 0x11d   : > { %9599 = vmatpush3.bf16.msra.mxu1 %v10650_v31  ;;  %9578 = vmatprep.subr.bf16.mxu0 %v10651_v32  ;;  %v10698_v31 = vld [vmem:[#allocation4 + $0x788] sm:$0xff]   ;;  %v10699_v32 = vld [vmem:[#allocation4 + $0x750] sm:$0xff]  }
 0x11e   : > { %9600 = vmatprep.subr.bf16.mxu1 %v10652_v33  ;;  %v10700_v33 = vld [vmem:[#allocation4 + $0x7d0] sm:$0xff]  }
 0x120   : > { %9579 = vmatpush3.bf16.msra.mxu0 %v10653_v34  ;;  %v10701_v34 = vld [vmem:[#allocation4 + $0x710] sm:$0xff]  }
 0x121   : > { %9601 = vmatpush3.bf16.msra.mxu1 %v10654_v35  ;;  %9580 = vmatprep.subr.bf16.mxu0 %v10655_v36  ;;  %v10702_v35 = vld [vmem:[#allocation4 + $0x790] sm:$0xff]   ;;  %v10703_v36 = vld [vmem:[#allocation4 + $0x758] sm:$0xff]  }
 0x122   : > { %9602 = vmatprep.subr.bf16.mxu1 %v10656_v37  ;;  %v10704_v37 = vld [vmem:[#allocation4 + $0x7d8] sm:$0xff]  }
 0x124   : > { %9581 = vmatpush3.bf16.msra.mxu0 %v10657_v38 }
 0x125   : > { %9603 = vmatpush3.bf16.msra.mxu1 %v10658_v39  ;;  %9610 = vmatprep.subr.bf16.mxu0 %v10659_v48  ;;  %v10705_v39 = vld [vmem:[#allocation4 + $0x718] sm:$0xff]  }
 0x126   : > { %9632 = vmatprep.subr.bf16.mxu1 %v10660_v49  ;;  %v10709_v49 = vld [vmem:[#allocation4 + $0x720] sm:$0xff]  }
 0x127   : > { %6984 = vmatmul.mubr.bf16.vlgmr.msra.gmra.mrb[20].mxu0 %v331_v46  ;;  %v10708_v46 = vld [vmem:[#allocation4 + $0x7e0] sm:$0xff]  }
 0x128   : > { %7024 = vmatmul.mubr.bf16.vlgmr.msra.gmra.mrb[20].mxu1 %v333_v47  ;;  %9611 = vmatpush3.bf16.msra.mxu0 %v10661_v50 }
 0x129   : > { %9633 = vmatpush3.bf16.msra.mxu1 %v10662_v51  ;;  %9612 = vmatprep.subr.bf16.mxu0 %v10663_v52  ;;  %v10710_v51 = vld [vmem:[#allocation4 + $0x7a0] sm:$0xff]  }
 0x12a   : > { %9634 = vmatprep.subr.bf16.mxu1 %v10664_v53  ;;  %7063 = vmatprep.mubr.bf16.mxu0 %v336_v19  ;;  %v10731_v19 = vld [vmem:[#allocation4 + $0x850] sm:$0xff]  }
 0x12b   : > { %7103 = vmatprep.mubr.bf16.mxu1 %v338_v20  ;;  %v10732_v20 = vld [vmem:[#allocation4 + $0x8d0] sm:$0xff]  }
 0x12c   : > { %9613 = vmatpush3.bf16.msra.mxu0 %v10665_v54  ;;  %v10711_v54 = vld [vmem:[#allocation4 + $0x768] sm:$0xff]  }
 0x12d   : > { %9635 = vmatpush3.bf16.msra.mxu1 %v10666_v55  ;;  %9614 = vmatprep.subr.bf16.mxu0 %v10667_v56  ;;  %v10712_v56 = vld [vmem:[#allocation4 + $0x7e8] sm:$0xff]  }
 0x12e   : > { %9636 = vmatprep.subr.bf16.mxu1 %v10668_v57  ;;  %v10713_v57 = vld [vmem:[#allocation4 + $0x728] sm:$0xff]  }
 0x130   : > { %9615 = vmatpush3.bf16.msra.mxu0 %v10669_v58  ;;  %v10714_v58 = vld [vmem:[#allocation4 + $0x7a8] sm:$0xff]  }
 0x131   : > { %9637 = vmatpush3.bf16.msra.mxu1 %v10670_v59  ;;  %9616 = vmatprep.subr.bf16.mxu0 %v10671_v60  ;;  %v10715_v59 = vld [vmem:[#allocation4 + $0x770] sm:$0xff]  }
 0x132   : > { %9638 = vmatprep.subr.bf16.mxu1 %v10672_v61  ;;  %v10716_v60 = vld [vmem:[#allocation4 + $0x7f0] sm:$0xff]  }
 0x133   : > { %v10717_v61 = vld [vmem:[#allocation4 + $0x730] sm:$0xff]  }
 0x134   : > { %9617 = vmatpush3.bf16.msra.mxu0 %v10673_v62  ;;  %v10718_v62 = vld [vmem:[#allocation4 + $0x7b0] sm:$0xff]  }
 0x135   : > { %9639 = vmatpush3.bf16.msra.mxu1 %v10674_v63  ;;  %9618 = vmatprep.subr.bf16.mxu0 %v10675_v0  ;;  %v10719_v63 = vld [vmem:[#allocation4 + $0x778] sm:$0xff]  }
 0x136   : > { %9640 = vmatprep.subr.bf16.mxu1 %v10676_v1  ;;  %v10720_v0 = vld [vmem:[#allocation4 + $0x7f8] sm:$0xff]  }
 0x137   : > { %v10721_v1 = vld [vmem:[#allocation4 + $0x738] sm:$0xff]  }
 0x138   : > { %9619 = vmatpush3.bf16.msra.mxu0 %v10677_v2  ;;  %v10722_v2 = vld [vmem:[#allocation4 + $0x7b8] sm:$0xff]  }
 0x139   : > { %9641 = vmatpush3.bf16.msra.mxu1 %v10678_v3  ;;  %9620 = vmatprep.subr.bf16.mxu0 %v10679_v4  ;;  %v244_v3 = vld [vmem:[%s11533_s23 + $0xe8] sm:$0xff]  ;;  %v246_v4 = vld [vmem:[%s11533_s23 + $0xf8] sm:$0xff] }
 0x13a   : > { %9642 = vmatprep.subr.bf16.mxu1 %v10680_v5  ;;  %v340_v5 = vpack.c.bf16 %v244_v3, %v244_v3  ;;  %v10759_v3 = vld [vmem:[#allocation4 + $0x948] sm:$0xff]  }
 0x13c   : > { %9621 = vmatpush3.bf16.msra.mxu0 %v10681_v6  ;;  %v342_v6 = vpack.c.bf16 %v246_v4, %v246_v4  ;;  %v10760_v4 = vld [vmem:[#allocation4 + $0x9c8] sm:$0xff]  }
 0x13d   : > { %9643 = vmatpush3.bf16.msra.mxu1 %v10682_v7  ;;  %9622 = vmatprep.subr.bf16.mxu0 %v10683_v8  ;;  %v243_v7 = vld [vmem:[%s11533_s23 + $0xe0] sm:$0xff]  ;;  %v245_v8 = vld [vmem:[%s11533_s23 + $0xf0] sm:$0xff] }
 0x13e   : > { %9644 = vmatprep.subr.bf16.mxu1 %v10684_v9  ;;  %v339_v9 = vpack.c.bf16 %v243_v7, %v243_v7  ;;  %v10763_v7 = vld [vmem:[#allocation4 + $0x950] sm:$0xff]  }
 0x140   : > { %9623 = vmatpush3.bf16.msra.mxu0 %v10685_v10  ;;  %v341_v10 = vpack.c.bf16 %v245_v8, %v245_v8  ;;  %v10764_v8 = vld [vmem:[#allocation4 + $0x9d0] sm:$0xff]  }
 0x141   : > { %9645 = vmatpush3.bf16.msra.mxu1 %v10686_v11  ;;  %9624 = vmatprep.subr.bf16.mxu0 %v10687_v12  ;;  %v10723_v11 = vld [vmem:[#allocation4 + $0x840] sm:$0xff]  }
 0x142   : > { %9646 = vmatprep.subr.bf16.mxu1 %v10688_v13  ;;  %v10724_v12 = vld [vmem:[#allocation4 + $0x8c0] sm:$0xff]  }
 0x143   : > { %v10725_v13 = vld [vmem:[#allocation4 + $0x800] sm:$0xff]  }
 0x144   : > { %9625 = vmatpush3.bf16.msra.mxu0 %v10689_v14  ;;  %v10726_v14 = vld [vmem:[#allocation4 + $0x880] sm:$0xff]  }
 0x145   : > { %9647 = vmatpush3.bf16.msra.mxu1 %v10690_v15  ;;  %9654 = vmatprep.subr.bf16.mxu0 %v10691_v24  ;;  %v10727_v15 = vld [vmem:[#allocation4 + $0x848] sm:$0xff]   ;;  %v10736_v24 = vld [vmem:[#allocation4 + $0x8d8] sm:$0xff]  }
 0x146   : > { %9676 = vmatprep.subr.bf16.mxu1 %v10692_v25 }
 0x147   : > { %7064 = vmatmul.mubr.bf16.vlgmr.msra.gmra.mrb[24].mxu0 %v335_v21  ;;  %v10733_v21 = vld [vmem:[#allocation4 + $0x810] sm:$0xff]  }
 0x148   : > { %7104 = vmatmul.mubr.bf16.vlgmr.msra.gmra.mrb[24].mxu1 %v337_v23  ;;  %9655 = vmatpush3.bf16.msra.mxu0 %v10693_v26  ;;  %v10735_v23 = vld [vmem:[#allocation4 + $0x858] sm:$0xff]  }
 0x149   : > { %9677 = vmatpush3.bf16.msra.mxu1 %v10694_v27  ;;  %9656 = vmatprep.subr.bf16.mxu0 %v10695_v28  ;;  %v10737_v26 = vld [vmem:[#allocation4 + $0x818] sm:$0xff]  }
 0x14a   : > { %9678 = vmatprep.subr.bf16.mxu1 %v10696_v29  ;;  %7143 = vmatprep.mubr.bf16.mxu0 %v340_v5  ;;  %v10738_v28 = vld [vmem:[#allocation4 + $0x898] sm:$0xff]   ;;  %v10761_v5 = vld [vmem:[#allocation4 + $0x908] sm:$0xff]  }
 0x14b   : > { %7183 = vmatprep.mubr.bf16.mxu1 %v342_v6  ;;  %v10762_v6 = vld [vmem:[#allocation4 + $0x988] sm:$0xff]  }
 0x14c   : > { %9657 = vmatpush3.bf16.msra.mxu0 %v10697_v30  ;;  %v10739_v30 = vld [vmem:[#allocation4 + $0x860] sm:$0xff]  }
 0x14d   : > { %9679 = vmatpush3.bf16.msra.mxu1 %v10698_v31  ;;  %9658 = vmatprep.subr.bf16.mxu0 %v10699_v32 }
 0x14e   : > { %9680 = vmatprep.subr.bf16.mxu1 %v10700_v33  ;;  %v10740_v33 = vld [vmem:[#allocation4 + $0x8e0] sm:$0xff]  }
 0x150   : > { %9659 = vmatpush3.bf16.msra.mxu0 %v10701_v34 }
 0x151   : > { %9681 = vmatpush3.bf16.msra.mxu1 %v10702_v35  ;;  %9660 = vmatprep.subr.bf16.mxu0 %v10703_v36  ;;  %v10741_v36 = vld [vmem:[#allocation4 + $0x820] sm:$0xff]  }
 0x152   : > { %9682 = vmatprep.subr.bf16.mxu1 %v10704_v37 }
 0x154   : > { %9661 = vmatpush3.bf16.msra.mxu0 %v10705_v39  ;;  %v10742_v39 = vld [vmem:[#allocation4 + $0x8a0] sm:$0xff]  }
 0x155   : > { %9683 = vmatpush3.bf16.msra.mxu1 %v10706_v41  ;;  %9662 = vmatprep.subr.bf16.mxu0 %v10707_v43 }
 0x156   : > { %9684 = vmatprep.subr.bf16.mxu1 %v10708_v46  ;;  %v10746_v46 = vld [vmem:[#allocation4 + $0x8a8] sm:$0xff]  }
 0x158   : > { %9663 = vmatpush3.bf16.msra.mxu0 %v10709_v49  ;;  %v10749_v49 = vld [vmem:[#allocation4 + $0x830] sm:$0xff]  }
 0x159   : > { %9685 = vmatpush3.bf16.msra.mxu1 %v10710_v51  ;;  %9664 = vmatprep.subr.bf16.mxu0 %v10711_v54  ;;  %v10751_v51 = vld [vmem:[#allocation4 + $0x878] sm:$0xff]  }
 0x15a   : > { %v9362_v38 = vpop.f32.mrb[0].mxu0  ;;  %9686 = vmatprep.subr.bf16.mxu1 %v10712_v56  ;;  %v10754_v54 = vld [vmem:[#allocation4 + $0x8b8] sm:$0xff]  }
 0x15b   : > { %v9384_v40 = vpop.f32.mrb[0].mxu1  ;;  %v9363_v42 = vpop.f32.mrb[1].mxu0 }
 0x15c   : > { %v9364_v44 = vadd.f32 %v9363_v42, %v9362_v38  ;;  %v9385_v45 = vpop.f32.mrb[1].mxu1  ;;  %v9365_v48 = vpop.f32.mrb[2].mxu0  ;;  %9665 = vmatpush3.bf16.msra.mxu0 %v10713_v57  ;;  %v10743_v42 = vld [vmem:[#allocation4 + $0x868] sm:$0xff]   ;;  %v250_v57 = vld [vmem:[%s11533_s23 + $0x118] sm:$0xff] }
 0x15d   : > { %v9386_v47 = vadd.f32 %v9385_v45, %v9384_v40  ;;  %v9387_v50 = vpop.f32.mrb[2].mxu1  ;;  %v9366_v53 = vpop.f32.mrb[3].mxu0  ;;  %9687 = vmatpush3.bf16.msra.mxu1 %v10714_v58  ;;  %9666 = vmatprep.subr.bf16.mxu0 %v10715_v59  ;;  %v10745_v45 = vld [vmem:[#allocation4 + $0x828] sm:$0xff]   ;;  %v10748_v48 = vld [vmem:[#allocation4 + $0x8f0] sm:$0xff]   ;;  %v247_v58 = vld [vmem:[%s11533_s23 + $0x100] sm:$0xff] }
 0x15e   : > { %v9388_v55 = vpop.f32.mrb[3].mxu1  ;;  %9688 = vmatprep.subr.bf16.mxu1 %v10716_v60  ;;  %v10750_v50 = vld [vmem:[#allocation4 + $0x8b0] sm:$0xff]   ;;  %v10753_v53 = vld [vmem:[#allocation4 + $0x838] sm:$0xff]   ;;  %v346_v60 = vpack.c.bf16 %v250_v57, %v250_v57  ;;  %v10793_v57 = vld [vmem:[#allocation4 + $0xa08] sm:$0xff]  }
 0x15f   : > { %v11571_v52 = vadd.f32 %v9386_v47, %v9364_v44  ;;  %v10744_v44 = vld [vmem:[#allocation4 + $0x8e8] sm:$0xff]   ;;  %v10747_v47 = vld [vmem:[#allocation4 + $0x870] sm:$0xff]  }
 0x160   : > { %9667 = vmatpush3.bf16.msra.mxu0 %v10717_v61  ;;  %v248_v55 = vld [vmem:[%s11533_s23 + $0x108] sm:$0xff]  ;;  %v249_v59 = vld [vmem:[%s11533_s23 + $0x110] sm:$0xff]  ;;  %v343_v61 = vpack.c.bf16 %v247_v58, %v247_v58 }
 0x161   : > { %9689 = vmatpush3.bf16.msra.mxu1 %v10718_v62  ;;  %9668 = vmatprep.subr.bf16.mxu0 %v10719_v63  ;;  %v344_v56 = vpack.c.bf16 %v248_v55, %v248_v55  ;;  %v345_v62 = vpack.c.bf16 %v249_v59, %v249_v59  ;;  %v10755_v63 = vld [vmem:[#allocation4 + $0x940] sm:$0xff]   ;;  %v10791_v55 = vld [vmem:[#allocation4 + $0xa48] sm:$0xff]   ;;  %v10795_v59 = vld [vmem:[#allocation4 + $0xa50] sm:$0xff]  }
 0x162   : > { %9690 = vmatprep.subr.bf16.mxu1 %v10720_v0  ;;  %v10756_v0 = vld [vmem:[#allocation4 + $0x9c0] sm:$0xff]   ;;  %v10794_v58 = vld [vmem:[#allocation4 + $0xa88] sm:$0xff]  }
 0x164   : > { %9669 = vmatpush3.bf16.msra.mxu0 %v10721_v1  ;;  %v10757_v1 = vld [vmem:[#allocation4 + $0x900] sm:$0xff]  }
 0x165   : > { %9691 = vmatpush3.bf16.msra.mxu1 %v10722_v2  ;;  %9698 = vmatprep.subr.bf16.mxu0 %v10723_v11  ;;  %v10758_v2 = vld [vmem:[#allocation4 + $0x980] sm:$0xff]   ;;  %v10767_v11 = vld [vmem:[#allocation4 + $0x958] sm:$0xff]  }
 0x166   : > { %9720 = vmatprep.subr.bf16.mxu1 %v10724_v12  ;;  %v10768_v12 = vld [vmem:[#allocation4 + $0x9d8] sm:$0xff]  }
 0x167   : > { %7144 = vmatmul.mubr.bf16.vlgmr.msra.gmra.mrb[28].mxu0 %v339_v9  ;;  %v10765_v9 = vld [vmem:[#allocation4 + $0x910] sm:$0xff]  }
 0x168   : > { %7184 = vmatmul.mubr.bf16.vlgmr.msra.gmra.mrb[28].mxu1 %v341_v10  ;;  %9699 = vmatpush3.bf16.msra.mxu0 %v10725_v13  ;;  %v10766_v10 = vld [vmem:[#allocation4 + $0x990] sm:$0xff]  }
 0x169   : > { %9721 = vmatpush3.bf16.msra.mxu1 %v10726_v14  ;;  %9700 = vmatprep.subr.bf16.mxu0 %v10727_v15  ;;  %v10769_v14 = vld [vmem:[#allocation4 + $0x918] sm:$0xff]  }
 0x16a   : > { %9722 = vmatprep.subr.bf16.mxu1 %v10728_v16  ;;  %7223 = vmatprep.mubr.bf16.mxu0 %v344_v56  ;;  %v10770_v16 = vld [vmem:[#allocation4 + $0x998] sm:$0xff]   ;;  %v10792_v56 = vld [vmem:[#allocation4 + $0xac8] sm:$0xff]  }
 0x16b   : > { %7263 = vmatprep.mubr.bf16.mxu1 %v346_v60  ;;  %v10796_v60 = vld [vmem:[#allocation4 + $0xad0] sm:$0xff]  }
 0x16c   : > { %9701 = vmatpush3.bf16.msra.mxu0 %v10729_v17 }
 0x16d   : > { %9723 = vmatpush3.bf16.msra.mxu1 %v10730_v18  ;;  %9702 = vmatprep.subr.bf16.mxu0 %v10731_v19  ;;  %v10771_v18 = vld [vmem:[#allocation4 + $0x960] sm:$0xff]  }
 0x16e   : > { %9724 = vmatprep.subr.bf16.mxu1 %v10732_v20 }
 0x170   : > { %9703 = vmatpush3.bf16.msra.mxu0 %v10733_v21  ;;  %v10772_v21 = vld [vmem:[#allocation4 + $0x9e0] sm:$0xff]  }
 0x171   : > { %9725 = vmatpush3.bf16.msra.mxu1 %v10734_v22  ;;  %9704 = vmatprep.subr.bf16.mxu0 %v10735_v23 }
 0x172   : > { %9726 = vmatprep.subr.bf16.mxu1 %v10736_v24  ;;  %v10773_v24 = vld [vmem:[#allocation4 + $0x920] sm:$0xff]  }
 0x174   : > { %9705 = vmatpush3.bf16.msra.mxu0 %v10737_v26 }
 0x175   : > { %9727 = vmatpush3.bf16.msra.mxu1 %v10738_v28  ;;  %9706 = vmatprep.subr.bf16.mxu0 %v10739_v30  ;;  %v10775_v30 = vld [vmem:[#allocation4 + $0x968] sm:$0xff]  }
 0x176   : > { %9728 = vmatprep.subr.bf16.mxu1 %v10740_v33  ;;  %v10777_v33 = vld [vmem:[#allocation4 + $0x928] sm:$0xff]  }
 0x178   : > { %9707 = vmatpush3.bf16.msra.mxu0 %v10741_v36  ;;  %v10780_v36 = vld [vmem:[#allocation4 + $0x9f0] sm:$0xff]  }
 0x179   : > { %9729 = vmatpush3.bf16.msra.mxu1 %v10742_v39  ;;  %9708 = vmatprep.subr.bf16.mxu0 %v10743_v42  ;;  %v10783_v39 = vld [vmem:[#allocation4 + $0x978] sm:$0xff]  }
 0x17a   : > { %v9406_v25 = vpop.f32.mrb[4].mxu0  ;;  %9730 = vmatprep.subr.bf16.mxu1 %v10744_v44  ;;  %v10786_v42 = vld [vmem:[#allocation4 + $0x9b8] sm:$0xff]  }
 0x17b   : > { %v9428_v27 = vpop.f32.mrb[4].mxu1  ;;  %v9407_v29 = vpop.f32.mrb[5].mxu0  ;;  %v254_v44 = vld [vmem:[%s11533_s23 + $0x138] sm:$0xff] }
 0x17c   : > { %v9408_v31 = vadd.f32 %v9407_v29, %v9406_v25  ;;  %v9429_v32 = vpop.f32.mrb[5].mxu1  ;;  %v9409_v35 = vpop.f32.mrb[6].mxu0  ;;  %9709 = vmatpush3.bf16.msra.mxu0 %v10745_v45  ;;  %v251_v45 = vld [vmem:[%s11533_s23 + $0x120] sm:$0xff] }
 0x17d   : > { %v9430_v34 = vadd.f32 %v9429_v32, %v9428_v27  ;;  %v9431_v38 = vpop.f32.mrb[6].mxu1  ;;  %v9410_v40 = vpop.f32.mrb[7].mxu0  ;;  %9731 = vmatpush3.bf16.msra.mxu1 %v10746_v46  ;;  %9710 = vmatprep.subr.bf16.mxu0 %v10747_v47  ;;  %v10774_v27 = vld [vmem:[#allocation4 + $0x9a0] sm:$0xff]   ;;  %v10776_v32 = vld [vmem:[#allocation4 + $0x9e8] sm:$0xff]   ;;  %v10779_v35 = vld [vmem:[#allocation4 + $0x970] sm:$0xff]   ;;  %v350_v47 = vpack.c.bf16 %v254_v44, %v254_v44 }
 0x17e   : > { %v6666_v37 = vadd.f32 %v9408_v31, %v11571_v52  ;;  %v9432_v43 = vpop.f32.mrb[7].mxu1  ;;  %9732 = vmatprep.subr.bf16.mxu1 %v10748_v48  ;;  %v10752_v52 = vld [vmem:[#allocation4 + $0x8f8] sm:$0xff]   ;;  %v10782_v38 = vld [vmem:[#allocation4 + $0x9b0] sm:$0xff]   ;;  %v347_v48 = vpack.c.bf16 %v251_v45, %v251_v45  ;;  %v10824_v44 = vld [vmem:[#allocation4 + $0xbc8] sm:$0xff]  }
 0x17f   : > { %v10784_v40 = vld [vmem:[#allocation4 + $0x9f8] sm:$0xff]   ;;  %v252_v43 = vld [vmem:[%s11533_s23 + $0x128] sm:$0xff] }
 0x180   : > { %v11578_v41 = vadd.f32 %v9430_v34, %v6666_v37  ;;  %9711 = vmatpush3.bf16.msra.mxu0 %v10749_v49  ;;  %v10778_v34 = vld [vmem:[#allocation4 + $0x9a8] sm:$0xff]   ;;  %v10781_v37 = vld [vmem:[#allocation4 + $0x930] sm:$0xff]   ;;  %v348_v46 = vpack.c.bf16 %v252_v43, %v252_v43 }
 0x181   : > { %9733 = vmatpush3.bf16.msra.mxu1 %v10750_v50  ;;  %9712 = vmatprep.subr.bf16.mxu0 %v10751_v51  ;;  %v253_v49 = vld [vmem:[%s11533_s23 + $0x130] sm:$0xff]  ;;  %v10787_v51 = vld [vmem:[#allocation4 + $0xa40] sm:$0xff]   ;;  %v10823_v43 = vld [vmem:[#allocation4 + $0xb48] sm:$0xff]  }
 0x182   : > { %9734 = vmatprep.subr.bf16.mxu1 %v10752_v52  ;;  %v349_v50 = vpack.c.bf16 %v253_v49, %v253_v49  ;;  %v10788_v52 = vld [vmem:[#allocation4 + $0xac0] sm:$0xff]   ;;  %v10825_v45 = vld [vmem:[#allocation4 + $0xb08] sm:$0xff]   ;;  %v10829_v49 = vld [vmem:[#allocation4 + $0xb10] sm:$0xff]  }
 0x184   : > { %9713 = vmatpush3.bf16.msra.mxu0 %v10753_v53  ;;  %v10789_v53 = vld [vmem:[#allocation4 + $0xa00] sm:$0xff]  }
 0x185   : > { %9735 = vmatpush3.bf16.msra.mxu1 %v10754_v54  ;;  %9742 = vmatprep.subr.bf16.mxu0 %v10755_v63  ;;  %v10790_v54 = vld [vmem:[#allocation4 + $0xa80] sm:$0xff]   ;;  %v10799_v63 = vld [vmem:[#allocation4 + $0xa58] sm:$0xff]  }
 0x186   : > { %9764 = vmatprep.subr.bf16.mxu1 %v10756_v0  ;;  %v10800_v0 = vld [vmem:[#allocation4 + $0xad8] sm:$0xff]  }
 0x187   : > { %7224 = vmatmul.mubr.bf16.vlgmr.msra.gmra.mrb[32].mxu0 %v343_v61  ;;  %v10797_v61 = vld [vmem:[#allocation4 + $0xa10] sm:$0xff]  }
 0x188   : > { %7264 = vmatmul.mubr.bf16.vlgmr.msra.gmra.mrb[32].mxu1 %v345_v62  ;;  %9743 = vmatpush3.bf16.msra.mxu0 %v10757_v1  ;;  %v10798_v62 = vld [vmem:[#allocation4 + $0xa90] sm:$0xff]  }
 0x189   : > { %9765 = vmatpush3.bf16.msra.mxu1 %v10758_v2  ;;  %9744 = vmatprep.subr.bf16.mxu0 %v10759_v3  ;;  %v10801_v2 = vld [vmem:[#allocation4 + $0xa18] sm:$0xff]  }
 0x18a   : > { %9766 = vmatprep.subr.bf16.mxu1 %v10760_v4  ;;  %7303 = vmatprep.mubr.bf16.mxu0 %v348_v46  ;;  %v10802_v4 = vld [vmem:[#allocation4 + $0xa98] sm:$0xff]   ;;  %v10826_v46 = vld [vmem:[#allocation4 + $0xb88] sm:$0xff]  }
 0x18b   : > { %7343 = vmatprep.mubr.bf16.mxu1 %v350_v47  ;;  %v10827_v47 = vld [vmem:[#allocation4 + $0xb50] sm:$0xff]  }
 0x18c   : > { %9745 = vmatpush3.bf16.msra.mxu0 %v10761_v5 }
 0x18d   : > { %9767 = vmatpush3.bf16.msra.mxu1 %v10762_v6  ;;  %9746 = vmatprep.subr.bf16.mxu0 %v10763_v7  ;;  %v10803_v6 = vld [vmem:[#allocation4 + $0xa60] sm:$0xff]  }
 0x18e   : > { %9768 = vmatprep.subr.bf16.mxu1 %v10764_v8 }
 0x190   : > { %9747 = vmatpush3.bf16.msra.mxu0 %v10765_v9  ;;  %v10804_v9 = vld [vmem:[#allocation4 + $0xae0] sm:$0xff]  }
 0x191   : > { %9769 = vmatpush3.bf16.msra.mxu1 %v10766_v10  ;;  %9748 = vmatprep.subr.bf16.mxu0 %v10767_v11 }
 0x192   : > { %9770 = vmatprep.subr.bf16.mxu1 %v10768_v12  ;;  %v10805_v12 = vld [vmem:[#allocation4 + $0xa20] sm:$0xff]  }
 0x194   : > { %9749 = vmatpush3.bf16.msra.mxu0 %v10769_v14 }
 0x195   : > { %9771 = vmatpush3.bf16.msra.mxu1 %v10770_v16  ;;  %9750 = vmatprep.subr.bf16.mxu0 %v10771_v18  ;;  %v10807_v18 = vld [vmem:[#allocation4 + $0xa68] sm:$0xff]  }
 0x196   : > { %9772 = vmatprep.subr.bf16.mxu1 %v10772_v21  ;;  %v10809_v21 = vld [vmem:[#allocation4 + $0xa28] sm:$0xff]  }
 0x198   : > { %9751 = vmatpush3.bf16.msra.mxu0 %v10773_v24  ;;  %v10812_v24 = vld [vmem:[#allocation4 + $0xaf0] sm:$0xff]  }
 0x199   : > { %9773 = vmatpush3.bf16.msra.mxu1 %v10774_v27  ;;  %9752 = vmatprep.subr.bf16.mxu0 %v10775_v30  ;;  %v10815_v27 = vld [vmem:[#allocation4 + $0xa78] sm:$0xff]  }
 0x19a   : > { %v9450_v13 = vpop.f32.mrb[8].mxu0  ;;  %9774 = vmatprep.subr.bf16.mxu1 %v10776_v32  ;;  %v10818_v30 = vld [vmem:[#allocation4 + $0xab8] sm:$0xff]  }
 0x19b   : > { %v9472_v15 = vpop.f32.mrb[8].mxu1  ;;  %v9451_v17 = vpop.f32.mrb[9].mxu0  ;;  %v258_v32 = vld [vmem:[%s11533_s23 + $0x158] sm:$0xff] }
 0x19c   : > { %v9452_v19 = vadd.f32 %v9451_v17, %v9450_v13  ;;  %v9473_v20 = vpop.f32.mrb[9].mxu1  ;;  %v9453_v23 = vpop.f32.mrb[10].mxu0  ;;  %9753 = vmatpush3.bf16.msra.mxu0 %v10777_v33 }
 0x19d   : > { %v9474_v22 = vadd.f32 %v9473_v20, %v9472_v15  ;;  %v9475_v26 = vpop.f32.mrb[10].mxu1  ;;  %v9454_v28 = vpop.f32.mrb[11].mxu0  ;;  %9775 = vmatpush3.bf16.msra.mxu1 %v10778_v34  ;;  %9754 = vmatprep.subr.bf16.mxu0 %v10779_v35  ;;  %v10806_v15 = vld [vmem:[#allocation4 + $0xaa0] sm:$0xff]   ;;  %v10808_v20 = vld [vmem:[#allocation4 + $0xae8] sm:$0xff]   ;;  %v10811_v23 = vld [vmem:[#allocation4 + $0xa70] sm:$0xff]   ;;  %v354_v34 = vpack.c.bf16 %v258_v32, %v258_v32 }
 0x19e   : > { %v6746_v25 = vadd.f32 %v9452_v19, %v11578_v41  ;;  %v9476_v31 = vpop.f32.mrb[11].mxu1  ;;  %9776 = vmatprep.subr.bf16.mxu1 %v10780_v36  ;;  %v10785_v41 = vld [vmem:[#allocation4 + $0x938] sm:$0xff]   ;;  %v10814_v26 = vld [vmem:[#allocation4 + $0xab0] sm:$0xff]   ;;  %v255_v35 = vld [vmem:[%s11533_s23 + $0x140] sm:$0xff] }
 0x19f   : > { %v10816_v28 = vld [vmem:[#allocation4 + $0xaf8] sm:$0xff]   ;;  %v256_v31 = vld [vmem:[%s11533_s23 + $0x148] sm:$0xff]  ;;  %v257_v36 = vld [vmem:[%s11533_s23 + $0x150] sm:$0xff] }
 0x1a0   : > { %v11585_v29 = vadd.f32 %v9474_v22, %v6746_v25  ;;  %9755 = vmatpush3.bf16.msra.mxu0 %v10781_v37  ;;  %v10810_v22 = vld [vmem:[#allocation4 + $0xaa8] sm:$0xff]   ;;  %v10813_v25 = vld [vmem:[#allocation4 + $0xa30] sm:$0xff]   ;;  %v352_v33 = vpack.c.bf16 %v256_v31, %v256_v31  ;;  %v351_v37 = vpack.c.bf16 %v255_v35, %v255_v35 }
 0x1a1   : > { %9777 = vmatpush3.bf16.msra.mxu1 %v10782_v38  ;;  %9756 = vmatprep.subr.bf16.mxu0 %v10783_v39  ;;  %v353_v38 = vpack.c.bf16 %v257_v36, %v257_v36  ;;  %v10819_v39 = vld [vmem:[#allocation4 + $0xb40] sm:$0xff]   ;;  %v10855_v31 = vld [vmem:[#allocation4 + $0xc48] sm:$0xff]   ;;  %v10859_v35 = vld [vmem:[#allocation4 + $0xc50] sm:$0xff]  }
 0x1a2   : > { %9778 = vmatprep.subr.bf16.mxu1 %v10784_v40  ;;  %v10820_v40 = vld [vmem:[#allocation4 + $0xbc0] sm:$0xff]   ;;  %v10856_v32 = vld [vmem:[#allocation4 + $0xcc8] sm:$0xff]   ;;  %v10860_v36 = vld [vmem:[#allocation4 + $0xcd0] sm:$0xff]  }
 0x1a4   : > { %9757 = vmatpush3.bf16.msra.mxu0 %v10785_v41  ;;  %v10821_v41 = vld [vmem:[#allocation4 + $0xb00] sm:$0xff]  }
 0x1a5   : > { %9779 = vmatpush3.bf16.msra.mxu1 %v10786_v42  ;;  %9786 = vmatprep.subr.bf16.mxu0 %v10787_v51  ;;  %v10822_v42 = vld [vmem:[#allocation4 + $0xb80] sm:$0xff]   ;;  %v10831_v51 = vld [vmem:[#allocation4 + $0xb58] sm:$0xff]  }
 0x1a6   : > { %9808 = vmatprep.subr.bf16.mxu1 %v10788_v52  ;;  %v10832_v52 = vld [vmem:[#allocation4 + $0xbd8] sm:$0xff]  }
 0x1a7   : > { %7304 = vmatmul.mubr.bf16.vlgmr.msra.gmra.mrb[36].mxu0 %v347_v48  ;;  %v10828_v48 = vld [vmem:[#allocation4 + $0xbd0] sm:$0xff]  }
 0x1a8   : > { %7344 = vmatmul.mubr.bf16.vlgmr.msra.gmra.mrb[36].mxu1 %v349_v50  ;;  %9787 = vmatpush3.bf16.msra.mxu0 %v10789_v53  ;;  %v10830_v50 = vld [vmem:[#allocation4 + $0xb90] sm:$0xff]  }
 0x1a9   : > { %9809 = vmatpush3.bf16.msra.mxu1 %v10790_v54  ;;  %9788 = vmatprep.subr.bf16.mxu0 %v10791_v55  ;;  %v10833_v54 = vld [vmem:[#allocation4 + $0xb18] sm:$0xff]  }
 0x1aa   : > { %9810 = vmatprep.subr.bf16.mxu1 %v10792_v56  ;;  %7383 = vmatprep.mubr.bf16.mxu0 %v352_v33  ;;  %v10834_v56 = vld [vmem:[#allocation4 + $0xb98] sm:$0xff]   ;;  %v10857_v33 = vld [vmem:[#allocation4 + $0xc08] sm:$0xff]  }
 0x1ab   : > { %7423 = vmatprep.mubr.bf16.mxu1 %v354_v34  ;;  %v10858_v34 = vld [vmem:[#allocation4 + $0xc88] sm:$0xff]  }
 0x1ac   : > { %9789 = vmatpush3.bf16.msra.mxu0 %v10793_v57 }
 0x1ad   : > { %9811 = vmatpush3.bf16.msra.mxu1 %v10794_v58  ;;  %9790 = vmatprep.subr.bf16.mxu0 %v10795_v59  ;;  %v10835_v58 = vld [vmem:[#allocation4 + $0xb60] sm:$0xff]  }
 0x1ae   : > { %9812 = vmatprep.subr.bf16.mxu1 %v10796_v60 }
 0x1b0   : > { %9791 = vmatpush3.bf16.msra.mxu0 %v10797_v61  ;;  %v10836_v61 = vld [vmem:[#allocation4 + $0xbe0] sm:$0xff]  }
 0x1b1   : > { %9813 = vmatpush3.bf16.msra.mxu1 %v10798_v62  ;;  %9792 = vmatprep.subr.bf16.mxu0 %v10799_v63 }
 0x1b2   : > { %9814 = vmatprep.subr.bf16.mxu1 %v10800_v0  ;;  %v10837_v0 = vld [vmem:[#allocation4 + $0xb20] sm:$0xff]  }
 0x1b4   : > { %9793 = vmatpush3.bf16.msra.mxu0 %v10801_v2 }
 0x1b5   : > { %9815 = vmatpush3.bf16.msra.mxu1 %v10802_v4  ;;  %9794 = vmatprep.subr.bf16.mxu0 %v10803_v6  ;;  %v10839_v6 = vld [vmem:[#allocation4 + $0xb68] sm:$0xff]  }
 0x1b6   : > { %9816 = vmatprep.subr.bf16.mxu1 %v10804_v9  ;;  %v10841_v9 = vld [vmem:[#allocation4 + $0xb28] sm:$0xff]  }
 0x1b8   : > { %9795 = vmatpush3.bf16.msra.mxu0 %v10805_v12  ;;  %v10844_v12 = vld [vmem:[#allocation4 + $0xbf0] sm:$0xff]  }
 0x1b9   : > { %9817 = vmatpush3.bf16.msra.mxu1 %v10806_v15  ;;  %9796 = vmatprep.subr.bf16.mxu0 %v10807_v18  ;;  %v10847_v15 = vld [vmem:[#allocation4 + $0xb78] sm:$0xff]  }
 0x1ba   : > { %v9494_v1 = vpop.f32.mrb[12].mxu0  ;;  %9818 = vmatprep.subr.bf16.mxu1 %v10808_v20  ;;  %v10850_v18 = vld [vmem:[#allocation4 + $0xbb8] sm:$0xff]  }
 0x1bb   : > { %v9516_v3 = vpop.f32.mrb[12].mxu1  ;;  %v9495_v5 = vpop.f32.mrb[13].mxu0 }
 0x1bc   : > { %v9496_v7 = vadd.f32 %v9495_v5, %v9494_v1  ;;  %v9517_v8 = vpop.f32.mrb[13].mxu1  ;;  %v9497_v11 = vpop.f32.mrb[14].mxu0  ;;  %9797 = vmatpush3.bf16.msra.mxu0 %v10809_v21  ;;  %v262_v21 = vld [vmem:[%s11533_s23 + $0x178] sm:$0xff] }
 0x1bd   : > { %v9518_v10 = vadd.f32 %v9517_v8, %v9516_v3  ;;  %v9519_v14 = vpop.f32.mrb[14].mxu1  ;;  %v9498_v16 = vpop.f32.mrb[15].mxu0  ;;  %9819 = vmatpush3.bf16.msra.mxu1 %v10810_v22  ;;  %9798 = vmatprep.subr.bf16.mxu0 %v10811_v23  ;;  %v10838_v3 = vld [vmem:[#allocation4 + $0xba0] sm:$0xff]   ;;  %v10840_v8 = vld [vmem:[#allocation4 + $0xbe8] sm:$0xff]   ;;  %v10843_v11 = vld [vmem:[#allocation4 + $0xb70] sm:$0xff]  }
 0x1be   : > { %v6826_v13 = vadd.f32 %v9496_v7, %v11585_v29  ;;  %v9520_v19 = vpop.f32.mrb[15].mxu1  ;;  %9820 = vmatprep.subr.bf16.mxu1 %v10812_v24  ;;  %v10817_v29 = vld [vmem:[#allocation4 + $0xa38] sm:$0xff]   ;;  %v10846_v14 = vld [vmem:[#allocation4 + $0xbb0] sm:$0xff]   ;;  %v259_v22 = vld [vmem:[%s11533_s23 + $0x160] sm:$0xff]  ;;  %v358_v24 = vpack.c.bf16 %v262_v21, %v262_v21 }
 0x1bf   : > { %v10848_v16 = vld [vmem:[#allocation4 + $0xbf8] sm:$0xff]   ;;  %v260_v19 = vld [vmem:[%s11533_s23 + $0x168] sm:$0xff]  ;;  %v261_v23 = vld [vmem:[%s11533_s23 + $0x170] sm:$0xff] }
 0x1c0   : > { %v11592_v17 = vadd.f32 %v9518_v10, %v6826_v13  ;;  %9799 = vmatpush3.bf16.msra.mxu0 %v10813_v25  ;;  %v10842_v10 = vld [vmem:[#allocation4 + $0xba8] sm:$0xff]   ;;  %v10845_v13 = vld [vmem:[#allocation4 + $0xb30] sm:$0xff]   ;;  %v356_v20 = vpack.c.bf16 %v260_v19, %v260_v19  ;;  %v355_v25 = vpack.c.bf16 %v259_v22, %v259_v22 }
 0x1c1   : > { %9821 = vmatpush3.bf16.msra.mxu1 %v10814_v26  ;;  %9800 = vmatprep.subr.bf16.mxu0 %v10815_v27  ;;  %v357_v26 = vpack.c.bf16 %v261_v23, %v261_v23  ;;  %v10851_v27 = vld [vmem:[#allocation4 + $0xc40] sm:$0xff]   ;;  %v10887_v19 = vld [vmem:[#allocation4 + $0xd48] sm:$0xff]   ;;  %v10891_v23 = vld [vmem:[#allocation4 + $0xd50] sm:$0xff]  }
 0x1c2   : > { %9822 = vmatprep.subr.bf16.mxu1 %v10816_v28  ;;  %v10852_v28 = vld [vmem:[#allocation4 + $0xcc0] sm:$0xff]   ;;  %v10889_v21 = vld [vmem:[#allocation4 + $0xd08] sm:$0xff]  }
 0x1c3   : > { %v10890_v22 = vld [vmem:[#allocation4 + $0xd88] sm:$0xff]  }
 0x1c4   : > { %9801 = vmatpush3.bf16.msra.mxu0 %v10817_v29  ;;  %v10853_v29 = vld [vmem:[#allocation4 + $0xc00] sm:$0xff]  }
 0x1c5   : > { %9823 = vmatpush3.bf16.msra.mxu1 %v10818_v30  ;;  %9830 = vmatprep.subr.bf16.mxu0 %v10819_v39  ;;  %v10854_v30 = vld [vmem:[#allocation4 + $0xc80] sm:$0xff]   ;;  %v10863_v39 = vld [vmem:[#allocation4 + $0xc58] sm:$0xff]  }
 0x1c6   : > { %9852 = vmatprep.subr.bf16.mxu1 %v10820_v40  ;;  %v10864_v40 = vld [vmem:[#allocation4 + $0xcd8] sm:$0xff]  }
 0x1c7   : > { %7384 = vmatmul.mubr.bf16.vlgmr.msra.gmra.mrb[40].mxu0 %v351_v37  ;;  %v10861_v37 = vld [vmem:[#allocation4 + $0xc10] sm:$0xff]  }
 0x1c8   : > { %7424 = vmatmul.mubr.bf16.vlgmr.msra.gmra.mrb[40].mxu1 %v353_v38  ;;  %9831 = vmatpush3.bf16.msra.mxu0 %v10821_v41  ;;  %v10862_v38 = vld [vmem:[#allocation4 + $0xc90] sm:$0xff]  }
 0x1c9   : > { %9853 = vmatpush3.bf16.msra.mxu1 %v10822_v42  ;;  %9832 = vmatprep.subr.bf16.mxu0 %v10823_v43  ;;  %v10865_v42 = vld [vmem:[#allocation4 + $0xc18] sm:$0xff]  }
 0x1ca   : > { %9854 = vmatprep.subr.bf16.mxu1 %v10824_v44  ;;  %7463 = vmatprep.mubr.bf16.mxu0 %v356_v20  ;;  %v10866_v44 = vld [vmem:[#allocation4 + $0xc98] sm:$0xff]   ;;  %v10888_v20 = vld [vmem:[#allocation4 + $0xdc8] sm:$0xff]  }
 0x1cb   : > { %7503 = vmatprep.mubr.bf16.mxu1 %v358_v24  ;;  %v10892_v24 = vld [vmem:[#allocation4 + $0xdd0] sm:$0xff]  }
 0x1cc   : > { %9833 = vmatpush3.bf16.msra.mxu0 %v10825_v45 }
 0x1cd   : > { %9855 = vmatpush3.bf16.msra.mxu1 %v10826_v46  ;;  %9834 = vmatprep.subr.bf16.mxu0 %v10827_v47  ;;  %v10867_v46 = vld [vmem:[#allocation4 + $0xc60] sm:$0xff]  }
 0x1ce   : > { %9856 = vmatprep.subr.bf16.mxu1 %v10828_v48 }
 0x1d0   : > { %9835 = vmatpush3.bf16.msra.mxu0 %v10829_v49  ;;  %v10868_v49 = vld [vmem:[#allocation4 + $0xce0] sm:$0xff]  }
 0x1d1   : > { %9857 = vmatpush3.bf16.msra.mxu1 %v10830_v50  ;;  %9836 = vmatprep.subr.bf16.mxu0 %v10831_v51 }
 0x1d2   : > { %9858 = vmatprep.subr.bf16.mxu1 %v10832_v52  ;;  %v10869_v52 = vld [vmem:[#allocation4 + $0xc20] sm:$0xff]  }
 0x1d4   : > { %9837 = vmatpush3.bf16.msra.mxu0 %v10833_v54 }
 0x1d5   : > { %9859 = vmatpush3.bf16.msra.mxu1 %v10834_v56  ;;  %9838 = vmatprep.subr.bf16.mxu0 %v10835_v58  ;;  %v10871_v58 = vld [vmem:[#allocation4 + $0xc68] sm:$0xff]  }
 0x1d6   : > { %9860 = vmatprep.subr.bf16.mxu1 %v10836_v61  ;;  %v10873_v61 = vld [vmem:[#allocation4 + $0xc28] sm:$0xff]  }
 0x1d8   : > { %9839 = vmatpush3.bf16.msra.mxu0 %v10837_v0  ;;  %v10876_v0 = vld [vmem:[#allocation4 + $0xcf0] sm:$0xff]  }
 0x1d9   : > { %9861 = vmatpush3.bf16.msra.mxu1 %v10838_v3  ;;  %9840 = vmatprep.subr.bf16.mxu0 %v10839_v6  ;;  %v10879_v3 = vld [vmem:[#allocation4 + $0xc78] sm:$0xff]  }
 0x1da   : > { %v9538_v53 = vpop.f32.mrb[16].mxu0  ;;  %9862 = vmatprep.subr.bf16.mxu1 %v10840_v8  ;;  %v10882_v6 = vld [vmem:[#allocation4 + $0xcb8] sm:$0xff]  }
 0x1db   : > { %v9560_v55 = vpop.f32.mrb[16].mxu1  ;;  %v9539_v57 = vpop.f32.mrb[17].mxu0  ;;  %v266_v8 = vld [vmem:[%s11533_s23 + $0x198] sm:$0xff] }
 0x1dc   : > { %v9540_v59 = vadd.f32 %v9539_v57, %v9538_v53  ;;  %v9561_v60 = vpop.f32.mrb[17].mxu1  ;;  %v9541_v63 = vpop.f32.mrb[18].mxu0  ;;  %9841 = vmatpush3.bf16.msra.mxu0 %v10841_v9  ;;  %v263_v9 = vld [vmem:[%s11533_s23 + $0x180] sm:$0xff] }
 0x1dd   : > { %v9562_v62 = vadd.f32 %v9561_v60, %v9560_v55  ;;  %v9563_v2 = vpop.f32.mrb[18].mxu1  ;;  %v9542_v4 = vpop.f32.mrb[19].mxu0  ;;  %9863 = vmatpush3.bf16.msra.mxu1 %v10842_v10  ;;  %9842 = vmatprep.subr.bf16.mxu0 %v10843_v11  ;;  %v10870_v55 = vld [vmem:[#allocation4 + $0xca0] sm:$0xff]   ;;  %v10872_v60 = vld [vmem:[#allocation4 + $0xce8] sm:$0xff]   ;;  %v10875_v63 = vld [vmem:[#allocation4 + $0xc70] sm:$0xff]   ;;  %v362_v11 = vpack.c.bf16 %v266_v8, %v266_v8 }
 0x1de   : > { %v6906_v1 = vadd.f32 %v9540_v59, %v11592_v17  ;;  %v9564_v7 = vpop.f32.mrb[19].mxu1  ;;  %9864 = vmatprep.subr.bf16.mxu1 %v10844_v12  ;;  %v10849_v17 = vld [vmem:[#allocation4 + $0xb38] sm:$0xff]   ;;  %v10878_v2 = vld [vmem:[#allocation4 + $0xcb0] sm:$0xff]   ;;  %v359_v12 = vpack.c.bf16 %v263_v9, %v263_v9  ;;  %v10920_v8 = vld [vmem:[#allocation4 + $0xec8] sm:$0xff]  }
 0x1df   : > { %v10880_v4 = vld [vmem:[#allocation4 + $0xcf8] sm:$0xff]   ;;  %v264_v7 = vld [vmem:[%s11533_s23 + $0x188] sm:$0xff] }
 0x1e0   : > { %v11599_v5 = vadd.f32 %v9562_v62, %v6906_v1  ;;  %9843 = vmatpush3.bf16.msra.mxu0 %v10845_v13  ;;  %v10874_v62 = vld [vmem:[#allocation4 + $0xca8] sm:$0xff]   ;;  %v10877_v1 = vld [vmem:[#allocation4 + $0xc30] sm:$0xff]   ;;  %v360_v10 = vpack.c.bf16 %v264_v7, %v264_v7 }
 0x1e1   : > { %9865 = vmatpush3.bf16.msra.mxu1 %v10846_v14  ;;  %9844 = vmatprep.subr.bf16.mxu0 %v10847_v15  ;;  %v265_v13 = vld [vmem:[%s11533_s23 + $0x190] sm:$0xff]  ;;  %v10883_v15 = vld [vmem:[#allocation4 + $0xd40] sm:$0xff]   ;;  %v10919_v7 = vld [vmem:[#allocation4 + $0xe48] sm:$0xff]  }
 0x1e2   : > { %9866 = vmatprep.subr.bf16.mxu1 %v10848_v16  ;;  %v361_v14 = vpack.c.bf16 %v265_v13, %v265_v13  ;;  %v10884_v16 = vld [vmem:[#allocation4 + $0xdc0] sm:$0xff]   ;;  %v10921_v9 = vld [vmem:[#allocation4 + $0xe08] sm:$0xff]   ;;  %v10925_v13 = vld [vmem:[#allocation4 + $0xe10] sm:$0xff]  }
 0x1e4   : > { %9845 = vmatpush3.bf16.msra.mxu0 %v10849_v17  ;;  %v10885_v17 = vld [vmem:[#allocation4 + $0xd00] sm:$0xff]  }
 0x1e5   : > { %9867 = vmatpush3.bf16.msra.mxu1 %v10850_v18  ;;  %9874 = vmatprep.subr.bf16.mxu0 %v10851_v27  ;;  %v10886_v18 = vld [vmem:[#allocation4 + $0xd80] sm:$0xff]   ;;  %v10895_v27 = vld [vmem:[#allocation4 + $0xd58] sm:$0xff]  }
 0x1e6   : > { %9896 = vmatprep.subr.bf16.mxu1 %v10852_v28  ;;  %v10896_v28 = vld [vmem:[#allocation4 + $0xdd8] sm:$0xff]  }
 0x1e7   : > { %7464 = vmatmul.mubr.bf16.vlgmr.msra.gmra.mrb[44].mxu0 %v355_v25  ;;  %v10893_v25 = vld [vmem:[#allocation4 + $0xd10] sm:$0xff]  }
 0x1e8   : > { %7504 = vmatmul.mubr.bf16.vlgmr.msra.gmra.mrb[44].mxu1 %v357_v26  ;;  %9875 = vmatpush3.bf16.msra.mxu0 %v10853_v29  ;;  %v10894_v26 = vld [vmem:[#allocation4 + $0xd90] sm:$0xff]  }
 0x1e9   : > { %9897 = vmatpush3.bf16.msra.mxu1 %v10854_v30  ;;  %9876 = vmatprep.subr.bf16.mxu0 %v10855_v31  ;;  %v10897_v30 = vld [vmem:[#allocation4 + $0xd18] sm:$0xff]  }
 0x1ea   : > { %9898 = vmatprep.subr.bf16.mxu1 %v10856_v32  ;;  %7543 = vmatprep.mubr.bf16.mxu0 %v360_v10  ;;  %v10898_v32 = vld [vmem:[#allocation4 + $0xd98] sm:$0xff]   ;;  %v10922_v10 = vld [vmem:[#allocation4 + $0xe88] sm:$0xff]  }
 0x1eb   : > { %7583 = vmatprep.mubr.bf16.mxu1 %v362_v11  ;;  %v10923_v11 = vld [vmem:[#allocation4 + $0xe50] sm:$0xff]  }
 0x1ec   : > { %9877 = vmatpush3.bf16.msra.mxu0 %v10857_v33 }
 0x1ed   : > { %9899 = vmatpush3.bf16.msra.mxu1 %v10858_v34  ;;  %9878 = vmatprep.subr.bf16.mxu0 %v10859_v35  ;;  %v10899_v34 = vld [vmem:[#allocation4 + $0xd60] sm:$0xff]  }
 0x1ee   : > { %9900 = vmatprep.subr.bf16.mxu1 %v10860_v36 }
 0x1f0   : > { %9879 = vmatpush3.bf16.msra.mxu0 %v10861_v37  ;;  %v10900_v37 = vld [vmem:[#allocation4 + $0xde0] sm:$0xff]  }
 0x1f1   : > { %9901 = vmatpush3.bf16.msra.mxu1 %v10862_v38  ;;  %9880 = vmatprep.subr.bf16.mxu0 %v10863_v39 }
 0x1f2   : > { %9902 = vmatprep.subr.bf16.mxu1 %v10864_v40  ;;  %v10901_v40 = vld [vmem:[#allocation4 + $0xd20] sm:$0xff]  }
 0x1f4   : > { %9881 = vmatpush3.bf16.msra.mxu0 %v10865_v42 }
 0x1f5   : > { %9903 = vmatpush3.bf16.msra.mxu1 %v10866_v44  ;;  %9882 = vmatprep.subr.bf16.mxu0 %v10867_v46  ;;  %v10903_v46 = vld [vmem:[#allocation4 + $0xd68] sm:$0xff]  }
 0x1f6   : > { %9904 = vmatprep.subr.bf16.mxu1 %v10868_v49  ;;  %v10905_v49 = vld [vmem:[#allocation4 + $0xd28] sm:$0xff]  }
 0x1f8   : > { %9883 = vmatpush3.bf16.msra.mxu0 %v10869_v52  ;;  %v10908_v52 = vld [vmem:[#allocation4 + $0xdf0] sm:$0xff]  }
 0x1f9   : > { %9905 = vmatpush3.bf16.msra.mxu1 %v10870_v55  ;;  %9884 = vmatprep.subr.bf16.mxu0 %v10871_v58  ;;  %v10911_v55 = vld [vmem:[#allocation4 + $0xd78] sm:$0xff]  }
 0x1fa   : > { %v9582_v41 = vpop.f32.mrb[20].mxu0  ;;  %9906 = vmatprep.subr.bf16.mxu1 %v10872_v60  ;;  %v10914_v58 = vld [vmem:[#allocation4 + $0xdb8] sm:$0xff]  }
 0x1fb   : > { %v9604_v43 = vpop.f32.mrb[20].mxu1  ;;  %v9583_v45 = vpop.f32.mrb[21].mxu0  ;;  %v270_v60 = vld [vmem:[%s11533_s23 + $0x1b8] sm:$0xff] }
 0x1fc   : > { %v9584_v47 = vadd.f32 %v9583_v45, %v9582_v41  ;;  %v9605_v48 = vpop.f32.mrb[21].mxu1  ;;  %v9585_v51 = vpop.f32.mrb[22].mxu0  ;;  %9885 = vmatpush3.bf16.msra.mxu0 %v10873_v61 }
 0x1fd   : > { %v9606_v50 = vadd.f32 %v9605_v48, %v9604_v43  ;;  %v9607_v54 = vpop.f32.mrb[22].mxu1  ;;  %v9586_v56 = vpop.f32.mrb[23].mxu0  ;;  %9907 = vmatpush3.bf16.msra.mxu1 %v10874_v62  ;;  %9886 = vmatprep.subr.bf16.mxu0 %v10875_v63  ;;  %v10902_v43 = vld [vmem:[#allocation4 + $0xda0] sm:$0xff]   ;;  %v10904_v48 = vld [vmem:[#allocation4 + $0xde8] sm:$0xff]   ;;  %v10907_v51 = vld [vmem:[#allocation4 + $0xd70] sm:$0xff]   ;;  %v366_v62 = vpack.c.bf16 %v270_v60, %v270_v60 }
 0x1fe   : > { %v6986_v53 = vadd.f32 %v9584_v47, %v11599_v5  ;;  %v9608_v59 = vpop.f32.mrb[23].mxu1  ;;  %9908 = vmatprep.subr.bf16.mxu1 %v10876_v0  ;;  %v10881_v5 = vld [vmem:[#allocation4 + $0xc38] sm:$0xff]   ;;  %v10910_v54 = vld [vmem:[#allocation4 + $0xdb0] sm:$0xff]   ;;  %v267_v63 = vld [vmem:[%s11533_s23 + $0x1a0] sm:$0xff] }
 0x1ff   : > { %v10912_v56 = vld [vmem:[#allocation4 + $0xdf8] sm:$0xff]   ;;  %v268_v59 = vld [vmem:[%s11533_s23 + $0x1a8] sm:$0xff]  ;;  %v269_v0 = vld [vmem:[%s11533_s23 + $0x1b0] sm:$0xff] }
 0x200   : > { %v11606_v57 = vadd.f32 %v9606_v50, %v6986_v53  ;;  %9887 = vmatpush3.bf16.msra.mxu0 %v10877_v1  ;;  %v10906_v50 = vld [vmem:[#allocation4 + $0xda8] sm:$0xff]   ;;  %v10909_v53 = vld [vmem:[#allocation4 + $0xd30] sm:$0xff]   ;;  %v364_v61 = vpack.c.bf16 %v268_v59, %v268_v59  ;;  %v363_v1 = vpack.c.bf16 %v267_v63, %v267_v63 }
 0x201   : > { %9909 = vmatpush3.bf16.msra.mxu1 %v10878_v2  ;;  %9888 = vmatprep.subr.bf16.mxu0 %v10879_v3  ;;  %v365_v2 = vpack.c.bf16 %v269_v0, %v269_v0  ;;  %v10915_v3 = vld [vmem:[#allocation4 + $0xe40] sm:$0xff]   ;;  %v10951_v59 = vld [vmem:[#allocation4 + $0xf48] sm:$0xff]   ;;  %v10955_v63 = vld [vmem:[#allocation4 + $0xf50] sm:$0xff]  }
 0x202   : > { %9910 = vmatprep.subr.bf16.mxu1 %v10880_v4  ;;  %v10916_v4 = vld [vmem:[#allocation4 + $0xec0] sm:$0xff]   ;;  %v10952_v60 = vld [vmem:[#allocation4 + $0xfc8] sm:$0xff]   ;;  %v10956_v0 = vld [vmem:[#allocation4 + $0xfd0] sm:$0xff]  }
 0x204   : > { %9889 = vmatpush3.bf16.msra.mxu0 %v10881_v5  ;;  %v10917_v5 = vld [vmem:[#allocation4 + $0xe00] sm:$0xff]  }
 0x205   : > { %9911 = vmatpush3.bf16.msra.mxu1 %v10882_v6  ;;  %9918 = vmatprep.subr.bf16.mxu0 %v10883_v15  ;;  %v10918_v6 = vld [vmem:[#allocation4 + $0xe80] sm:$0xff]   ;;  %v10927_v15 = vld [vmem:[#allocation4 + $0xe58] sm:$0xff]  }
 0x206   : > { %9940 = vmatprep.subr.bf16.mxu1 %v10884_v16  ;;  %v10928_v16 = vld [vmem:[#allocation4 + $0xed8] sm:$0xff]  }
 0x207   : > { %7544 = vmatmul.mubr.bf16.vlgmr.msra.gmra.mrb[48].mxu0 %v359_v12  ;;  %v10924_v12 = vld [vmem:[#allocation4 + $0xed0] sm:$0xff]  }
 0x208   : > { %7584 = vmatmul.mubr.bf16.vlgmr.msra.gmra.mrb[48].mxu1 %v361_v14  ;;  %9919 = vmatpush3.bf16.msra.mxu0 %v10885_v17  ;;  %v10926_v14 = vld [vmem:[#allocation4 + $0xe90] sm:$0xff]  }
 0x209   : > { %9941 = vmatpush3.bf16.msra.mxu1 %v10886_v18  ;;  %9920 = vmatprep.subr.bf16.mxu0 %v10887_v19  ;;  %v10929_v18 = vld [vmem:[#allocation4 + $0xe18] sm:$0xff]  }
 0x20a   : > { %9942 = vmatprep.subr.bf16.mxu1 %v10888_v20  ;;  %7623 = vmatprep.mubr.bf16.mxu0 %v364_v61  ;;  %v10930_v20 = vld [vmem:[#allocation4 + $0xe98] sm:$0xff]   ;;  %v10953_v61 = vld [vmem:[#allocation4 + $0xf08] sm:$0xff]  }
 0x20b   : > { %7663 = vmatprep.mubr.bf16.mxu1 %v366_v62  ;;  %v10954_v62 = vld [vmem:[#allocation4 + $0xf88] sm:$0xff]  }
 0x20c   : > { %9921 = vmatpush3.bf16.msra.mxu0 %v10889_v21 }
 0x20d   : > { %9943 = vmatpush3.bf16.msra.mxu1 %v10890_v22  ;;  %9922 = vmatprep.subr.bf16.mxu0 %v10891_v23  ;;  %v10931_v22 = vld [vmem:[#allocation4 + $0xe60] sm:$0xff]  }
 0x20e   : > { %9944 = vmatprep.subr.bf16.mxu1 %v10892_v24 }
 0x210   : > { %9923 = vmatpush3.bf16.msra.mxu0 %v10893_v25  ;;  %v10932_v25 = vld [vmem:[#allocation4 + $0xee0] sm:$0xff]  }
 0x211   : > { %9945 = vmatpush3.bf16.msra.mxu1 %v10894_v26  ;;  %9924 = vmatprep.subr.bf16.mxu0 %v10895_v27 }
 0x212   : > { %9946 = vmatprep.subr.bf16.mxu1 %v10896_v28  ;;  %v10933_v28 = vld [vmem:[#allocation4 + $0xe20] sm:$0xff]  }
 0x214   : > { %9925 = vmatpush3.bf16.msra.mxu0 %v10897_v30 }
 0x215   : > { %9947 = vmatpush3.bf16.msra.mxu1 %v10898_v32  ;;  %9926 = vmatprep.subr.bf16.mxu0 %v10899_v34  ;;  %v10935_v34 = vld [vmem:[#allocation4 + $0xe68] sm:$0xff]  }
 0x216   : > { %9948 = vmatprep.subr.bf16.mxu1 %v10900_v37  ;;  %v10937_v37 = vld [vmem:[#allocation4 + $0xe28] sm:$0xff]  }
 0x218   : > { %9927 = vmatpush3.bf16.msra.mxu0 %v10901_v40  ;;  %v10940_v40 = vld [vmem:[#allocation4 + $0xef0] sm:$0xff]  }
 0x219   : > { %9949 = vmatpush3.bf16.msra.mxu1 %v10902_v43  ;;  %9928 = vmatprep.subr.bf16.mxu0 %v10903_v46  ;;  %v10943_v43 = vld [vmem:[#allocation4 + $0xe78] sm:$0xff]  }
 0x21a   : > { %v9626_v29 = vpop.f32.mrb[24].mxu0  ;;  %9950 = vmatprep.subr.bf16.mxu1 %v10904_v48  ;;  %v10946_v46 = vld [vmem:[#allocation4 + $0xeb8] sm:$0xff]  }
 0x21b   : > { %v9648_v31 = vpop.f32.mrb[24].mxu1  ;;  %v9627_v33 = vpop.f32.mrb[25].mxu0 }
 0x21c   : > { %v9628_v35 = vadd.f32 %v9627_v33, %v9626_v29  ;;  %v9649_v36 = vpop.f32.mrb[25].mxu1  ;;  %v9629_v39 = vpop.f32.mrb[26].mxu0  ;;  %9929 = vmatpush3.bf16.msra.mxu0 %v10905_v49  ;;  %v274_v49 = vld [vmem:[%s11533_s23 + $0x1d8] sm:$0xff] }
 0x21d   : > { %v9650_v38 = vadd.f32 %v9649_v36, %v9648_v31  ;;  %v9651_v42 = vpop.f32.mrb[26].mxu1  ;;  %v9630_v44 = vpop.f32.mrb[27].mxu0  ;;  %9951 = vmatpush3.bf16.msra.mxu1 %v10906_v50  ;;  %9930 = vmatprep.subr.bf16.mxu0 %v10907_v51  ;;  %v10934_v31 = vld [vmem:[#allocation4 + $0xea0] sm:$0xff]   ;;  %v10936_v36 = vld [vmem:[#allocation4 + $0xee8] sm:$0xff]   ;;  %v10939_v39 = vld [vmem:[#allocation4 + $0xe70] sm:$0xff]  }
 0x21e   : > { %v7066_v41 = vadd.f32 %v9628_v35, %v11606_v57  ;;  %v9652_v47 = vpop.f32.mrb[27].mxu1  ;;  %9952 = vmatprep.subr.bf16.mxu1 %v10908_v52  ;;  %v10913_v57 = vld [vmem:[#allocation4 + $0xd38] sm:$0xff]   ;;  %v10942_v42 = vld [vmem:[#allocation4 + $0xeb0] sm:$0xff]   ;;  %v271_v50 = vld [vmem:[%s11533_s23 + $0x1c0] sm:$0xff]  ;;  %v370_v52 = vpack.c.bf16 %v274_v49, %v274_v49 }
 0x21f   : > { %v10944_v44 = vld [vmem:[#allocation4 + $0xef8] sm:$0xff]   ;;  %v272_v47 = vld [vmem:[%s11533_s23 + $0x1c8] sm:$0xff]  ;;  %v273_v51 = vld [vmem:[%s11533_s23 + $0x1d0] sm:$0xff] }
 0x220   : > { %v11613_v45 = vadd.f32 %v9650_v38, %v7066_v41  ;;  %9931 = vmatpush3.bf16.msra.mxu0 %v10909_v53  ;;  %v10938_v38 = vld [vmem:[#allocation4 + $0xea8] sm:$0xff]   ;;  %v10941_v41 = vld [vmem:[#allocation4 + $0xe30] sm:$0xff]   ;;  %v368_v48 = vpack.c.bf16 %v272_v47, %v272_v47  ;;  %v367_v53 = vpack.c.bf16 %v271_v50, %v271_v50 }
 0x221   : > { %9953 = vmatpush3.bf16.msra.mxu1 %v10910_v54  ;;  %9932 = vmatprep.subr.bf16.mxu0 %v10911_v55  ;;  %v369_v54 = vpack.c.bf16 %v273_v51, %v273_v51  ;;  %v10947_v55 = vld [vmem:[#allocation4 + $0xf40] sm:$0xff]   ;;  %v10983_v47 = vld [vmem:[#allocation4 + $0x1048] sm:$0xff]   ;;  %v10987_v51 = vld [vmem:[#allocation4 + $0x1050] sm:$0xff]  }
 0x222   : > { %9954 = vmatprep.subr.bf16.mxu1 %v10912_v56  ;;  %v10948_v56 = vld [vmem:[#allocation4 + $0xfc0] sm:$0xff]   ;;  %v10985_v49 = vld [vmem:[#allocation4 + $0x1008] sm:$0xff]  }
 0x223   : > { %v10986_v50 = vld [vmem:[#allocation4 + $0x1088] sm:$0xff]  }
 0x224   : > { %9933 = vmatpush3.bf16.msra.mxu0 %v10913_v57  ;;  %v10949_v57 = vld [vmem:[#allocation4 + $0xf00] sm:$0xff]  }
 0x225   : > { %9955 = vmatpush3.bf16.msra.mxu1 %v10914_v58  ;;  %9962 = vmatprep.subr.bf16.mxu0 %v10915_v3  ;;  %v10950_v58 = vld [vmem:[#allocation4 + $0xf80] sm:$0xff]   ;;  %v10959_v3 = vld [vmem:[#allocation4 + $0xf58] sm:$0xff]  }
 0x226   : > { %9984 = vmatprep.subr.bf16.mxu1 %v10916_v4  ;;  %v10960_v4 = vld [vmem:[#allocation4 + $0xfd8] sm:$0xff]  }
 0x227   : > { %7624 = vmatmul.mubr.bf16.vlgmr.msra.gmra.mrb[52].mxu0 %v363_v1  ;;  %v10957_v1 = vld [vmem:[#allocation4 + $0xf10] sm:$0xff]  }
 0x228   : > { %7664 = vmatmul.mubr.bf16.vlgmr.msra.gmra.mrb[52].mxu1 %v365_v2  ;;  %9963 = vmatpush3.bf16.msra.mxu0 %v10917_v5  ;;  %v10958_v2 = vld [vmem:[#allocation4 + $0xf90] sm:$0xff]  }
 0x229   : > { %9985 = vmatpush3.bf16.msra.mxu1 %v10918_v6  ;;  %9964 = vmatprep.subr.bf16.mxu0 %v10919_v7  ;;  %v10961_v6 = vld [vmem:[#allocation4 + $0xf18] sm:$0xff]  }
 0x22a   : > { %9986 = vmatprep.subr.bf16.mxu1 %v10920_v8  ;;  %7703 = vmatprep.mubr.bf16.mxu0 %v368_v48  ;;  %v10962_v8 = vld [vmem:[#allocation4 + $0xf98] sm:$0xff]   ;;  %v10984_v48 = vld [vmem:[#allocation4 + $0x10c8] sm:$0xff]  }
 0x22b   : > { %7743 = vmatprep.mubr.bf16.mxu1 %v370_v52  ;;  %v10988_v52 = vld [vmem:[#allocation4 + $0x10d0] sm:$0xff]  }
 0x22c   : > { %9965 = vmatpush3.bf16.msra.mxu0 %v10921_v9 }
 0x22d   : > { %9987 = vmatpush3.bf16.msra.mxu1 %v10922_v10  ;;  %9966 = vmatprep.subr.bf16.mxu0 %v10923_v11  ;;  %v10963_v10 = vld [vmem:[#allocation4 + $0xf60] sm:$0xff]  }
 0x22e   : > { %9988 = vmatprep.subr.bf16.mxu1 %v10924_v12 }
 0x230   : > { %9967 = vmatpush3.bf16.msra.mxu0 %v10925_v13  ;;  %v10964_v13 = vld [vmem:[#allocation4 + $0xfe0] sm:$0xff]  }
 0x231   : > { %9989 = vmatpush3.bf16.msra.mxu1 %v10926_v14  ;;  %9968 = vmatprep.subr.bf16.mxu0 %v10927_v15 }
 0x232   : > { %9990 = vmatprep.subr.bf16.mxu1 %v10928_v16  ;;  %v10965_v16 = vld [vmem:[#allocation4 + $0xf20] sm:$0xff]  }
 0x234   : > { %9969 = vmatpush3.bf16.msra.mxu0 %v10929_v18 }
 0x235   : > { %9991 = vmatpush3.bf16.msra.mxu1 %v10930_v20  ;;  %9970 = vmatprep.subr.bf16.mxu0 %v10931_v22  ;;  %v10967_v22 = vld [vmem:[#allocation4 + $0xf68] sm:$0xff]  }
 0x236   : > { %9992 = vmatprep.subr.bf16.mxu1 %v10932_v25  ;;  %v10969_v25 = vld [vmem:[#allocation4 + $0xf28] sm:$0xff]  }
 0x238   : > { %9971 = vmatpush3.bf16.msra.mxu0 %v10933_v28  ;;  %v10972_v28 = vld [vmem:[#allocation4 + $0xff0] sm:$0xff]  }
 0x239   : > { %9993 = vmatpush3.bf16.msra.mxu1 %v10934_v31  ;;  %9972 = vmatprep.subr.bf16.mxu0 %v10935_v34  ;;  %v10975_v31 = vld [vmem:[#allocation4 + $0xf78] sm:$0xff]  }
 0x23a   : > { %v9670_v17 = vpop.f32.mrb[28].mxu0  ;;  %9994 = vmatprep.subr.bf16.mxu1 %v10936_v36  ;;  %v10978_v34 = vld [vmem:[#allocation4 + $0xfb8] sm:$0xff]  }
 0x23b   : > { %v9692_v19 = vpop.f32.mrb[28].mxu1  ;;  %v9671_v21 = vpop.f32.mrb[29].mxu0  ;;  %v278_v36 = vld [vmem:[%s11533_s23 + $0x1f8] sm:$0xff] }
 0x23c   : > { %v9672_v23 = vadd.f32 %v9671_v21, %v9670_v17  ;;  %v9693_v24 = vpop.f32.mrb[29].mxu1  ;;  %v9673_v27 = vpop.f32.mrb[30].mxu0  ;;  %9973 = vmatpush3.bf16.msra.mxu0 %v10937_v37  ;;  %v275_v37 = vld [vmem:[%s11533_s23 + $0x1e0] sm:$0xff] }
 0x23d   : > { %v9694_v26 = vadd.f32 %v9693_v24, %v9692_v19  ;;  %v9695_v30 = vpop.f32.mrb[30].mxu1  ;;  %v9674_v32 = vpop.f32.mrb[31].mxu0  ;;  %9995 = vmatpush3.bf16.msra.mxu1 %v10938_v38  ;;  %9974 = vmatprep.subr.bf16.mxu0 %v10939_v39  ;;  %v10966_v19 = vld [vmem:[#allocation4 + $0xfa0] sm:$0xff]   ;;  %v10968_v24 = vld [vmem:[#allocation4 + $0xfe8] sm:$0xff]   ;;  %v10971_v27 = vld [vmem:[#allocation4 + $0xf70] sm:$0xff]   ;;  %v374_v39 = vpack.c.bf16 %v278_v36, %v278_v36 }
 0x23e   : > { %v7146_v29 = vadd.f32 %v9672_v23, %v11613_v45  ;;  %v9696_v35 = vpop.f32.mrb[31].mxu1  ;;  %9996 = vmatprep.subr.bf16.mxu1 %v10940_v40  ;;  %v10945_v45 = vld [vmem:[#allocation4 + $0xe38] sm:$0xff]   ;;  %v10974_v30 = vld [vmem:[#allocation4 + $0xfb0] sm:$0xff]   ;;  %v371_v40 = vpack.c.bf16 %v275_v37, %v275_v37  ;;  %v11016_v36 = vld [vmem:[#allocation4 + $0x11c8] sm:$0xff]  }
 0x23f   : > { %v10976_v32 = vld [vmem:[#allocation4 + $0xff8] sm:$0xff]   ;;  %v276_v35 = vld [vmem:[%s11533_s23 + $0x1e8] sm:$0xff] }
 0x240   : > { %v11620_v33 = vadd.f32 %v9694_v26, %v7146_v29  ;;  %9975 = vmatpush3.bf16.msra.mxu0 %v10941_v41  ;;  %v10970_v26 = vld [vmem:[#allocation4 + $0xfa8] sm:$0xff]   ;;  %v10973_v29 = vld [vmem:[#allocation4 + $0xf30] sm:$0xff]   ;;  %v372_v38 = vpack.c.bf16 %v276_v35, %v276_v35 }
 0x241   : > { %9997 = vmatpush3.bf16.msra.mxu1 %v10942_v42  ;;  %9976 = vmatprep.subr.bf16.mxu0 %v10943_v43  ;;  %v277_v41 = vld [vmem:[%s11533_s23 + $0x1f0] sm:$0xff]  ;;  %v10979_v43 = vld [vmem:[#allocation4 + $0x1040] sm:$0xff]   ;;  %v11015_v35 = vld [vmem:[#allocation4 + $0x1148] sm:$0xff]  }
 0x242   : > { %9998 = vmatprep.subr.bf16.mxu1 %v10944_v44  ;;  %v373_v42 = vpack.c.bf16 %v277_v41, %v277_v41  ;;  %v10980_v44 = vld [vmem:[#allocation4 + $0x10c0] sm:$0xff]   ;;  %v11017_v37 = vld [vmem:[#allocation4 + $0x1108] sm:$0xff]   ;;  %v11021_v41 = vld [vmem:[#allocation4 + $0x1110] sm:$0xff]  }
 0x244   : > { %9977 = vmatpush3.bf16.msra.mxu0 %v10945_v45  ;;  %v10981_v45 = vld [vmem:[#allocation4 + $0x1000] sm:$0xff]  }
 0x245   : > { %9999 = vmatpush3.bf16.msra.mxu1 %v10946_v46  ;;  %10006 = vmatprep.subr.bf16.mxu0 %v10947_v55  ;;  %v10982_v46 = vld [vmem:[#allocation4 + $0x1080] sm:$0xff]   ;;  %v10991_v55 = vld [vmem:[#allocation4 + $0x1058] sm:$0xff]  }
 0x246   : > { %10028 = vmatprep.subr.bf16.mxu1 %v10948_v56  ;;  %v10992_v56 = vld [vmem:[#allocation4 + $0x10d8] sm:$0xff]  }
 0x247   : > { %7704 = vmatmul.mubr.bf16.vlgmr.msra.gmra.mrb[56].mxu0 %v367_v53  ;;  %v10989_v53 = vld [vmem:[#allocation4 + $0x1010] sm:$0xff]  }
 0x248   : > { %7744 = vmatmul.mubr.bf16.vlgmr.msra.gmra.mrb[56].mxu1 %v369_v54  ;;  %10007 = vmatpush3.bf16.msra.mxu0 %v10949_v57  ;;  %v10990_v54 = vld [vmem:[#allocation4 + $0x1090] sm:$0xff]  }
 0x249   : > { %10029 = vmatpush3.bf16.msra.mxu1 %v10950_v58  ;;  %10008 = vmatprep.subr.bf16.mxu0 %v10951_v59  ;;  %v10993_v58 = vld [vmem:[#allocation4 + $0x1018] sm:$0xff]  }
 0x24a   : > { %10030 = vmatprep.subr.bf16.mxu1 %v10952_v60  ;;  %7783 = vmatprep.mubr.bf16.mxu0 %v372_v38  ;;  %v10994_v60 = vld [vmem:[#allocation4 + $0x1098] sm:$0xff]   ;;  %v11018_v38 = vld [vmem:[#allocation4 + $0x1188] sm:$0xff]  }
 0x24b   : > { %7823 = vmatprep.mubr.bf16.mxu1 %v374_v39  ;;  %v11019_v39 = vld [vmem:[#allocation4 + $0x1150] sm:$0xff]  }
 0x24c   : > { %10009 = vmatpush3.bf16.msra.mxu0 %v10953_v61 }
 0x24d   : > { %10031 = vmatpush3.bf16.msra.mxu1 %v10954_v62  ;;  %10010 = vmatprep.subr.bf16.mxu0 %v10955_v63  ;;  %v10995_v62 = vld [vmem:[#allocation4 + $0x1060] sm:$0xff]  }
 0x24e   : > { %10032 = vmatprep.subr.bf16.mxu1 %v10956_v0 }
 0x250   : > { %10011 = vmatpush3.bf16.msra.mxu0 %v10957_v1  ;;  %v10996_v1 = vld [vmem:[#allocation4 + $0x10e0] sm:$0xff]  }
 0x251   : > { %10033 = vmatpush3.bf16.msra.mxu1 %v10958_v2  ;;  %10012 = vmatprep.subr.bf16.mxu0 %v10959_v3 }
 0x252   : > { %10034 = vmatprep.subr.bf16.mxu1 %v10960_v4  ;;  %v10997_v4 = vld [vmem:[#allocation4 + $0x1020] sm:$0xff]  }
 0x254   : > { %10013 = vmatpush3.bf16.msra.mxu0 %v10961_v6 }
 0x255   : > { %10035 = vmatpush3.bf16.msra.mxu1 %v10962_v8  ;;  %10014 = vmatprep.subr.bf16.mxu0 %v10963_v10  ;;  %v10999_v10 = vld [vmem:[#allocation4 + $0x1068] sm:$0xff]  }
 0x256   : > { %10036 = vmatprep.subr.bf16.mxu1 %v10964_v13  ;;  %v11001_v13 = vld [vmem:[#allocation4 + $0x1028] sm:$0xff]  }
 0x258   : > { %10015 = vmatpush3.bf16.msra.mxu0 %v10965_v16  ;;  %v11004_v16 = vld [vmem:[#allocation4 + $0x10f0] sm:$0xff]  }
 0x259   : > { %10037 = vmatpush3.bf16.msra.mxu1 %v10966_v19  ;;  %10016 = vmatprep.subr.bf16.mxu0 %v10967_v22  ;;  %v11007_v19 = vld [vmem:[#allocation4 + $0x1078] sm:$0xff]  }
 0x25a   : > { %v9714_v5 = vpop.f32.mrb[32].mxu0  ;;  %10038 = vmatprep.subr.bf16.mxu1 %v10968_v24  ;;  %v11010_v22 = vld [vmem:[#allocation4 + $0x10b8] sm:$0xff]  }
 0x25b   : > { %v9736_v7 = vpop.f32.mrb[32].mxu1  ;;  %v9715_v9 = vpop.f32.mrb[33].mxu0  ;;  %v282_v24 = vld [vmem:[%s11533_s23 + $0x218] sm:$0xff] }
 0x25c   : > { %v9716_v11 = vadd.f32 %v9715_v9, %v9714_v5  ;;  %v9737_v12 = vpop.f32.mrb[33].mxu1  ;;  %v9717_v15 = vpop.f32.mrb[34].mxu0  ;;  %10017 = vmatpush3.bf16.msra.mxu0 %v10969_v25 }
 0x25d   : > { %v9738_v14 = vadd.f32 %v9737_v12, %v9736_v7  ;;  %v9739_v18 = vpop.f32.mrb[34].mxu1  ;;  %v9718_v20 = vpop.f32.mrb[35].mxu0  ;;  %10039 = vmatpush3.bf16.msra.mxu1 %v10970_v26  ;;  %10018 = vmatprep.subr.bf16.mxu0 %v10971_v27  ;;  %v10998_v7 = vld [vmem:[#allocation4 + $0x10a0] sm:$0xff]   ;;  %v11000_v12 = vld [vmem:[#allocation4 + $0x10e8] sm:$0xff]   ;;  %v11003_v15 = vld [vmem:[#allocation4 + $0x1070] sm:$0xff]   ;;  %v378_v26 = vpack.c.bf16 %v282_v24, %v282_v24 }
 0x25e   : > { %v7226_v17 = vadd.f32 %v9716_v11, %v11620_v33  ;;  %v9740_v23 = vpop.f32.mrb[35].mxu1  ;;  %10040 = vmatprep.subr.bf16.mxu1 %v10972_v28  ;;  %v10977_v33 = vld [vmem:[#allocation4 + $0xf38] sm:$0xff]   ;;  %v11006_v18 = vld [vmem:[#allocation4 + $0x10b0] sm:$0xff]   ;;  %v279_v27 = vld [vmem:[%s11533_s23 + $0x200] sm:$0xff] }
 0x25f   : > { %v11008_v20 = vld [vmem:[#allocation4 + $0x10f8] sm:$0xff]   ;;  %v280_v23 = vld [vmem:[%s11533_s23 + $0x208] sm:$0xff]  ;;  %v281_v28 = vld [vmem:[%s11533_s23 + $0x210] sm:$0xff] }
 0x260   : > { %v11627_v21 = vadd.f32 %v9738_v14, %v7226_v17  ;;  %10019 = vmatpush3.bf16.msra.mxu0 %v10973_v29  ;;  %v11002_v14 = vld [vmem:[#allocation4 + $0x10a8] sm:$0xff]   ;;  %v11005_v17 = vld [vmem:[#allocation4 + $0x1030] sm:$0xff]   ;;  %v376_v25 = vpack.c.bf16 %v280_v23, %v280_v23  ;;  %v375_v29 = vpack.c.bf16 %v279_v27, %v279_v27 }
 0x261   : > { %10041 = vmatpush3.bf16.msra.mxu1 %v10974_v30  ;;  %10020 = vmatprep.subr.bf16.mxu0 %v10975_v31  ;;  %v377_v30 = vpack.c.bf16 %v281_v28, %v281_v28  ;;  %v11011_v31 = vld [vmem:[#allocation4 + $0x1140] sm:$0xff]   ;;  %v11047_v23 = vld [vmem:[#allocation4 + $0x1248] sm:$0xff]   ;;  %v11051_v27 = vld [vmem:[#allocation4 + $0x1250] sm:$0xff]  }
 0x262   : > { %10042 = vmatprep.subr.bf16.mxu1 %v10976_v32  ;;  %v11012_v32 = vld [vmem:[#allocation4 + $0x11c0] sm:$0xff]   ;;  %v11048_v24 = vld [vmem:[#allocation4 + $0x12c8] sm:$0xff]   ;;  %v11052_v28 = vld [vmem:[#allocation4 + $0x12d0] sm:$0xff]  }
 0x264   : > { %10021 = vmatpush3.bf16.msra.mxu0 %v10977_v33  ;;  %v11013_v33 = vld [vmem:[#allocation4 + $0x1100] sm:$0xff]  }
 0x265   : > { %10043 = vmatpush3.bf16.msra.mxu1 %v10978_v34  ;;  %10050 = vmatprep.subr.bf16.mxu0 %v10979_v43  ;;  %v11014_v34 = vld [vmem:[#allocation4 + $0x1180] sm:$0xff]   ;;  %v11023_v43 = vld [vmem:[#allocation4 + $0x1158] sm:$0xff]  }
 0x266   : > { %10072 = vmatprep.subr.bf16.mxu1 %v10980_v44  ;;  %v11024_v44 = vld [vmem:[#allocation4 + $0x11d8] sm:$0xff]  }
 0x267   : > { %7784 = vmatmul.mubr.bf16.vlgmr.msra.gmra.mrb[60].mxu0 %v371_v40  ;;  %v11020_v40 = vld [vmem:[#allocation4 + $0x11d0] sm:$0xff]  }
 0x268   : > { %7824 = vmatmul.mubr.bf16.vlgmr.msra.gmra.mrb[60].mxu1 %v373_v42  ;;  %10051 = vmatpush3.bf16.msra.mxu0 %v10981_v45  ;;  %v11022_v42 = vld [vmem:[#allocation4 + $0x1190] sm:$0xff]  }
 0x269   : > { %10073 = vmatpush3.bf16.msra.mxu1 %v10982_v46  ;;  %10052 = vmatprep.subr.bf16.mxu0 %v10983_v47  ;;  %v11025_v46 = vld [vmem:[#allocation4 + $0x1118] sm:$0xff]  }
 0x26a   : > { %10074 = vmatprep.subr.bf16.mxu1 %v10984_v48  ;;  %7863 = vmatprep.mubr.bf16.mxu0 %v376_v25  ;;  %v11026_v48 = vld [vmem:[#allocation4 + $0x1198] sm:$0xff]   ;;  %v11049_v25 = vld [vmem:[#allocation4 + $0x1208] sm:$0xff]  }
 0x26b   : > { %7903 = vmatprep.mubr.bf16.mxu1 %v378_v26  ;;  %v11050_v26 = vld [vmem:[#allocation4 + $0x1288] sm:$0xff]  }
 0x26c   : > { %10053 = vmatpush3.bf16.msra.mxu0 %v10985_v49 }
 0x26d   : > { %10075 = vmatpush3.bf16.msra.mxu1 %v10986_v50  ;;  %10054 = vmatprep.subr.bf16.mxu0 %v10987_v51  ;;  %v11027_v50 = vld [vmem:[#allocation4 + $0x1160] sm:$0xff]  }
 0x26e   : > { %10076 = vmatprep.subr.bf16.mxu1 %v10988_v52 }
 0x270   : > { %10055 = vmatpush3.bf16.msra.mxu0 %v10989_v53  ;;  %v11028_v53 = vld [vmem:[#allocation4 + $0x11e0] sm:$0xff]  }
 0x271   : > { %10077 = vmatpush3.bf16.msra.mxu1 %v10990_v54  ;;  %10056 = vmatprep.subr.bf16.mxu0 %v10991_v55 }
 0x272   : > { %10078 = vmatprep.subr.bf16.mxu1 %v10992_v56  ;;  %v11029_v56 = vld [vmem:[#allocation4 + $0x1120] sm:$0xff]  }
 0x274   : > { %10057 = vmatpush3.bf16.msra.mxu0 %v10993_v58 }
 0x275   : > { %10079 = vmatpush3.bf16.msra.mxu1 %v10994_v60  ;;  %10058 = vmatprep.subr.bf16.mxu0 %v10995_v62  ;;  %v11031_v62 = vld [vmem:[#allocation4 + $0x1168] sm:$0xff]  }
 0x276   : > { %10080 = vmatprep.subr.bf16.mxu1 %v10996_v1  ;;  %v11033_v1 = vld [vmem:[#allocation4 + $0x1128] sm:$0xff]  }
 0x278   : > { %10059 = vmatpush3.bf16.msra.mxu0 %v10997_v4  ;;  %v11036_v4 = vld [vmem:[#allocation4 + $0x11f0] sm:$0xff]  }
 0x279   : > { %10081 = vmatpush3.bf16.msra.mxu1 %v10998_v7  ;;  %10060 = vmatprep.subr.bf16.mxu0 %v10999_v10  ;;  %v11039_v7 = vld [vmem:[#allocation4 + $0x1178] sm:$0xff]  }
 0x27a   : > { %v9758_v57 = vpop.f32.mrb[36].mxu0  ;;  %10082 = vmatprep.subr.bf16.mxu1 %v11000_v12  ;;  %v11042_v10 = vld [vmem:[#allocation4 + $0x11b8] sm:$0xff]  }
 0x27b   : > { %v9780_v59 = vpop.f32.mrb[36].mxu1  ;;  %v9759_v61 = vpop.f32.mrb[37].mxu0 }
 0x27c   : > { %v9760_v63 = vadd.f32 %v9759_v61, %v9758_v57  ;;  %v9781_v0 = vpop.f32.mrb[37].mxu1  ;;  %v9761_v3 = vpop.f32.mrb[38].mxu0  ;;  %10061 = vmatpush3.bf16.msra.mxu0 %v11001_v13  ;;  %v286_v13 = vld [vmem:[%s11533_s23 + $0x238] sm:$0xff] }
 0x27d   : > { %v9782_v2 = vadd.f32 %v9781_v0, %v9780_v59  ;;  %v9783_v6 = vpop.f32.mrb[38].mxu1  ;;  %v9762_v8 = vpop.f32.mrb[39].mxu0  ;;  %10083 = vmatpush3.bf16.msra.mxu1 %v11002_v14  ;;  %10062 = vmatprep.subr.bf16.mxu0 %v11003_v15  ;;  %v11030_v59 = vld [vmem:[#allocation4 + $0x11a0] sm:$0xff]   ;;  %v11032_v0 = vld [vmem:[#allocation4 + $0x11e8] sm:$0xff]   ;;  %v11035_v3 = vld [vmem:[#allocation4 + $0x1170] sm:$0xff]  }
 0x27e   : > { %v7306_v5 = vadd.f32 %v9760_v63, %v11627_v21  ;;  %v9784_v11 = vpop.f32.mrb[39].mxu1  ;;  %10084 = vmatprep.subr.bf16.mxu1 %v11004_v16  ;;  %v11009_v21 = vld [vmem:[#allocation4 + $0x1038] sm:$0xff]   ;;  %v11038_v6 = vld [vmem:[#allocation4 + $0x11b0] sm:$0xff]   ;;  %v283_v14 = vld [vmem:[%s11533_s23 + $0x220] sm:$0xff]  ;;  %v382_v16 = vpack.c.bf16 %v286_v13, %v286_v13 }
 0x27f   : > { %v11040_v8 = vld [vmem:[#allocation4 + $0x11f8] sm:$0xff]   ;;  %v284_v11 = vld [vmem:[%s11533_s23 + $0x228] sm:$0xff]  ;;  %v285_v15 = vld [vmem:[%s11533_s23 + $0x230] sm:$0xff] }
 0x280   : > { %v11634_v9 = vadd.f32 %v9782_v2, %v7306_v5  ;;  %10063 = vmatpush3.bf16.msra.mxu0 %v11005_v17  ;;  %v11034_v2 = vld [vmem:[#allocation4 + $0x11a8] sm:$0xff]   ;;  %v11037_v5 = vld [vmem:[#allocation4 + $0x1130] sm:$0xff]   ;;  %v380_v12 = vpack.c.bf16 %v284_v11, %v284_v11  ;;  %v379_v17 = vpack.c.bf16 %v283_v14, %v283_v14 }
 0x281   : > { %10085 = vmatpush3.bf16.msra.mxu1 %v11006_v18  ;;  %10064 = vmatprep.subr.bf16.mxu0 %v11007_v19  ;;  %v381_v18 = vpack.c.bf16 %v285_v15, %v285_v15  ;;  %v11043_v19 = vld [vmem:[#allocation4 + $0x1240] sm:$0xff]   ;;  %v11079_v11 = vld [vmem:[#allocation4 + $0x1348] sm:$0xff]   ;;  %v11083_v15 = vld [vmem:[#allocation4 + $0x1350] sm:$0xff]  }
 0x282   : > { %10086 = vmatprep.subr.bf16.mxu1 %v11008_v20  ;;  %v11044_v20 = vld [vmem:[#allocation4 + $0x12c0] sm:$0xff]   ;;  %v11081_v13 = vld [vmem:[#allocation4 + $0x1308] sm:$0xff]  }
 0x283   : > { %v11082_v14 = vld [vmem:[#allocation4 + $0x1388] sm:$0xff]  }
 0x284   : > { %10065 = vmatpush3.bf16.msra.mxu0 %v11009_v21  ;;  %v11045_v21 = vld [vmem:[#allocation4 + $0x1200] sm:$0xff]  }
 0x285   : > { %10087 = vmatpush3.bf16.msra.mxu1 %v11010_v22  ;;  %10094 = vmatprep.subr.bf16.mxu0 %v11011_v31  ;;  %v11046_v22 = vld [vmem:[#allocation4 + $0x1280] sm:$0xff]   ;;  %v11055_v31 = vld [vmem:[#allocation4 + $0x1258] sm:$0xff]  }
 0x286   : > { %10116 = vmatprep.subr.bf16.mxu1 %v11012_v32  ;;  %v11056_v32 = vld [vmem:[#allocation4 + $0x12d8] sm:$0xff]  }
 0x287   : > { %7864 = vmatmul.mubr.bf16.vlgmr.msra.gmra.mrb[64].mxu0 %v375_v29  ;;  %v11053_v29 = vld [vmem:[#allocation4 + $0x1210] sm:$0xff]  }
 0x288   : > { %7904 = vmatmul.mubr.bf16.vlgmr.msra.gmra.mrb[64].mxu1 %v377_v30  ;;  %10095 = vmatpush3.bf16.msra.mxu0 %v11013_v33  ;;  %v11054_v30 = vld [vmem:[#allocation4 + $0x1290] sm:$0xff]  }
 0x289   : > { %10117 = vmatpush3.bf16.msra.mxu1 %v11014_v34  ;;  %10096 = vmatprep.subr.bf16.mxu0 %v11015_v35  ;;  %v11057_v34 = vld [vmem:[#allocation4 + $0x1218] sm:$0xff]  }
 0x28a   : > { %10118 = vmatprep.subr.bf16.mxu1 %v11016_v36  ;;  %7943 = vmatprep.mubr.bf16.mxu0 %v380_v12  ;;  %v11058_v36 = vld [vmem:[#allocation4 + $0x1298] sm:$0xff]   ;;  %v11080_v12 = vld [vmem:[#allocation4 + $0x13c8] sm:$0xff]  }
 0x28b   : > { %7983 = vmatprep.mubr.bf16.mxu1 %v382_v16  ;;  %v11084_v16 = vld [vmem:[#allocation4 + $0x13d0] sm:$0xff]  }
 0x28c   : > { %10097 = vmatpush3.bf16.msra.mxu0 %v11017_v37 }
 0x28d   : > { %10119 = vmatpush3.bf16.msra.mxu1 %v11018_v38  ;;  %10098 = vmatprep.subr.bf16.mxu0 %v11019_v39  ;;  %v11059_v38 = vld [vmem:[#allocation4 + $0x1260] sm:$0xff]  }
 0x28e   : > { %10120 = vmatprep.subr.bf16.mxu1 %v11020_v40 }
 0x290   : > { %10099 = vmatpush3.bf16.msra.mxu0 %v11021_v41  ;;  %v11060_v41 = vld [vmem:[#allocation4 + $0x12e0] sm:$0xff]  }
 0x291   : > { %10121 = vmatpush3.bf16.msra.mxu1 %v11022_v42  ;;  %10100 = vmatprep.subr.bf16.mxu0 %v11023_v43 }
 0x292   : > { %10122 = vmatprep.subr.bf16.mxu1 %v11024_v44  ;;  %v11061_v44 = vld [vmem:[#allocation4 + $0x1220] sm:$0xff]  }
 0x294   : > { %10101 = vmatpush3.bf16.msra.mxu0 %v11025_v46 }
 0x295   : > { %10123 = vmatpush3.bf16.msra.mxu1 %v11026_v48  ;;  %10102 = vmatprep.subr.bf16.mxu0 %v11027_v50  ;;  %v11063_v50 = vld [vmem:[#allocation4 + $0x1268] sm:$0xff]  }
 0x296   : > { %10124 = vmatprep.subr.bf16.mxu1 %v11028_v53  ;;  %v11065_v53 = vld [vmem:[#allocation4 + $0x1228] sm:$0xff]  }
 0x298   : > { %10103 = vmatpush3.bf16.msra.mxu0 %v11029_v56  ;;  %v11068_v56 = vld [vmem:[#allocation4 + $0x12f0] sm:$0xff]  }
 0x299   : > { %10125 = vmatpush3.bf16.msra.mxu1 %v11030_v59  ;;  %10104 = vmatprep.subr.bf16.mxu0 %v11031_v62  ;;  %v11071_v59 = vld [vmem:[#allocation4 + $0x1278] sm:$0xff]  }
 0x29a   : > { %v9802_v45 = vpop.f32.mrb[40].mxu0  ;;  %10126 = vmatprep.subr.bf16.mxu1 %v11032_v0  ;;  %v11074_v62 = vld [vmem:[#allocation4 + $0x12b8] sm:$0xff]  }
 0x29b   : > { %v9824_v47 = vpop.f32.mrb[40].mxu1  ;;  %v9803_v49 = vpop.f32.mrb[41].mxu0  ;;  %v290_v0 = vld [vmem:[%s11533_s23 + $0x258] sm:$0xff] }
 0x29c   : > { %v9804_v51 = vadd.f32 %v9803_v49, %v9802_v45  ;;  %v9825_v52 = vpop.f32.mrb[41].mxu1  ;;  %v9805_v55 = vpop.f32.mrb[42].mxu0  ;;  %10105 = vmatpush3.bf16.msra.mxu0 %v11033_v1  ;;  %v287_v1 = vld [vmem:[%s11533_s23 + $0x240] sm:$0xff] }
 0x29d   : > { %v9826_v54 = vadd.f32 %v9825_v52, %v9824_v47  ;;  %v9827_v58 = vpop.f32.mrb[42].mxu1  ;;  %v9806_v60 = vpop.f32.mrb[43].mxu0  ;;  %10127 = vmatpush3.bf16.msra.mxu1 %v11034_v2  ;;  %10106 = vmatprep.subr.bf16.mxu0 %v11035_v3  ;;  %v11062_v47 = vld [vmem:[#allocation4 + $0x12a0] sm:$0xff]   ;;  %v11064_v52 = vld [vmem:[#allocation4 + $0x12e8] sm:$0xff]   ;;  %v11067_v55 = vld [vmem:[#allocation4 + $0x1270] sm:$0xff]   ;;  %v386_v3 = vpack.c.bf16 %v290_v0, %v290_v0 }
 0x29e   : > { %v7386_v57 = vadd.f32 %v9804_v51, %v11634_v9  ;;  %v9828_v63 = vpop.f32.mrb[43].mxu1  ;;  %10128 = vmatprep.subr.bf16.mxu1 %v11036_v4  ;;  %v11041_v9 = vld [vmem:[#allocation4 + $0x1138] sm:$0xff]   ;;  %v11070_v58 = vld [vmem:[#allocation4 + $0x12b0] sm:$0xff]   ;;  %v383_v4 = vpack.c.bf16 %v287_v1, %v287_v1  ;;  %v11112_v0 = vld [vmem:[#allocation4 + $0x14c8] sm:$0xff]  }
 0x29f   : > { %v11072_v60 = vld [vmem:[#allocation4 + $0x12f8] sm:$0xff]   ;;  %v288_v63 = vld [vmem:[%s11533_s23 + $0x248] sm:$0xff] }
 0x2a0   : > { %v11641_v61 = vadd.f32 %v9826_v54, %v7386_v57  ;;  %10107 = vmatpush3.bf16.msra.mxu0 %v11037_v5  ;;  %v11066_v54 = vld [vmem:[#allocation4 + $0x12a8] sm:$0xff]   ;;  %v11069_v57 = vld [vmem:[#allocation4 + $0x1230] sm:$0xff]   ;;  %v384_v2 = vpack.c.bf16 %v288_v63, %v288_v63 }
 0x2a1   : > { %10129 = vmatpush3.bf16.msra.mxu1 %v11038_v6  ;;  %10108 = vmatprep.subr.bf16.mxu0 %v11039_v7  ;;  %v289_v5 = vld [vmem:[%s11533_s23 + $0x250] sm:$0xff]  ;;  %v11075_v7 = vld [vmem:[#allocation4 + $0x1340] sm:$0xff]   ;;  %v11111_v63 = vld [vmem:[#allocation4 + $0x1448] sm:$0xff]  }
 0x2a2   : > { %10130 = vmatprep.subr.bf16.mxu1 %v11040_v8  ;;  %v385_v6 = vpack.c.bf16 %v289_v5, %v289_v5  ;;  %v11076_v8 = vld [vmem:[#allocation4 + $0x13c0] sm:$0xff]   ;;  %v11113_v1 = vld [vmem:[#allocation4 + $0x1408] sm:$0xff]   ;;  %v11117_v5 = vld [vmem:[#allocation4 + $0x1410] sm:$0xff]  }
 0x2a4   : > { %10109 = vmatpush3.bf16.msra.mxu0 %v11041_v9  ;;  %v11077_v9 = vld [vmem:[#allocation4 + $0x1300] sm:$0xff]  }
 0x2a5   : > { %10131 = vmatpush3.bf16.msra.mxu1 %v11042_v10  ;;  %10138 = vmatprep.subr.bf16.mxu0 %v11043_v19  ;;  %v11078_v10 = vld [vmem:[#allocation4 + $0x1380] sm:$0xff]   ;;  %v11087_v19 = vld [vmem:[#allocation4 + $0x1358] sm:$0xff]  }
 0x2a6   : > { %10160 = vmatprep.subr.bf16.mxu1 %v11044_v20  ;;  %v11088_v20 = vld [vmem:[#allocation4 + $0x13d8] sm:$0xff]  }
 0x2a7   : > { %7944 = vmatmul.mubr.bf16.vlgmr.msra.gmra.mrb[68].mxu0 %v379_v17  ;;  %v11085_v17 = vld [vmem:[#allocation4 + $0x1310] sm:$0xff]  }
 0x2a8   : > { %7984 = vmatmul.mubr.bf16.vlgmr.msra.gmra.mrb[68].mxu1 %v381_v18  ;;  %10139 = vmatpush3.bf16.msra.mxu0 %v11045_v21  ;;  %v11086_v18 = vld [vmem:[#allocation4 + $0x1390] sm:$0xff]  }
 0x2a9   : > { %10161 = vmatpush3.bf16.msra.mxu1 %v11046_v22  ;;  %10140 = vmatprep.subr.bf16.mxu0 %v11047_v23  ;;  %v11089_v22 = vld [vmem:[#allocation4 + $0x1318] sm:$0xff]  }
 0x2aa   : > { %10162 = vmatprep.subr.bf16.mxu1 %v11048_v24  ;;  %8023 = vmatprep.mubr.bf16.mxu0 %v384_v2  ;;  %v11090_v24 = vld [vmem:[#allocation4 + $0x1398] sm:$0xff]   ;;  %v11114_v2 = vld [vmem:[#allocation4 + $0x1488] sm:$0xff]  }
 0x2ab   : > { %8063 = vmatprep.mubr.bf16.mxu1 %v386_v3  ;;  %v11115_v3 = vld [vmem:[#allocation4 + $0x1450] sm:$0xff]  }
 0x2ac   : > { %10141 = vmatpush3.bf16.msra.mxu0 %v11049_v25 }
 0x2ad   : > { %10163 = vmatpush3.bf16.msra.mxu1 %v11050_v26  ;;  %10142 = vmatprep.subr.bf16.mxu0 %v11051_v27  ;;  %v11091_v26 = vld [vmem:[#allocation4 + $0x1360] sm:$0xff]  }
 0x2ae   : > { %10164 = vmatprep.subr.bf16.mxu1 %v11052_v28 }
 0x2b0   : > { %10143 = vmatpush3.bf16.msra.mxu0 %v11053_v29  ;;  %v11092_v29 = vld [vmem:[#allocation4 + $0x13e0] sm:$0xff]  }
 0x2b1   : > { %10165 = vmatpush3.bf16.msra.mxu1 %v11054_v30  ;;  %10144 = vmatprep.subr.bf16.mxu0 %v11055_v31 }
 0x2b2   : > { %10166 = vmatprep.subr.bf16.mxu1 %v11056_v32  ;;  %v11093_v32 = vld [vmem:[#allocation4 + $0x1320] sm:$0xff]  }
 0x2b4   : > { %10145 = vmatpush3.bf16.msra.mxu0 %v11057_v34 }
 0x2b5   : > { %10167 = vmatpush3.bf16.msra.mxu1 %v11058_v36  ;;  %10146 = vmatprep.subr.bf16.mxu0 %v11059_v38  ;;  %v11095_v38 = vld [vmem:[#allocation4 + $0x1368] sm:$0xff]  }
 0x2b6   : > { %10168 = vmatprep.subr.bf16.mxu1 %v11060_v41  ;;  %v11097_v41 = vld [vmem:[#allocation4 + $0x1328] sm:$0xff]  }
 0x2b8   : > { %10147 = vmatpush3.bf16.msra.mxu0 %v11061_v44  ;;  %v11100_v44 = vld [vmem:[#allocation4 + $0x13f0] sm:$0xff]  }
 0x2b9   : > { %10169 = vmatpush3.bf16.msra.mxu1 %v11062_v47  ;;  %10148 = vmatprep.subr.bf16.mxu0 %v11063_v50  ;;  %v11103_v47 = vld [vmem:[#allocation4 + $0x1378] sm:$0xff]  }
 0x2ba   : > { %v9846_v33 = vpop.f32.mrb[44].mxu0  ;;  %10170 = vmatprep.subr.bf16.mxu1 %v11064_v52  ;;  %v11106_v50 = vld [vmem:[#allocation4 + $0x13b8] sm:$0xff]  }
 0x2bb   : > { %v9868_v35 = vpop.f32.mrb[44].mxu1  ;;  %v9847_v37 = vpop.f32.mrb[45].mxu0  ;;  %v294_v52 = vld [vmem:[%s11533_s23 + $0x278] sm:$0xff] }
 0x2bc   : > { %v9848_v39 = vadd.f32 %v9847_v37, %v9846_v33  ;;  %v9869_v40 = vpop.f32.mrb[45].mxu1  ;;  %v9849_v43 = vpop.f32.mrb[46].mxu0  ;;  %10149 = vmatpush3.bf16.msra.mxu0 %v11065_v53 }
 0x2bd   : > { %v9870_v42 = vadd.f32 %v9869_v40, %v9868_v35  ;;  %v9871_v46 = vpop.f32.mrb[46].mxu1  ;;  %v9850_v48 = vpop.f32.mrb[47].mxu0  ;;  %10171 = vmatpush3.bf16.msra.mxu1 %v11066_v54  ;;  %10150 = vmatprep.subr.bf16.mxu0 %v11067_v55  ;;  %v11094_v35 = vld [vmem:[#allocation4 + $0x13a0] sm:$0xff]   ;;  %v11096_v40 = vld [vmem:[#allocation4 + $0x13e8] sm:$0xff]   ;;  %v11099_v43 = vld [vmem:[#allocation4 + $0x1370] sm:$0xff]   ;;  %v390_v54 = vpack.c.bf16 %v294_v52, %v294_v52 }
 0x2be   : > { %v7466_v45 = vadd.f32 %v9848_v39, %v11641_v61  ;;  %v9872_v51 = vpop.f32.mrb[47].mxu1  ;;  %10172 = vmatprep.subr.bf16.mxu1 %v11068_v56  ;;  %v11073_v61 = vld [vmem:[#allocation4 + $0x1238] sm:$0xff]   ;;  %v11102_v46 = vld [vmem:[#allocation4 + $0x13b0] sm:$0xff]   ;;  %v291_v55 = vld [vmem:[%s11533_s23 + $0x260] sm:$0xff] }
 0x2bf   : > { %v11104_v48 = vld [vmem:[#allocation4 + $0x13f8] sm:$0xff]   ;;  %v292_v51 = vld [vmem:[%s11533_s23 + $0x268] sm:$0xff]  ;;  %v293_v56 = vld [vmem:[%s11533_s23 + $0x270] sm:$0xff] }
 0x2c0   : > { %v11648_v49 = vadd.f32 %v9870_v42, %v7466_v45  ;;  %10151 = vmatpush3.bf16.msra.mxu0 %v11069_v57  ;;  %v11098_v42 = vld [vmem:[#allocation4 + $0x13a8] sm:$0xff]   ;;  %v11101_v45 = vld [vmem:[#allocation4 + $0x1330] sm:$0xff]   ;;  %v388_v53 = vpack.c.bf16 %v292_v51, %v292_v51  ;;  %v387_v57 = vpack.c.bf16 %v291_v55, %v291_v55 }
 0x2c1   : > { %10173 = vmatpush3.bf16.msra.mxu1 %v11070_v58  ;;  %10152 = vmatprep.subr.bf16.mxu0 %v11071_v59  ;;  %v389_v58 = vpack.c.bf16 %v293_v56, %v293_v56  ;;  %v11107_v59 = vld [vmem:[#allocation4 + $0x1440] sm:$0xff]   ;;  %v11143_v51 = vld [vmem:[#allocation4 + $0x1548] sm:$0xff]   ;;  %v11147_v55 = vld [vmem:[#allocation4 + $0x1550] sm:$0xff]  }
 0x2c2   : > { %10174 = vmatprep.subr.bf16.mxu1 %v11072_v60  ;;  %v11108_v60 = vld [vmem:[#allocation4 + $0x14c0] sm:$0xff]   ;;  %v11144_v52 = vld [vmem:[#allocation4 + $0x15c8] sm:$0xff]   ;;  %v11148_v56 = vld [vmem:[#allocation4 + $0x15d0] sm:$0xff]  }
 0x2c4   : > { %10153 = vmatpush3.bf16.msra.mxu0 %v11073_v61  ;;  %v11109_v61 = vld [vmem:[#allocation4 + $0x1400] sm:$0xff]  }
 0x2c5   : > { %10175 = vmatpush3.bf16.msra.mxu1 %v11074_v62  ;;  %10182 = vmatprep.subr.bf16.mxu0 %v11075_v7  ;;  %v11110_v62 = vld [vmem:[#allocation4 + $0x1480] sm:$0xff]   ;;  %v11119_v7 = vld [vmem:[#allocation4 + $0x1458] sm:$0xff]  }
 0x2c6   : > { %10204 = vmatprep.subr.bf16.mxu1 %v11076_v8  ;;  %v11120_v8 = vld [vmem:[#allocation4 + $0x14d8] sm:$0xff]  }
 0x2c7   : > { %8024 = vmatmul.mubr.bf16.vlgmr.msra.gmra.mrb[72].mxu0 %v383_v4  ;;  %v11116_v4 = vld [vmem:[#allocation4 + $0x14d0] sm:$0xff]  }
 0x2c8   : > { %8064 = vmatmul.mubr.bf16.vlgmr.msra.gmra.mrb[72].mxu1 %v385_v6  ;;  %10183 = vmatpush3.bf16.msra.mxu0 %v11077_v9  ;;  %v11118_v6 = vld [vmem:[#allocation4 + $0x1490] sm:$0xff]  }
 0x2c9   : > { %10205 = vmatpush3.bf16.msra.mxu1 %v11078_v10  ;;  %10184 = vmatprep.subr.bf16.mxu0 %v11079_v11  ;;  %v11121_v10 = vld [vmem:[#allocation4 + $0x1418] sm:$0xff]  }
 0x2ca   : > { %10206 = vmatprep.subr.bf16.mxu1 %v11080_v12  ;;  %8103 = vmatprep.mubr.bf16.mxu0 %v388_v53  ;;  %v11122_v12 = vld [vmem:[#allocation4 + $0x1498] sm:$0xff]   ;;  %v11145_v53 = vld [vmem:[#allocation4 + $0x1508] sm:$0xff]  }
 0x2cb   : > { %8143 = vmatprep.mubr.bf16.mxu1 %v390_v54  ;;  %v11146_v54 = vld [vmem:[#allocation4 + $0x1588] sm:$0xff]  }
 0x2cc   : > { %10185 = vmatpush3.bf16.msra.mxu0 %v11081_v13 }
 0x2cd   : > { %10207 = vmatpush3.bf16.msra.mxu1 %v11082_v14  ;;  %10186 = vmatprep.subr.bf16.mxu0 %v11083_v15  ;;  %v11123_v14 = vld [vmem:[#allocation4 + $0x1460] sm:$0xff]  }
 0x2ce   : > { %10208 = vmatprep.subr.bf16.mxu1 %v11084_v16 }
 0x2d0   : > { %10187 = vmatpush3.bf16.msra.mxu0 %v11085_v17  ;;  %v11124_v17 = vld [vmem:[#allocation4 + $0x14e0] sm:$0xff]  }
 0x2d1   : > { %10209 = vmatpush3.bf16.msra.mxu1 %v11086_v18  ;;  %10188 = vmatprep.subr.bf16.mxu0 %v11087_v19 }
 0x2d2   : > { %10210 = vmatprep.subr.bf16.mxu1 %v11088_v20  ;;  %v11125_v20 = vld [vmem:[#allocation4 + $0x1420] sm:$0xff]  }
 0x2d4   : > { %10189 = vmatpush3.bf16.msra.mxu0 %v11089_v22 }
 0x2d5   : > { %10211 = vmatpush3.bf16.msra.mxu1 %v11090_v24  ;;  %10190 = vmatprep.subr.bf16.mxu0 %v11091_v26  ;;  %v11127_v26 = vld [vmem:[#allocation4 + $0x1468] sm:$0xff]  }
 0x2d6   : > { %10212 = vmatprep.subr.bf16.mxu1 %v11092_v29  ;;  %v11129_v29 = vld [vmem:[#allocation4 + $0x1428] sm:$0xff]  }
 0x2d8   : > { %10191 = vmatpush3.bf16.msra.mxu0 %v11093_v32  ;;  %v11132_v32 = vld [vmem:[#allocation4 + $0x14f0] sm:$0xff]  }
 0x2d9   : > { %10213 = vmatpush3.bf16.msra.mxu1 %v11094_v35  ;;  %10192 = vmatprep.subr.bf16.mxu0 %v11095_v38  ;;  %v11135_v35 = vld [vmem:[#allocation4 + $0x1478] sm:$0xff]  }
 0x2da   : > { %v9890_v21 = vpop.f32.mrb[48].mxu0  ;;  %10214 = vmatprep.subr.bf16.mxu1 %v11096_v40  ;;  %v11138_v38 = vld [vmem:[#allocation4 + $0x14b8] sm:$0xff]  }
 0x2db   : > { %v9912_v23 = vpop.f32.mrb[48].mxu1  ;;  %v9891_v25 = vpop.f32.mrb[49].mxu0 }
 0x2dc   : > { %v9892_v27 = vadd.f32 %v9891_v25, %v9890_v21  ;;  %v9913_v28 = vpop.f32.mrb[49].mxu1  ;;  %v9893_v31 = vpop.f32.mrb[50].mxu0  ;;  %10193 = vmatpush3.bf16.msra.mxu0 %v11097_v41  ;;  %v298_v41 = vld [vmem:[%s11533_s23 + $0x298] sm:$0xff] }
 0x2dd   : > { %v9914_v30 = vadd.f32 %v9913_v28, %v9912_v23  ;;  %v9915_v34 = vpop.f32.mrb[50].mxu1  ;;  %v9894_v36 = vpop.f32.mrb[51].mxu0  ;;  %10215 = vmatpush3.bf16.msra.mxu1 %v11098_v42  ;;  %10194 = vmatprep.subr.bf16.mxu0 %v11099_v43  ;;  %v11126_v23 = vld [vmem:[#allocation4 + $0x14a0] sm:$0xff]   ;;  %v11128_v28 = vld [vmem:[#allocation4 + $0x14e8] sm:$0xff]   ;;  %v11131_v31 = vld [vmem:[#allocation4 + $0x1470] sm:$0xff]  }
 0x2de   : > { %v7546_v33 = vadd.f32 %v9892_v27, %v11648_v49  ;;  %v9916_v39 = vpop.f32.mrb[51].mxu1  ;;  %10216 = vmatprep.subr.bf16.mxu1 %v11100_v44  ;;  %v11105_v49 = vld [vmem:[#allocation4 + $0x1338] sm:$0xff]   ;;  %v11134_v34 = vld [vmem:[#allocation4 + $0x14b0] sm:$0xff]   ;;  %v295_v42 = vld [vmem:[%s11533_s23 + $0x280] sm:$0xff]  ;;  %v394_v44 = vpack.c.bf16 %v298_v41, %v298_v41 }
 0x2df   : > { %v11136_v36 = vld [vmem:[#allocation4 + $0x14f8] sm:$0xff]   ;;  %v296_v39 = vld [vmem:[%s11533_s23 + $0x288] sm:$0xff]  ;;  %v297_v43 = vld [vmem:[%s11533_s23 + $0x290] sm:$0xff] }
 0x2e0   : > { %v11655_v37 = vadd.f32 %v9914_v30, %v7546_v33  ;;  %10195 = vmatpush3.bf16.msra.mxu0 %v11101_v45  ;;  %v11130_v30 = vld [vmem:[#allocation4 + $0x14a8] sm:$0xff]   ;;  %v11133_v33 = vld [vmem:[#allocation4 + $0x1430] sm:$0xff]   ;;  %v392_v40 = vpack.c.bf16 %v296_v39, %v296_v39  ;;  %v391_v45 = vpack.c.bf16 %v295_v42, %v295_v42 }
 0x2e1   : > { %10217 = vmatpush3.bf16.msra.mxu1 %v11102_v46  ;;  %10196 = vmatprep.subr.bf16.mxu0 %v11103_v47  ;;  %v393_v46 = vpack.c.bf16 %v297_v43, %v297_v43  ;;  %v11139_v47 = vld [vmem:[#allocation4 + $0x1540] sm:$0xff]   ;;  %v11175_v39 = vld [vmem:[#allocation4 + $0x1648] sm:$0xff]   ;;  %v11179_v43 = vld [vmem:[#allocation4 + $0x1650] sm:$0xff]  }
 0x2e2   : > { %10218 = vmatprep.subr.bf16.mxu1 %v11104_v48  ;;  %v11140_v48 = vld [vmem:[#allocation4 + $0x15c0] sm:$0xff]   ;;  %v11177_v41 = vld [vmem:[#allocation4 + $0x1608] sm:$0xff]  }
 0x2e3   : > { %v11178_v42 = vld [vmem:[#allocation4 + $0x1688] sm:$0xff]  }
 0x2e4   : > { %10197 = vmatpush3.bf16.msra.mxu0 %v11105_v49  ;;  %v11141_v49 = vld [vmem:[#allocation4 + $0x1500] sm:$0xff]  }
 0x2e5   : > { %10219 = vmatpush3.bf16.msra.mxu1 %v11106_v50  ;;  %10226 = vmatprep.subr.bf16.mxu0 %v11107_v59  ;;  %v11142_v50 = vld [vmem:[#allocation4 + $0x1580] sm:$0xff]   ;;  %v11151_v59 = vld [vmem:[#allocation4 + $0x1558] sm:$0xff]  }
 0x2e6   : > { %10248 = vmatprep.subr.bf16.mxu1 %v11108_v60  ;;  %v11152_v60 = vld [vmem:[#allocation4 + $0x15d8] sm:$0xff]  }
 0x2e7   : > { %8104 = vmatmul.mubr.bf16.vlgmr.msra.gmra.mrb[76].mxu0 %v387_v57  ;;  %v11149_v57 = vld [vmem:[#allocation4 + $0x1510] sm:$0xff]  }
 0x2e8   : > { %8144 = vmatmul.mubr.bf16.vlgmr.msra.gmra.mrb[76].mxu1 %v389_v58  ;;  %10227 = vmatpush3.bf16.msra.mxu0 %v11109_v61  ;;  %v11150_v58 = vld [vmem:[#allocation4 + $0x1590] sm:$0xff]  }
 0x2e9   : > { %10249 = vmatpush3.bf16.msra.mxu1 %v11110_v62  ;;  %10228 = vmatprep.subr.bf16.mxu0 %v11111_v63  ;;  %v11153_v62 = vld [vmem:[#allocation4 + $0x1518] sm:$0xff]  }
 0x2ea   : > { %10250 = vmatprep.subr.bf16.mxu1 %v11112_v0  ;;  %8183 = vmatprep.mubr.bf16.mxu0 %v392_v40  ;;  %v11154_v0 = vld [vmem:[#allocation4 + $0x1598] sm:$0xff]   ;;  %v11176_v40 = vld [vmem:[#allocation4 + $0x16c8] sm:$0xff]  }
 0x2eb   : > { %8223 = vmatprep.mubr.bf16.mxu1 %v394_v44  ;;  %v11180_v44 = vld [vmem:[#allocation4 + $0x16d0] sm:$0xff]  }
 0x2ec   : > { %10229 = vmatpush3.bf16.msra.mxu0 %v11113_v1 }
 0x2ed   : > { %10251 = vmatpush3.bf16.msra.mxu1 %v11114_v2  ;;  %10230 = vmatprep.subr.bf16.mxu0 %v11115_v3  ;;  %v11155_v2 = vld [vmem:[#allocation4 + $0x1560] sm:$0xff]  }
 0x2ee   : > { %10252 = vmatprep.subr.bf16.mxu1 %v11116_v4 }
 0x2f0   : > { %10231 = vmatpush3.bf16.msra.mxu0 %v11117_v5  ;;  %v11156_v5 = vld [vmem:[#allocation4 + $0x15e0] sm:$0xff]  }
 0x2f1   : > { %10253 = vmatpush3.bf16.msra.mxu1 %v11118_v6  ;;  %10232 = vmatprep.subr.bf16.mxu0 %v11119_v7 }
 0x2f2   : > { %10254 = vmatprep.subr.bf16.mxu1 %v11120_v8  ;;  %v11157_v8 = vld [vmem:[#allocation4 + $0x1520] sm:$0xff]  }
 0x2f4   : > { %10233 = vmatpush3.bf16.msra.mxu0 %v11121_v10 }
 0x2f5   : > { %10255 = vmatpush3.bf16.msra.mxu1 %v11122_v12  ;;  %10234 = vmatprep.subr.bf16.mxu0 %v11123_v14  ;;  %v11159_v14 = vld [vmem:[#allocation4 + $0x1568] sm:$0xff]  }
 0x2f6   : > { %10256 = vmatprep.subr.bf16.mxu1 %v11124_v17  ;;  %v11161_v17 = vld [vmem:[#allocation4 + $0x1528] sm:$0xff]  }
 0x2f8   : > { %10235 = vmatpush3.bf16.msra.mxu0 %v11125_v20  ;;  %v11164_v20 = vld [vmem:[#allocation4 + $0x15f0] sm:$0xff]  }
 0x2f9   : > { %10257 = vmatpush3.bf16.msra.mxu1 %v11126_v23  ;;  %10236 = vmatprep.subr.bf16.mxu0 %v11127_v26  ;;  %v11167_v23 = vld [vmem:[#allocation4 + $0x1578] sm:$0xff]  }
 0x2fa   : > { %v9934_v9 = vpop.f32.mrb[52].mxu0  ;;  %10258 = vmatprep.subr.bf16.mxu1 %v11128_v28  ;;  %v11170_v26 = vld [vmem:[#allocation4 + $0x15b8] sm:$0xff]  }
 0x2fb   : > { %v9956_v11 = vpop.f32.mrb[52].mxu1  ;;  %v9935_v13 = vpop.f32.mrb[53].mxu0  ;;  %v302_v28 = vld [vmem:[%s11533_s23 + $0x2b8] sm:$0xff] }
 0x2fc   : > { %v9936_v15 = vadd.f32 %v9935_v13, %v9934_v9  ;;  %v9957_v16 = vpop.f32.mrb[53].mxu1  ;;  %v9937_v19 = vpop.f32.mrb[54].mxu0  ;;  %10237 = vmatpush3.bf16.msra.mxu0 %v11129_v29  ;;  %v299_v29 = vld [vmem:[%s11533_s23 + $0x2a0] sm:$0xff] }
 0x2fd   : > { %v9958_v18 = vadd.f32 %v9957_v16, %v9956_v11  ;;  %v9959_v22 = vpop.f32.mrb[54].mxu1  ;;  %v9938_v24 = vpop.f32.mrb[55].mxu0  ;;  %10259 = vmatpush3.bf16.msra.mxu1 %v11130_v30  ;;  %10238 = vmatprep.subr.bf16.mxu0 %v11131_v31  ;;  %v11158_v11 = vld [vmem:[#allocation4 + $0x15a0] sm:$0xff]   ;;  %v11160_v16 = vld [vmem:[#allocation4 + $0x15e8] sm:$0xff]   ;;  %v11163_v19 = vld [vmem:[#allocation4 + $0x1570] sm:$0xff]   ;;  %v398_v31 = vpack.c.bf16 %v302_v28, %v302_v28 }
 0x2fe   : > { %v7626_v21 = vadd.f32 %v9936_v15, %v11655_v37  ;;  %v9960_v27 = vpop.f32.mrb[55].mxu1  ;;  %10260 = vmatprep.subr.bf16.mxu1 %v11132_v32  ;;  %v11137_v37 = vld [vmem:[#allocation4 + $0x1438] sm:$0xff]   ;;  %v11166_v22 = vld [vmem:[#allocation4 + $0x15b0] sm:$0xff]   ;;  %v395_v32 = vpack.c.bf16 %v299_v29, %v299_v29  ;;  %v11208_v28 = vld [vmem:[#allocation4 + $0x17c8] sm:$0xff]  }
 0x2ff   : > { %v11168_v24 = vld [vmem:[#allocation4 + $0x15f8] sm:$0xff]   ;;  %v300_v27 = vld [vmem:[%s11533_s23 + $0x2a8] sm:$0xff] }
 0x300   : > { %v11662_v25 = vadd.f32 %v9958_v18, %v7626_v21  ;;  %10239 = vmatpush3.bf16.msra.mxu0 %v11133_v33  ;;  %v11162_v18 = vld [vmem:[#allocation4 + $0x15a8] sm:$0xff]   ;;  %v11165_v21 = vld [vmem:[#allocation4 + $0x1530] sm:$0xff]   ;;  %v396_v30 = vpack.c.bf16 %v300_v27, %v300_v27 }
 0x301   : > { %10261 = vmatpush3.bf16.msra.mxu1 %v11134_v34  ;;  %10240 = vmatprep.subr.bf16.mxu0 %v11135_v35  ;;  %v301_v33 = vld [vmem:[%s11533_s23 + $0x2b0] sm:$0xff]  ;;  %v11171_v35 = vld [vmem:[#allocation4 + $0x1640] sm:$0xff]   ;;  %v11207_v27 = vld [vmem:[#allocation4 + $0x1748] sm:$0xff]  }
 0x302   : > { %10262 = vmatprep.subr.bf16.mxu1 %v11136_v36  ;;  %v397_v34 = vpack.c.bf16 %v301_v33, %v301_v33  ;;  %v11172_v36 = vld [vmem:[#allocation4 + $0x16c0] sm:$0xff]   ;;  %v11209_v29 = vld [vmem:[#allocation4 + $0x1708] sm:$0xff]   ;;  %v11213_v33 = vld [vmem:[#allocation4 + $0x1710] sm:$0xff]  }
 0x304   : > { %10241 = vmatpush3.bf16.msra.mxu0 %v11137_v37  ;;  %v11173_v37 = vld [vmem:[#allocation4 + $0x1600] sm:$0xff]  }
 0x305   : > { %10263 = vmatpush3.bf16.msra.mxu1 %v11138_v38  ;;  %10270 = vmatprep.subr.bf16.mxu0 %v11139_v47  ;;  %v11174_v38 = vld [vmem:[#allocation4 + $0x1680] sm:$0xff]   ;;  %v11183_v47 = vld [vmem:[#allocation4 + $0x1658] sm:$0xff]  }
 0x306   : > { %10292 = vmatprep.subr.bf16.mxu1 %v11140_v48  ;;  %v11184_v48 = vld [vmem:[#allocation4 + $0x16d8] sm:$0xff]  }
 0x307   : > { %8184 = vmatmul.mubr.bf16.vlgmr.msra.gmra.mrb[80].mxu0 %v391_v45  ;;  %v11181_v45 = vld [vmem:[#allocation4 + $0x1610] sm:$0xff]  }
 0x308   : > { %8224 = vmatmul.mubr.bf16.vlgmr.msra.gmra.mrb[80].mxu1 %v393_v46  ;;  %10271 = vmatpush3.bf16.msra.mxu0 %v11141_v49  ;;  %v11182_v46 = vld [vmem:[#allocation4 + $0x1690] sm:$0xff]  }
 0x309   : > { %10293 = vmatpush3.bf16.msra.mxu1 %v11142_v50  ;;  %10272 = vmatprep.subr.bf16.mxu0 %v11143_v51  ;;  %v11185_v50 = vld [vmem:[#allocation4 + $0x1618] sm:$0xff]  }
 0x30a   : > { %10294 = vmatprep.subr.bf16.mxu1 %v11144_v52  ;;  %8263 = vmatprep.mubr.bf16.mxu0 %v396_v30  ;;  %v11186_v52 = vld [vmem:[#allocation4 + $0x1698] sm:$0xff]   ;;  %v11210_v30 = vld [vmem:[#allocation4 + $0x1788] sm:$0xff]  }
 0x30b   : > { %8303 = vmatprep.mubr.bf16.mxu1 %v398_v31  ;;  %v11211_v31 = vld [vmem:[#allocation4 + $0x1750] sm:$0xff]  }
 0x30c   : > { %10273 = vmatpush3.bf16.msra.mxu0 %v11145_v53 }
 0x30d   : > { %10295 = vmatpush3.bf16.msra.mxu1 %v11146_v54  ;;  %10274 = vmatprep.subr.bf16.mxu0 %v11147_v55  ;;  %v11187_v54 = vld [vmem:[#allocation4 + $0x1660] sm:$0xff]  }
 0x30e   : > { %10296 = vmatprep.subr.bf16.mxu1 %v11148_v56 }
 0x310   : > { %10275 = vmatpush3.bf16.msra.mxu0 %v11149_v57  ;;  %v11188_v57 = vld [vmem:[#allocation4 + $0x16e0] sm:$0xff]  }
 0x311   : > { %10297 = vmatpush3.bf16.msra.mxu1 %v11150_v58  ;;  %10276 = vmatprep.subr.bf16.mxu0 %v11151_v59 }
 0x312   : > { %10298 = vmatprep.subr.bf16.mxu1 %v11152_v60  ;;  %v11189_v60 = vld [vmem:[#allocation4 + $0x1620] sm:$0xff]  }
 0x314   : > { %10277 = vmatpush3.bf16.msra.mxu0 %v11153_v62 }
 0x315   : > { %10299 = vmatpush3.bf16.msra.mxu1 %v11154_v0  ;;  %10278 = vmatprep.subr.bf16.mxu0 %v11155_v2  ;;  %v11191_v2 = vld [vmem:[#allocation4 + $0x1668] sm:$0xff]  }
 0x316   : > { %10300 = vmatprep.subr.bf16.mxu1 %v11156_v5  ;;  %v11193_v5 = vld [vmem:[#allocation4 + $0x1628] sm:$0xff]  }
 0x318   : > { %10279 = vmatpush3.bf16.msra.mxu0 %v11157_v8  ;;  %v11196_v8 = vld [vmem:[#allocation4 + $0x16f0] sm:$0xff]  }
 0x319   : > { %10301 = vmatpush3.bf16.msra.mxu1 %v11158_v11  ;;  %10280 = vmatprep.subr.bf16.mxu0 %v11159_v14  ;;  %v11199_v11 = vld [vmem:[#allocation4 + $0x1678] sm:$0xff]  }
 0x31a   : > { %v9978_v61 = vpop.f32.mrb[56].mxu0  ;;  %10302 = vmatprep.subr.bf16.mxu1 %v11160_v16  ;;  %v11202_v14 = vld [vmem:[#allocation4 + $0x16b8] sm:$0xff]  }
 0x31b   : > { %v10000_v63 = vpop.f32.mrb[56].mxu1  ;;  %v9979_v1 = vpop.f32.mrb[57].mxu0  ;;  %v306_v16 = vld [vmem:[%s11533_s23 + $0x2d8] sm:$0xff] }
 0x31c   : > { %v9980_v3 = vadd.f32 %v9979_v1, %v9978_v61  ;;  %v10001_v4 = vpop.f32.mrb[57].mxu1  ;;  %v9981_v7 = vpop.f32.mrb[58].mxu0  ;;  %10281 = vmatpush3.bf16.msra.mxu0 %v11161_v17 }
 0x31d   : > { %v10002_v6 = vadd.f32 %v10001_v4, %v10000_v63  ;;  %v10003_v10 = vpop.f32.mrb[58].mxu1  ;;  %v9982_v12 = vpop.f32.mrb[59].mxu0  ;;  %10303 = vmatpush3.bf16.msra.mxu1 %v11162_v18  ;;  %10282 = vmatprep.subr.bf16.mxu0 %v11163_v19  ;;  %v11190_v63 = vld [vmem:[#allocation4 + $0x16a0] sm:$0xff]   ;;  %v11192_v4 = vld [vmem:[#allocation4 + $0x16e8] sm:$0xff]   ;;  %v11195_v7 = vld [vmem:[#allocation4 + $0x1670] sm:$0xff]   ;;  %v402_v18 = vpack.c.bf16 %v306_v16, %v306_v16 }
 0x31e   : > { %v7706_v9 = vadd.f32 %v9980_v3, %v11662_v25  ;;  %v10004_v15 = vpop.f32.mrb[59].mxu1  ;;  %10304 = vmatprep.subr.bf16.mxu1 %v11164_v20  ;;  %v11169_v25 = vld [vmem:[#allocation4 + $0x1538] sm:$0xff]   ;;  %v11198_v10 = vld [vmem:[#allocation4 + $0x16b0] sm:$0xff]   ;;  %v303_v19 = vld [vmem:[%s11533_s23 + $0x2c0] sm:$0xff] }
 0x31f   : > { %v11200_v12 = vld [vmem:[#allocation4 + $0x16f8] sm:$0xff]   ;;  %v304_v15 = vld [vmem:[%s11533_s23 + $0x2c8] sm:$0xff]  ;;  %v305_v20 = vld [vmem:[%s11533_s23 + $0x2d0] sm:$0xff] }
 0x320   : > { %v11669_v13 = vadd.f32 %v10002_v6, %v7706_v9  ;;  %10283 = vmatpush3.bf16.msra.mxu0 %v11165_v21  ;;  %v11194_v6 = vld [vmem:[#allocation4 + $0x16a8] sm:$0xff]   ;;  %v11197_v9 = vld [vmem:[#allocation4 + $0x1630] sm:$0xff]   ;;  %v400_v17 = vpack.c.bf16 %v304_v15, %v304_v15  ;;  %v399_v21 = vpack.c.bf16 %v303_v19, %v303_v19 }
 0x321   : > { %10305 = vmatpush3.bf16.msra.mxu1 %v11166_v22  ;;  %10284 = vmatprep.subr.bf16.mxu0 %v11167_v23  ;;  %v401_v22 = vpack.c.bf16 %v305_v20, %v305_v20  ;;  %v11203_v23 = vld [vmem:[#allocation4 + $0x1740] sm:$0xff]  }
 0x322   : > { %10306 = vmatprep.subr.bf16.mxu1 %v11168_v24  ;;  %v11204_v24 = vld [vmem:[#allocation4 + $0x17c0] sm:$0xff]  }
 0x324   : > { %10285 = vmatpush3.bf16.msra.mxu0 %v11169_v25  ;;  %v11205_v25 = vld [vmem:[#allocation4 + $0x1700] sm:$0xff]  }
 0x325   : > { %10307 = vmatpush3.bf16.msra.mxu1 %v11170_v26  ;;  %10314 = vmatprep.subr.bf16.mxu0 %v11171_v35  ;;  %v11206_v26 = vld [vmem:[#allocation4 + $0x1780] sm:$0xff]   ;;  %v11215_v35 = vld [vmem:[#allocation4 + $0x1758] sm:$0xff]  }
 0x326   : > { %10336 = vmatprep.subr.bf16.mxu1 %v11172_v36  ;;  %v11216_v36 = vld [vmem:[#allocation4 + $0x17d8] sm:$0xff]  }
 0x327   : > { %8264 = vmatmul.mubr.bf16.vlgmr.msra.gmra.mrb[84].mxu0 %v395_v32  ;;  %v11212_v32 = vld [vmem:[#allocation4 + $0x17d0] sm:$0xff]  }
 0x328   : > { %8304 = vmatmul.mubr.bf16.vlgmr.msra.gmra.mrb[84].mxu1 %v397_v34  ;;  %10315 = vmatpush3.bf16.msra.mxu0 %v11173_v37  ;;  %v11214_v34 = vld [vmem:[#allocation4 + $0x1790] sm:$0xff]  }
 0x329   : > { %10337 = vmatpush3.bf16.msra.mxu1 %v11174_v38  ;;  %10316 = vmatprep.subr.bf16.mxu0 %v11175_v39  ;;  %v11217_v38 = vld [vmem:[#allocation4 + $0x1718] sm:$0xff]  }
 0x32a   : > { %10338 = vmatprep.subr.bf16.mxu1 %v11176_v40  ;;  %8343 = vmatprep.mubr.bf16.mxu0 %v400_v17  ;;  %v11218_v40 = vld [vmem:[#allocation4 + $0x1798] sm:$0xff]  }
 0x32b   : > { %8383 = vmatprep.mubr.bf16.mxu1 %v402_v18 }
 0x32c   : > { %10317 = vmatpush3.bf16.msra.mxu0 %v11177_v41 }
 0x32d   : > { %10339 = vmatpush3.bf16.msra.mxu1 %v11178_v42  ;;  %10318 = vmatprep.subr.bf16.mxu0 %v11179_v43  ;;  %v11219_v42 = vld [vmem:[#allocation4 + $0x1760] sm:$0xff]  }
 0x32e   : > { %10340 = vmatprep.subr.bf16.mxu1 %v11180_v44 }
 0x330   : > { %10319 = vmatpush3.bf16.msra.mxu0 %v11181_v45  ;;  %v11220_v45 = vld [vmem:[#allocation4 + $0x17e0] sm:$0xff]  }
 0x331   : > { %10341 = vmatpush3.bf16.msra.mxu1 %v11182_v46  ;;  %10320 = vmatprep.subr.bf16.mxu0 %v11183_v47 }
 0x332   : > { %10342 = vmatprep.subr.bf16.mxu1 %v11184_v48  ;;  %v11221_v48 = vld [vmem:[#allocation4 + $0x1720] sm:$0xff]  }
 0x334   : > { %10321 = vmatpush3.bf16.msra.mxu0 %v11185_v50 }
 0x335   : > { %10343 = vmatpush3.bf16.msra.mxu1 %v11186_v52  ;;  %10322 = vmatprep.subr.bf16.mxu0 %v11187_v54  ;;  %v11223_v54 = vld [vmem:[#allocation4 + $0x1768] sm:$0xff]  }
 0x336   : > { %10344 = vmatprep.subr.bf16.mxu1 %v11188_v57  ;;  %v11225_v57 = vld [vmem:[#allocation4 + $0x1728] sm:$0xff]  }
 0x338   : > { %10323 = vmatpush3.bf16.msra.mxu0 %v11189_v60  ;;  %v11228_v60 = vld [vmem:[#allocation4 + $0x17f0] sm:$0xff]  }
 0x339   : > { %10345 = vmatpush3.bf16.msra.mxu1 %v11190_v63  ;;  %10324 = vmatprep.subr.bf16.mxu0 %v11191_v2  ;;  %v11231_v63 = vld [vmem:[#allocation4 + $0x1778] sm:$0xff]  }
 0x33a   : > { %v10022_v49 = vpop.f32.mrb[60].mxu0  ;;  %10346 = vmatprep.subr.bf16.mxu1 %v11192_v4  ;;  %v11234_v2 = vld [vmem:[#allocation4 + $0x17b8] sm:$0xff]  }
 0x33b   : > { %v10044_v51 = vpop.f32.mrb[60].mxu1  ;;  %v10023_v53 = vpop.f32.mrb[61].mxu0 }
 0x33c   : > { %v10024_v55 = vadd.f32 %v10023_v53, %v10022_v49  ;;  %v10045_v56 = vpop.f32.mrb[61].mxu1  ;;  %v10025_v59 = vpop.f32.mrb[62].mxu0  ;;  %10325 = vmatpush3.bf16.msra.mxu0 %v11193_v5  ;;  %v310_v5 = vld [vmem:[%s11533_s23 + $0x2f8] sm:$0xff] }
 0x33d   : > { %v10046_v58 = vadd.f32 %v10045_v56, %v10044_v51  ;;  %v10047_v62 = vpop.f32.mrb[62].mxu1  ;;  %v10026_v0 = vpop.f32.mrb[63].mxu0  ;;  %10347 = vmatpush3.bf16.msra.mxu1 %v11194_v6  ;;  %10326 = vmatprep.subr.bf16.mxu0 %v11195_v7  ;;  %v11222_v51 = vld [vmem:[#allocation4 + $0x17a0] sm:$0xff]   ;;  %v11224_v56 = vld [vmem:[#allocation4 + $0x17e8] sm:$0xff]   ;;  %v11227_v59 = vld [vmem:[#allocation4 + $0x1770] sm:$0xff]  }
 0x33e   : > { %v7786_v61 = vadd.f32 %v10024_v55, %v11669_v13  ;;  %v10048_v3 = vpop.f32.mrb[63].mxu1  ;;  %10348 = vmatprep.subr.bf16.mxu1 %v11196_v8  ;;  %v11201_v13 = vld [vmem:[#allocation4 + $0x1638] sm:$0xff]   ;;  %v11230_v62 = vld [vmem:[#allocation4 + $0x17b0] sm:$0xff]   ;;  %v307_v6 = vld [vmem:[%s11533_s23 + $0x2e0] sm:$0xff]  ;;  %v406_v8 = vpack.c.bf16 %v310_v5, %v310_v5 }
 0x33f   : > { %v11232_v0 = vld [vmem:[#allocation4 + $0x17f8] sm:$0xff]   ;;  %v308_v3 = vld [vmem:[%s11533_s23 + $0x2e8] sm:$0xff]  ;;  %v309_v7 = vld [vmem:[%s11533_s23 + $0x2f0] sm:$0xff] }
 0x340   : > { %v11676_v1 = vadd.f32 %v10046_v58, %v7786_v61  ;;  %10327 = vmatpush3.bf16.msra.mxu0 %v11197_v9  ;;  %v11226_v58 = vld [vmem:[#allocation4 + $0x17a8] sm:$0xff]   ;;  %v11229_v61 = vld [vmem:[#allocation4 + $0x1730] sm:$0xff]   ;;  %v404_v4 = vpack.c.bf16 %v308_v3, %v308_v3  ;;  %v403_v9 = vpack.c.bf16 %v307_v6, %v307_v6 }
 0x341   : > { %10349 = vmatpush3.bf16.msra.mxu1 %v11198_v10  ;;  %10328 = vmatprep.subr.bf16.mxu0 %v11199_v11  ;;  %v405_v10 = vpack.c.bf16 %v309_v7, %v309_v7 }
 0x342   : > { %10350 = vmatprep.subr.bf16.mxu1 %v11200_v12 }
 0x344   : > { %10329 = vmatpush3.bf16.msra.mxu0 %v11201_v13 }
 0x345   : > { %10351 = vmatpush3.bf16.msra.mxu1 %v11202_v14  ;;  %10358 = vmatprep.subr.bf16.mxu0 %v11203_v23 }
 0x346   : > { %10380 = vmatprep.subr.bf16.mxu1 %v11204_v24 }
 0x347   : > { %8344 = vmatmul.mubr.bf16.vlgmr.msra.gmra.mrb[88].mxu0 %v399_v21 }
 0x348   : > { %8384 = vmatmul.mubr.bf16.vlgmr.msra.gmra.mrb[88].mxu1 %v401_v22  ;;  %10359 = vmatpush3.bf16.msra.mxu0 %v11205_v25 }
 0x349   : > { %10381 = vmatpush3.bf16.msra.mxu1 %v11206_v26  ;;  %10360 = vmatprep.subr.bf16.mxu0 %v11207_v27 }
 0x34a   : > { %10382 = vmatprep.subr.bf16.mxu1 %v11208_v28  ;;  %8423 = vmatprep.mubr.bf16.mxu0 %v404_v4 }
 0x34b   : > { %8463 = vmatprep.mubr.bf16.mxu1 %v406_v8 }
 0x34c   : > { %10361 = vmatpush3.bf16.msra.mxu0 %v11209_v29 }
 0x34d   : > { %10383 = vmatpush3.bf16.msra.mxu1 %v11210_v30  ;;  %10362 = vmatprep.subr.bf16.mxu0 %v11211_v31 }
 0x34e   : > { %10384 = vmatprep.subr.bf16.mxu1 %v11212_v32 }
 0x350   : > { %10363 = vmatpush3.bf16.msra.mxu0 %v11213_v33 }
 0x351   : > { %10385 = vmatpush3.bf16.msra.mxu1 %v11214_v34  ;;  %10364 = vmatprep.subr.bf16.mxu0 %v11215_v35 }
 0x352   : > { %10386 = vmatprep.subr.bf16.mxu1 %v11216_v36 }
 0x354   : > { %10365 = vmatpush3.bf16.msra.mxu0 %v11217_v38 }
 0x355   : > { %10387 = vmatpush3.bf16.msra.mxu1 %v11218_v40  ;;  %10366 = vmatprep.subr.bf16.mxu0 %v11219_v42 }
 0x356   : > { %10388 = vmatprep.subr.bf16.mxu1 %v11220_v45 }
 0x358   : > { %10367 = vmatpush3.bf16.msra.mxu0 %v11221_v48 }
 0x359   : > { %10389 = vmatpush3.bf16.msra.mxu1 %v11222_v51  ;;  %10368 = vmatprep.subr.bf16.mxu0 %v11223_v54 }
 0x35a   : > { %v10066_v37 = vpop.f32.mrb[64].mxu0  ;;  %10390 = vmatprep.subr.bf16.mxu1 %v11224_v56 }
 0x35b   : > { %v10088_v39 = vpop.f32.mrb[64].mxu1  ;;  %v10067_v41 = vpop.f32.mrb[65].mxu0 }
 0x35c   : > { %v10068_v43 = vadd.f32 %v10067_v41, %v10066_v37  ;;  %v10089_v44 = vpop.f32.mrb[65].mxu1  ;;  %v10069_v47 = vpop.f32.mrb[66].mxu0  ;;  %10369 = vmatpush3.bf16.msra.mxu0 %v11225_v57 }
 0x35d   : > { %v10090_v46 = vadd.f32 %v10089_v44, %v10088_v39  ;;  %v10091_v50 = vpop.f32.mrb[66].mxu1  ;;  %v10070_v52 = vpop.f32.mrb[67].mxu0  ;;  %10391 = vmatpush3.bf16.msra.mxu1 %v11226_v58  ;;  %10370 = vmatprep.subr.bf16.mxu0 %v11227_v59 }
 0x35e   : > { %v7866_v49 = vadd.f32 %v10068_v43, %v11676_v1  ;;  %v10092_v55 = vpop.f32.mrb[67].mxu1  ;;  %10392 = vmatprep.subr.bf16.mxu1 %v11228_v60  ;;  %v11233_v1 = vld [vmem:[#allocation4 + $0x1738] sm:$0xff]  }
 0x360   : > { %v7906_v53 = vadd.f32 %v10090_v46, %v7866_v49  ;;  %10371 = vmatpush3.bf16.msra.mxu0 %v11229_v61 }
 0x361   : > { %10393 = vmatpush3.bf16.msra.mxu1 %v11230_v62  ;;  %10372 = vmatprep.subr.bf16.mxu0 %v11231_v63 }
 0x362   : > { %10394 = vmatprep.subr.bf16.mxu1 %v11232_v0 }
 0x364   : > { %10373 = vmatpush3.bf16.msra.mxu0 %v11233_v1 }
 0x365   : > { %10395 = vmatpush3.bf16.msra.mxu1 %v11234_v2 }
 0x367   : > { %8424 = vmatmul.mubr.bf16.vlgmr.msra.gmra.mrb[92].mxu0 %v403_v9 }
 0x368   : > { %8464 = vmatmul.mubr.bf16.vlgmr.msra.gmra.mrb[92].mxu1 %v405_v10 }
 0x37a   : > { %v10110_v11 = vpop.f32.mrb[68].mxu0 }
 0x37b   : > { %v10132_v12 = vpop.f32.mrb[68].mxu1  ;;  %v10111_v13 = vpop.f32.mrb[69].mxu0 }
 0x37c   : > { %v10112_v14 = vadd.f32 %v10111_v13, %v10110_v11  ;;  %v10133_v15 = vpop.f32.mrb[69].mxu1  ;;  %v10113_v16 = vpop.f32.mrb[70].mxu0 }
 0x37d   : > { %v10134_v17 = vadd.f32 %v10133_v15, %v10132_v12  ;;  %v10135_v18 = vpop.f32.mrb[70].mxu1  ;;  %v10114_v19 = vpop.f32.mrb[71].mxu0 }
 0x37e   : > { %v7946_v20 = vadd.f32 %v10112_v14, %v7906_v53  ;;  %v10136_v21 = vpop.f32.mrb[71].mxu1 }
 0x380   : > { %v7986_v22 = vadd.f32 %v10134_v17, %v7946_v20 }
 0x39a   : > { %v10154_v23 = vpop.f32.mrb[72].mxu0 }
 0x39b   : > { %v10176_v24 = vpop.f32.mrb[72].mxu1  ;;  %v10155_v25 = vpop.f32.mrb[73].mxu0 }
 0x39c   : > { %v10177_v26 = vpop.f32.mrb[73].mxu1  ;;  %v10156_v27 = vadd.f32 %v10155_v25, %v10154_v23  ;;  %v10157_v29 = vpop.f32.mrb[74].mxu0 }
 0x39d   : > { %v10178_v28 = vadd.f32 %v10177_v26, %v10176_v24  ;;  %v10179_v30 = vpop.f32.mrb[74].mxu1  ;;  %v10158_v31 = vpop.f32.mrb[75].mxu0 }
 0x39e   : > { %v10180_v32 = vpop.f32.mrb[75].mxu1  ;;  %v8026_v33 = vadd.f32 %v10156_v27, %v7986_v22  ;;  %v9343_v30 = vld [vmem:[#allocation6] ss:$0 sm:$0xff] }
 0x3a0   : > { %v8066_v34 = vadd.f32 %v10178_v28, %v8026_v33 }
 0x3ba   : > { %v10198_v35 = vpop.f32.mrb[76].mxu0 }
 0x3bb   : > { %v10220_v36 = vpop.f32.mrb[76].mxu1  ;;  %v10199_v37 = vpop.f32.mrb[77].mxu0 }
 0x3bc   : > { %v10200_v38 = vadd.f32 %v10199_v37, %v10198_v35  ;;  %v10221_v39 = vpop.f32.mrb[77].mxu1  ;;  %v10201_v40 = vpop.f32.mrb[78].mxu0 }
 0x3bd   : > { %v10222_v41 = vadd.f32 %v10221_v39, %v10220_v36  ;;  %v10223_v42 = vpop.f32.mrb[78].mxu1  ;;  %v10202_v43 = vpop.f32.mrb[79].mxu0 }
 0x3be   : > { %v8106_v44 = vadd.f32 %v10200_v38, %v8066_v34  ;;  %v10224_v45 = vpop.f32.mrb[79].mxu1 }
 0x3c0   : > { %v8146_v46 = vadd.f32 %v10222_v41, %v8106_v44 }
 0x3da   : > { %v10242_v47 = vpop.f32.mrb[80].mxu0 }
 0x3db   : > { %v10264_v48 = vpop.f32.mrb[80].mxu1  ;;  %v10243_v49 = vpop.f32.mrb[81].mxu0 }
 0x3dc   : > { %v10244_v50 = vadd.f32 %v10243_v49, %v10242_v47  ;;  %v10265_v51 = vpop.f32.mrb[81].mxu1  ;;  %v10245_v52 = vpop.f32.mrb[82].mxu0 }
 0x3dd   : > { %v10266_v53 = vadd.f32 %v10265_v51, %v10264_v48  ;;  %v10267_v54 = vpop.f32.mrb[82].mxu1  ;;  %v10246_v55 = vpop.f32.mrb[83].mxu0 }
 0x3de   : > { %v8186_v56 = vadd.f32 %v10244_v50, %v8146_v46  ;;  %v10268_v57 = vpop.f32.mrb[83].mxu1 }
 0x3e0   : > { %v8226_v58 = vadd.f32 %v10266_v53, %v8186_v56 }
 0x3fa   : > { %v10286_v59 = vpop.f32.mrb[84].mxu0 }
 0x3fb   : > { %v10308_v60 = vpop.f32.mrb[84].mxu1  ;;  %v10287_v61 = vpop.f32.mrb[85].mxu0 }
 0x3fc   : > { %v10309_v62 = vpop.f32.mrb[85].mxu1  ;;  %v10288_v63 = vadd.f32 %v10287_v61, %v10286_v59  ;;  %v10289_v1 = vpop.f32.mrb[86].mxu0 }
 0x3fd   : > { %v10310_v0 = vadd.f32 %v10309_v62, %v10308_v60  ;;  %v10311_v2 = vpop.f32.mrb[86].mxu1  ;;  %v10290_v3 = vpop.f32.mrb[87].mxu0 }
 0x3fe   : > { %v10312_v4 = vpop.f32.mrb[87].mxu1  ;;  %v8266_v5 = vadd.f32 %v10288_v63, %v8226_v58 }
 0x400   : > { %v8306_v6 = vadd.f32 %v10310_v0, %v8266_v5 }
 0x41a   : > { %v10330_v7 = vpop.f32.mrb[88].mxu0 }
 0x41b   : > { %v10352_v8 = vpop.f32.mrb[88].mxu1  ;;  %v10331_v9 = vpop.f32.mrb[89].mxu0 }
 0x41c   : > { %v10332_v10 = vadd.f32 %v10331_v9, %v10330_v7  ;;  %v10353_v11 = vpop.f32.mrb[89].mxu1  ;;  %v10333_v12 = vpop.f32.mrb[90].mxu0 }
 0x41d   : > { %v10354_v13 = vadd.f32 %v10353_v11, %v10352_v8  ;;  %v10355_v14 = vpop.f32.mrb[90].mxu1  ;;  %v10334_v15 = vpop.f32.mrb[91].mxu0 }
 0x41e   : > { %v8346_v16 = vadd.f32 %v10332_v10, %v8306_v6  ;;  %v10356_v17 = vpop.f32.mrb[91].mxu1 }
 0x420   : > { %v8386_v18 = vadd.f32 %v10354_v13, %v8346_v16 }
 0x43a   : > { %v10374_v19 = vpop.f32.mrb[92].mxu0 }
 0x43b   : > { %v10396_v20 = vpop.f32.mrb[92].mxu1  ;;  %v10375_v21 = vpop.f32.mrb[93].mxu0 }
 0x43c   : > { %v10376_v22 = vadd.f32 %v10375_v21, %v10374_v19  ;;  %v10397_v23 = vpop.f32.mrb[93].mxu1  ;;  %v10377_v24 = vpop.f32.mrb[94].mxu0 }
 0x43d   : > { %v10398_v25 = vadd.f32 %v10397_v23, %v10396_v20  ;;  %v10399_v26 = vpop.f32.mrb[94].mxu1  ;;  %v10378_v27 = vpop.f32.mrb[95].mxu0 }
 0x43e   : > { %v8426_v28 = vadd.f32 %v10376_v22, %v8386_v18  ;;  %v10400_v29 = vpop.f32.mrb[95].mxu1 }
 0x440   : > { %v8466_v31 = vadd.f32 %v10398_v25, %v8426_v28 }
 0x442   : > { %v8478_v32 = vadd.f32 %v9343_v30, %v8466_v31 }
 0x444   : > { %8480 = vst.msk [vmem:[%s213_s8] sm:$0xff] %vm8479_vm0, %v8478_v32 }
 0x445 PF: > { %p14_p9 = scmp.ge.s32.totalorder %s11480_s28, 5   ;;  %s11720_s12 = smov %s11351_s13 }
 0x446   : > { %s11721_s13 = smov %s11355_s14  ;;  %s11722_s14 = smov %s11491_s4 }
 0x447   : > { %s11723_s15 = smov %s11480_s28  ;;  %16 = sbr.rel (!%p14_p9) target bundleno = 4 (0x4), region = 80 }
 0x44e   :  { %8500 = vsyncpa [#allocation3], 1 }
 0x44f   :  { %8502 = vsyncpa [#allocation3 + $0x1], 1 }
 0x450   :  { %8503 = vsyncpa [#allocation5], 1 }

</bundles_post_ra>
